<compile_context>
chip_gen: v7x
topology: tpu7x:2x2x1
jax: 0.10.0
libtpu: 0.0.40
codegen_flags: <defaults>
</compile_context>

<pallas_src>
import functools

import jax
import jax.numpy as jnp
from jax.experimental import pallas as pl
from jax.experimental.pallas import tpu as pltpu


def _full_spec(shape):
    zeros = (0,) * len(shape)
    return pl.BlockSpec(shape, lambda i: zeros)


_ARB = pltpu.CompilerParams(dimension_semantics=("arbitrary",))


# ----------------------------------------------------------------------------
# Kernel 1 (prep): masked adjacency + fused GRU1 input weight
#   masked_adj = adj * softmax(mask_mat, axis=1)
#   Wprime     = masked_adj @ W_ih(GRU1)        (so gi1 = x @ Wprime + b_ih)
# ----------------------------------------------------------------------------
def _prep_kernel(mask_ref, adj_ref, wih1_ref, madj_ref, wprime_ref):
    mvals = mask_ref[...]
    mmax = jnp.max(mvals, axis=1, keepdims=True)
    e = jnp.exp(mvals - mmax)
    soft = e / jnp.sum(e, axis=1, keepdims=True)
    madj = adj_ref[...] * soft
    madj_ref[...] = madj
    wprime_ref[...] = jnp.dot(madj, wih1_ref[...],
                              preferred_element_type=jnp.float32)


def prep_masked_adj(mask_mat, adj, gru1_wih):
    m = mask_mat.shape[0]
    h3 = gru1_wih.shape[1]
    return pl.pallas_call(
        _prep_kernel,
        out_shape=(jax.ShapeDtypeStruct((m, m), jnp.float32),
                   jax.ShapeDtypeStruct((m, h3), jnp.float32)),
        grid=(1,),
        in_specs=[_full_spec((m, m)), _full_spec((m, m)), _full_spec((m, h3))],
        out_specs=(_full_spec((m, m)), _full_spec((m, h3))),
        compiler_params=_ARB,
    )(mask_mat, adj, gru1_wih)


# ----------------------------------------------------------------------------
# Kernel 2 (deep branch): GRU1 + linear1 + residual-combine + output activation
#   x2d: (P*b, m) sequence-major (row = t*b + batch).
#   gi for ALL timesteps computed as one matmul; only h@W_hh is in the loop.
# ----------------------------------------------------------------------------
def _make_deep_kernel(P, b, m, H, has_res, ratio, activation):
    def kernel(*refs):
        if has_res:
            (x_ref, wprime_ref, bih_ref, whh_ref, bhh_ref,
             linw_ref, linb_ref, z_ref, out_ref) = refs
        else:
            (x_ref, wprime_ref, bih_ref, whh_ref, bhh_ref,
             linw_ref, linb_ref, out_ref) = refs

        x2d = x_ref[...]                                       # (P*b, m)
        # One MXU matmul for the whole sequence's input projection.
        gi = jnp.dot(x2d, wprime_ref[...],
                     preferred_element_type=jnp.float32) + bih_ref[...]   # (P*b, 3H)

        whh = whh_ref[...]                                     # (H, 3H), loaded once
        bhh = bhh_ref[...]                                     # (1, 3H), loaded once

        h = jnp.zeros((b, H), jnp.float32)
        for t in range(P):                                     # fully unrolled recurrence
            gi_t = gi[t * b:(t + 1) * b, :]                    # (b, 3H), static slice
            gh = jnp.dot(h, whh, preferred_element_type=jnp.float32) + bhh
            r = jax.nn.sigmoid(gi_t[:, 0:H] + gh[:, 0:H])
            zg = jax.nn.sigmoid(gi_t[:, H:2 * H] + gh[:, H:2 * H])
            n = jnp.tanh(gi_t[:, 2 * H:3 * H] + r * gh[:, 2 * H:3 * H])
            h = (1.0 - zg) * n + zg * h

        # Epilogue: linear1 (dropout is identity in eval), residual combine, act.
        res = jnp.dot(h, linw_ref[...],
                      preferred_element_type=jnp.float32) + linb_ref[...]   # (b, m)
        if has_res:
            res = res * ratio + z_ref[...]
        if activation == "sigmoid":
            res = jax.nn.sigmoid(res)
        elif activation == "tanh":
            res = jnp.tanh(res)
        out_ref[...] = res

    return kernel


def deep_branch(x2d, wprime, bih, whh, bhh, lin_w, lin_b, z, *,
                batch, ratio, output_fun):
    Pb, m = x2d.shape
    b = batch
    P = Pb // b
    H = whh.shape[0]
    has_res = z is not None
    kernel = _make_deep_kernel(P, b, m, H, has_res, ratio, output_fun)
    in_specs = [_full_spec(x2d.shape), _full_spec(wprime.shape),
                _full_spec(bih.shape), _full_spec(whh.shape),
                _full_spec(bhh.shape), _full_spec(lin_w.shape),
                _full_spec(lin_b.shape)]
    args = [x2d, wprime, bih, whh, bhh, lin_w, lin_b]
    if has_res:
        in_specs.append(_full_spec(z.shape))
        args.append(z)
    return pl.pallas_call(
        kernel,
        out_shape=jax.ShapeDtypeStruct((b, m), jnp.float32),
        grid=(1,),
        in_specs=in_specs,
        out_specs=_full_spec((b, m)),
        compiler_params=_ARB,
    )(*args)


# ----------------------------------------------------------------------------
# Kernel 3 (epi branch): fused GRU2+GRU3 recurrence + Beta/Gamma heads.
#   gi:      (P, B2, 6H) precomputed input projection, gates interleaved
#            [r2, r3, z2, z3, n2, n3].
#   whh_bd:  (2H, 6H) block-diagonal recurrent weights; h carried as (B2, 2H)
#            = [h2 | h3], so one matmul drives both recurrences.
# ----------------------------------------------------------------------------
def _make_epi_kernel(P, B2, H):
    HH = 2 * H

    def kernel(gi_ref, whh_ref, bhh_ref,
               pbw1_ref, pbb1_ref, pbw2_ref, pbb2_ref,
               pgw1_ref, pgb1_ref, pgw2_ref, pgb2_ref,
               beta_ref, gamma_ref):
        whh = whh_ref[...]                                     # (2H, 6H)
        bhh = bhh_ref[...]                                     # (1, 6H)

        h = jnp.zeros((B2, HH), jnp.float32)
        for t in range(P):                                     # fully unrolled
            gi_t = gi_ref[t]                                   # (B2, 6H)
            gh = jnp.dot(h, whh, preferred_element_type=jnp.float32) + bhh
            r = jax.nn.sigmoid(gi_t[:, 0:HH] + gh[:, 0:HH])
            z = jax.nn.sigmoid(gi_t[:, HH:2 * HH] + gh[:, HH:2 * HH])
            n = jnp.tanh(gi_t[:, 2 * HH:3 * HH] + r * gh[:, 2 * HH:3 * HH])
            h = (1.0 - z) * n + z * h

        h2 = h[:, 0:H]                                         # GRU2 final hidden
        h3 = h[:, H:HH]                                        # GRU3 final hidden

        # PredBeta: Linear(H,5) -> ReLU -> Linear(5,1) -> Sigmoid
        bh = jnp.maximum(jnp.dot(h2, pbw1_ref[...],
                                 preferred_element_type=jnp.float32) + pbb1_ref[...], 0.0)
        beta = jax.nn.sigmoid(
            jnp.sum(bh * pbw2_ref[...], axis=1, keepdims=True) + pbb2_ref[...])
        # PredGamma
        gh2 = jnp.maximum(jnp.dot(h3, pgw1_ref[...],
                                  preferred_element_type=jnp.float32) + pgb1_ref[...], 0.0)
        gamma = jax.nn.sigmoid(
            jnp.sum(gh2 * pgw2_ref[...], axis=1, keepdims=True) + pgb2_ref[...])

        beta_ref[...] = beta
        gamma_ref[...] = gamma

    return kernel


def epi_branch(gi, whh_bd, bhh_cat, pb_w1, pb_b1, pb_w2t, pb_b2,
               pg_w1, pg_b1, pg_w2t, pg_b2):
    P, B2, _ = gi.shape
    H = pb_w1.shape[0]
    kernel = _make_epi_kernel(P, B2, H)
    args = [gi, whh_bd, bhh_cat, pb_w1, pb_b1, pb_w2t, pb_b2,
            pg_w1, pg_b1, pg_w2t, pg_b2]
    in_specs = [_full_spec(a.shape) for a in args]
    return pl.pallas_call(
        kernel,
        out_shape=(jax.ShapeDtypeStruct((B2, 1), jnp.float32),
                   jax.ShapeDtypeStruct((B2, 1), jnp.float32)),
        grid=(1,),
        in_specs=in_specs,
        out_specs=(_full_spec((B2, 1)), _full_spec((B2, 1))),
        compiler_params=_ARB,
    )(*args)


# ----------------------------------------------------------------------------
# Full forward pass (matches Model.forward semantics)
# ----------------------------------------------------------------------------
@functools.partial(jax.jit, static_argnames=("residual_window", "output_fun", "ratio"))
def model_forward(x, params, adj, *, ratio, residual_window, output_fun):
    b, P, m = x.shape
    H = params["gru1_whh"].shape[0]
    rw = residual_window

    # K1: masked adjacency + fused GRU1 input weight.
    masked_adj, wprime = prep_masked_adj(params["mask_mat"], adj, params["gru1_wih"])

    # ---- Deep branch (K2) --------------------------------------------------
    x_seq = jnp.transpose(x, (1, 0, 2))                 # (P, b, m) sequence-major
    x2d = x_seq.reshape(P * b, m)                       # row = t*b + batch
    if rw > 0:
        z_in = jnp.transpose(x[:, P - rw:, :], (0, 2, 1)).reshape(b * m, rw)
        z = (z_in @ params["res_w"] + params["res_b"]).reshape(b, m)
    else:
        z = None
    res = deep_branch(x2d, wprime, params["gru1_bih"], params["gru1_whh"],
                      params["gru1_bhh"], params["lin1_w"], params["lin1_b"], z,
                      batch=b, ratio=ratio, output_fun=output_fun)

    # ---- Epi branch (K3): build fused GRU2+GRU3 weight layout --------------
    B2 = b * m
    x_epi_seq = x_seq.reshape(P, B2)                    # (P, b*m), series = (batch, loc)

    def split_gates(a):                                 # (..., 3H) -> r, z, n
        return a[..., :H], a[..., H:2 * H], a[..., 2 * H:]

    r2w, z2w, n2w = split_gates(params["gru2_wih"])     # each (1, H)
    r3w, z3w, n3w = split_gates(params["gru3_wih"])
    wih_cat = jnp.concatenate([r2w, r3w, z2w, z3w, n2w, n3w], axis=-1)   # (1, 6H)
    r2b, z2b, n2b = split_gates(params["gru2_bih"])
    r3b, z3b, n3b = split_gates(params["gru3_bih"])
    bih_cat = jnp.concatenate([r2b, r3b, z2b, z3b, n2b, n3b], axis=-1)   # (1, 6H)
    r2h, z2h, n2h = split_gates(params["gru2_bhh"])
    r3h, z3h, n3h = split_gates(params["gru3_bhh"])
    bhh_cat = jnp.concatenate([r2h, r3h, z2h, z3h, n2h, n3h], axis=-1)   # (1, 6H)

    w2r, w2z, w2n = split_gates(params["gru2_whh"])     # each (H, H)
    w3r, w3z, w3n = split_gates(params["gru3_whh"])
    zH = jnp.zeros((H, H), jnp.float32)
    whh_bd = jnp.concatenate([
        jnp.concatenate([w2r, zH, w2z, zH, w2n, zH], axis=1),
        jnp.concatenate([zH, w3r, zH, w3z, zH, w3n], axis=1),
    ], axis=0)                                          # (2H, 6H) block-diagonal

    # In=1 input projection is a broadcast multiply; one pass in XLA.
    gi_epi = (x_epi_seq[:, :, None] * wih_cat.reshape(1, 1, 6 * H)
              + bih_cat.reshape(1, 1, 6 * H))           # (P, B2, 6H)

    beta_col, gamma_col = epi_branch(
        gi_epi, whh_bd, bhh_cat,
        params["pb_w1"], params["pb_b1"], params["pb_w2"].reshape(1, 5), params["pb_b2"],
        params["pg_w1"], params["pg_b1"], params["pg_w2"].reshape(1, 5), params["pg_b2"])
    Beta = beta_col.reshape(b, m)
    Gamma = gamma_col.reshape(b, m)

    # ---- NGM / EpiOutput (plain JAX glue) -----------------------------------
    diag_vals = jnp.diag(jnp.diagonal(masked_adj))
    W = jnp.diag(jnp.sum(masked_adj, axis=0)) - diag_vals
    A_single = masked_adj.T - diag_vals - W
    A = jnp.broadcast_to(A_single, (b, m, m))
    GammaDiag = jax.vmap(jnp.diag)(Gamma)
    tmp1 = jnp.minimum(GammaDiag - A, 1.0)              # tmp1[tmp1 > 1] = 1
    # TODO(synk): batched m x m matrix inverse has no clean Pallas primitive; plain JAX.
    inv_tmp1 = jnp.linalg.inv(tmp1)
    NGM = Beta[:, :, None] * inv_tmp1                   # BetaDiag.bmm(tmp1.inverse())
    x_last = x[:, -1, :]                                # (b, m)
    EpiOutput = jnp.einsum("bk,bjk->bj", x_last, NGM)   # X_vector_t.bmm(NGM^T)

    return res, EpiOutput, Beta, Gamma, NGM


# ----------------------------------------------------------------------------
# Deterministic parameter init (shapes from Model.__init__; PyTorch layout,
# weights stored transposed, gate order [r, z, n])
# ----------------------------------------------------------------------------
def init_params(key, m, hidR, residual_window):
    ks = jax.random.split(key, 24)
    w = lambda k, s: (0.1 * jax.random.normal(k, s, dtype=jnp.float32))

    def gru(k0, k1, k2, k3, in_dim):
        return dict(
            wih=w(k0, (in_dim, 3 * hidR)),
            whh=w(k1, (hidR, 3 * hidR)),
            bih=w(k2, (1, 3 * hidR)),
            bhh=w(k3, (1, 3 * hidR)),
        )

    g1 = gru(ks[0], ks[1], ks[2], ks[3], m)
    g2 = gru(ks[4], ks[5], ks[6], ks[7], 1)
    g3 = gru(ks[8], ks[9], ks[10], ks[11], 1)

    params = {
        "mask_mat": w(ks[12], (m, m)),
        "gru1_wih": g1["wih"], "gru1_whh": g1["whh"], "gru1_bih": g1["bih"], "gru1_bhh": g1["bhh"],
        "gru2_wih": g2["wih"], "gru2_whh": g2["whh"], "gru2_bih": g2["bih"], "gru2_bhh": g2["bhh"],
        "gru3_wih": g3["wih"], "gru3_whh": g3["whh"], "gru3_bih": g3["bih"], "gru3_bhh": g3["bhh"],
        "lin1_w": w(ks[13], (hidR, m)), "lin1_b": w(ks[14], (1, m)),
        "pb_w1": w(ks[15], (hidR, 5)), "pb_b1": w(ks[16], (1, 5)),
        "pb_w2": w(ks[17], (5, 1)), "pb_b2": w(ks[18], (1, 1)),
        "pg_w1": w(ks[19], (hidR, 5)), "pg_b1": w(ks[20], (1, 5)),
        "pg_w2": w(ks[21], (5, 1)), "pg_b2": w(ks[22], (1, 1)),
        "res_w": w(ks[23], (residual_window, 1)),
        "res_b": jnp.zeros((1, 1), jnp.float32),
    }
    return params


if __name__ == "__main__":
    # small, module-consistent shapes
    b, P, m, hidR = 2, 8, 16, 32
    residual_window = 4
    ratio = 0.5
    output_fun = "sigmoid"

    key = jax.random.PRNGKey(0)
    k_x, k_adj, k_p = jax.random.split(key, 3)
    x = jax.random.normal(k_x, (b, P, m), dtype=jnp.float32)
    adj = jax.random.uniform(k_adj, (m, m), dtype=jnp.float32)
    params = init_params(k_p, m, hidR, residual_window)

    outs = model_forward(x, params, adj, ratio=ratio,
                         residual_window=residual_window, output_fun=output_fun)
    outs = jax.block_until_ready(outs)

    res, epi_out, beta, gamma, ngm = outs
    assert res.shape == (b, m)
    assert epi_out.shape == (b, m)
    assert beta.shape == (b, m)
    assert gamma.shape == (b, m)
    assert ngm.shape == (b, m, m)
    assert all(bool(jnp.all(jnp.isfinite(o))) for o in (res, beta, gamma))
    print("KERNEL_OK")
</pallas_src>

<mosaic_0001>
module attributes {stable_mosaic.version = 11 : i64} {
  func.func @_prep_kernel(%arg0: i32, %arg1: memref<16x16xf32, #tpu.memory_space<vmem>>, %arg2: memref<16x16xf32, #tpu.memory_space<vmem>>, %arg3: memref<16x96xf32, #tpu.memory_space<vmem>>, %arg4: memref<16x16xf32, #tpu.memory_space<vmem>>, %arg5: memref<16x96xf32, #tpu.memory_space<vmem>>) attributes {dimension_semantics = [#tpu.dimension_semantics<arbitrary>], iteration_bounds = array<i64: 1>, scalar_prefetch = 0 : i64, scratch_operands = 0 : i64, tpu.core_type = #tpu.core_type<tc>, window_params = [{pipeline_mode = #tpu.pipeline_mode<synchronous>, transform_indices = @transform_0, window_bounds = array<i64: 16, 16>}, {pipeline_mode = #tpu.pipeline_mode<synchronous>, transform_indices = @transform_1, window_bounds = array<i64: 16, 16>}, {pipeline_mode = #tpu.pipeline_mode<synchronous>, transform_indices = @transform_2, window_bounds = array<i64: 16, 96>}, {pipeline_mode = #tpu.pipeline_mode<synchronous>, transform_indices = @transform_3, window_bounds = array<i64: 16, 16>}, {pipeline_mode = #tpu.pipeline_mode<synchronous>, transform_indices = @transform_4, window_bounds = array<i64: 16, 96>}]} {
    %c0 = arith.constant 0 : index
    %c0_0 = arith.constant 0 : index
    %0 = vector.load %arg1[%c0, %c0_0] : memref<16x16xf32, #tpu.memory_space<vmem>>, vector<16x16xf32>
    %cst = arith.constant dense<0xFF800000> : vector<16xf32>
    %1 = vector.multi_reduction <maximumf>, %0, %cst [1] : vector<16x16xf32> to vector<16xf32>
    %2 = vector.shape_cast %1 : vector<16xf32> to vector<16x1xf32>
    %3 = vector.broadcast %2 : vector<16x1xf32> to vector<16x16xf32>
    %4 = arith.subf %0, %3 : vector<16x16xf32>
    %5 = math.exp %4 : vector<16x16xf32>
    %cst_1 = arith.constant dense<0.000000e+00> : vector<16xf32>
    %6 = vector.multi_reduction <add>, %5, %cst_1 [1] : vector<16x16xf32> to vector<16xf32>
    %7 = vector.shape_cast %6 : vector<16xf32> to vector<16x1xf32>
    %8 = vector.broadcast %7 : vector<16x1xf32> to vector<16x16xf32>
    %9 = arith.divf %5, %8 : vector<16x16xf32>
    %c0_2 = arith.constant 0 : index
    %c0_3 = arith.constant 0 : index
    %10 = vector.load %arg2[%c0_2, %c0_3] : memref<16x16xf32, #tpu.memory_space<vmem>>, vector<16x16xf32>
    %11 = arith.mulf %10, %9 : vector<16x16xf32>
    %c0_4 = arith.constant 0 : index
    %c0_5 = arith.constant 0 : index
    %12 = vector.load %arg4[%c0_4, %c0_5] : memref<16x16xf32, #tpu.memory_space<vmem>>, vector<16x16xf32>
    tpu.vector_store %arg4[%c0_4, %c0_5], %11 {strides = array<i32>} : memref<16x16xf32, #tpu.memory_space<vmem>>, vector<16x16xf32>,
    %c0_6 = arith.constant 0 : index
    %c0_7 = arith.constant 0 : index
    %13 = vector.load %arg3[%c0_6, %c0_7] : memref<16x96xf32, #tpu.memory_space<vmem>>, vector<16x96xf32>
    %cst_8 = arith.constant dense<0.000000e+00> : vector<16x96xf32>
    %14 = tpu.matmul %11, %13, %cst_8 {dimension_numbers = #tpu.dot_dimension_numbers<[1], [0], [0], [1], [0, 0, 1, 1], [], []>} : vector<16x16xf32>, vector<16x96xf32>, vector<16x96xf32> -> vector<16x96xf32>
    %c0_9 = arith.constant 0 : index
    %c0_10 = arith.constant 0 : index
    %15 = vector.load %arg5[%c0_9, %c0_10] : memref<16x96xf32, #tpu.memory_space<vmem>>, vector<16x96xf32>
    tpu.vector_store %arg5[%c0_9, %c0_10], %14 {strides = array<i32>} : memref<16x96xf32, #tpu.memory_space<vmem>>, vector<16x96xf32>,
    return
  }
  func.func @transform_0(%arg0: i32) -> (i32, i32) {
    %c0_i32 = arith.constant 0 : i32
    %c0_i32_0 = arith.constant 0 : i32
    %c0_i32_1 = arith.constant 0 : i32
    return %c0_i32, %c0_i32_0 : i32, i32
  }
  func.func @transform_1(%arg0: i32) -> (i32, i32) {
    %c0_i32 = arith.constant 0 : i32
    %c0_i32_0 = arith.constant 0 : i32
    %c0_i32_1 = arith.constant 0 : i32
    return %c0_i32, %c0_i32_0 : i32, i32
  }
  func.func @transform_2(%arg0: i32) -> (i32, i32) {
    %c0_i32 = arith.constant 0 : i32
    %c0_i32_0 = arith.constant 0 : i32
    %c0_i32_1 = arith.constant 0 : i32
    return %c0_i32, %c0_i32_0 : i32, i32
  }
  func.func @transform_3(%arg0: i32) -> (i32, i32) {
    %c0_i32 = arith.constant 0 : i32
    %c0_i32_0 = arith.constant 0 : i32
    %c0_i32_1 = arith.constant 0 : i32
    return %c0_i32, %c0_i32_0 : i32, i32
  }
  func.func @transform_4(%arg0: i32) -> (i32, i32) {
    %c0_i32 = arith.constant 0 : i32
    %c0_i32_0 = arith.constant 0 : i32
    %c0_i32_1 = arith.constant 0 : i32
    return %c0_i32, %c0_i32_0 : i32, i32
  }
}

module attributes {stable_mosaic.version = 11 : i64} {
  func.func @kernel(%arg0: i32, %arg1: memref<8x32x192xf32, #tpu.memory_space<vmem>>, %arg2: memref<64x192xf32, #tpu.memory_space<vmem>>, %arg3: memref<1x192xf32, #tpu.memory_space<vmem>>, %arg4: memref<32x5xf32, #tpu.memory_space<vmem>>, %arg5: memref<1x5xf32, #tpu.memory_space<vmem>>, %arg6: memref<1x5xf32, #tpu.memory_space<vmem>>, %arg7: memref<1x1xf32, #tpu.memory_space<vmem>>, %arg8: memref<32x5xf32, #tpu.memory_space<vmem>>, %arg9: memref<1x5xf32, #tpu.memory_space<vmem>>, %arg10: memref<1x5xf32, #tpu.memory_space<vmem>>, %arg11: memref<1x1xf32, #tpu.memory_space<vmem>>, %arg12: memref<32x1xf32, #tpu.memory_space<vmem>>, %arg13: memref<32x1xf32, #tpu.memory_space<vmem>>) attributes {dimension_semantics = [#tpu.dimension_semantics<arbitrary>], iteration_bounds = array<i64: 1>, scalar_prefetch = 0 : i64, scratch_operands = 0 : i64, tpu.core_type = #tpu.core_type<tc>, window_params = [{pipeline_mode = #tpu.pipeline_mode<synchronous>, transform_indices = @transform_0, window_bounds = array<i64: 8, 32, 192>}, {pipeline_mode = #tpu.pipeline_mode<synchronous>, transform_indices = @transform_1, window_bounds = array<i64: 64, 192>}, {pipeline_mode = #tpu.pipeline_mode<synchronous>, transform_indices = @transform_2, window_bounds = array<i64: 1, 192>}, {pipeline_mode = #tpu.pipeline_mode<synchronous>, transform_indices = @transform_3, window_bounds = array<i64: 32, 5>}, {pipeline_mode = #tpu.pipeline_mode<synchronous>, transform_indices = @transform_4, window_bounds = array<i64: 1, 5>}, {pipeline_mode = #tpu.pipeline_mode<synchronous>, transform_indices = @transform_5, window_bounds = array<i64: 1, 5>}, {pipeline_mode = #tpu.pipeline_mode<synchronous>, transform_indices = @transform_6, window_bounds = array<i64: 1, 1>}, {pipeline_mode = #tpu.pipeline_mode<synchronous>, transform_indices = @transform_7, window_bounds = array<i64: 32, 5>}, {pipeline_mode = #tpu.pipeline_mode<synchronous>, transform_indices = @transform_8, window_bounds = array<i64: 1, 5>}, {pipeline_mode = #tpu.pipeline_mode<synchronous>, transform_indices = @transform_9, window_bounds = array<i64: 1, 5>}, {pipeline_mode = #tpu.pipeline_mode<synchronous>, transform_indices = @transform_10, window_bounds = array<i64: 1, 1>}, {pipeline_mode = #tpu.pipeline_mode<synchronous>, transform_indices = @transform_11, window_bounds = array<i64: 32, 1>}, {pipeline_mode = #tpu.pipeline_mode<synchronous>, transform_indices = @transform_12, window_bounds = array<i64: 32, 1>}]} {
    %c0 = arith.constant 0 : index
    %c0_0 = arith.constant 0 : index
    %0 = vector.load %arg2[%c0, %c0_0] : memref<64x192xf32, #tpu.memory_space<vmem>>, vector<64x192xf32>
    %c0_1 = arith.constant 0 : index
    %c0_2 = arith.constant 0 : index
    %1 = vector.load %arg3[%c0_1, %c0_2] : memref<1x192xf32, #tpu.memory_space<vmem>>, vector<1x192xf32>
    %cst = arith.constant 0.000000e+00 : f32
    %2 = vector.broadcast %cst : f32 to vector<32x64xf32>
    %c0_3 = arith.constant 0 : index
    %c0_4 = arith.constant 0 : index
    %c0_5 = arith.constant 0 : index
    %3 = vector.load %arg1[%c0_3, %c0_4, %c0_5] : memref<8x32x192xf32, #tpu.memory_space<vmem>>, vector<1x32x192xf32>
    %4 = vector.shape_cast %3 : vector<1x32x192xf32> to vector<32x192xf32>
    %cst_6 = arith.constant dense<0.000000e+00> : vector<32x192xf32>
    %5 = tpu.matmul %2, %0, %cst_6 {dimension_numbers = #tpu.dot_dimension_numbers<[1], [0], [0], [1], [0, 0, 1, 1], [], []>} : vector<32x64xf32>, vector<64x192xf32>, vector<32x192xf32> -> vector<32x192xf32>
    %6 = vector.broadcast %1 : vector<1x192xf32> to vector<32x192xf32>
    %7 = arith.addf %5, %6 : vector<32x192xf32>
    %8 = vector.extract_strided_slice %4 {offsets = [0, 0], sizes = [32, 64], strides = [1, 1]} : vector<32x192xf32> to vector<32x64xf32>
    %9 = vector.extract_strided_slice %7 {offsets = [0, 0], sizes = [32, 64], strides = [1, 1]} : vector<32x192xf32> to vector<32x64xf32>
    %10 = arith.addf %8, %9 : vector<32x64xf32>
    %11 = arith.negf %10 : vector<32x64xf32>
    %12 = math.exp %11 : vector<32x64xf32>
    %cst_7 = arith.constant 1.000000e+00 : f32
    %13 = vector.broadcast %cst_7 : f32 to vector<32x64xf32>
    %14 = arith.addf %13, %12 : vector<32x64xf32>
    %15 = arith.divf %13, %14 : vector<32x64xf32>
    %16 = vector.extract_strided_slice %4 {offsets = [0, 64], sizes = [32, 64], strides = [1, 1]} : vector<32x192xf32> to vector<32x64xf32>
    %17 = vector.extract_strided_slice %7 {offsets = [0, 64], sizes = [32, 64], strides = [1, 1]} : vector<32x192xf32> to vector<32x64xf32>
    %18 = arith.addf %16, %17 : vector<32x64xf32>
    %19 = arith.negf %18 : vector<32x64xf32>
    %20 = math.exp %19 : vector<32x64xf32>
    %cst_8 = arith.constant 1.000000e+00 : f32
    %21 = vector.broadcast %cst_8 : f32 to vector<32x64xf32>
    %22 = arith.addf %21, %20 : vector<32x64xf32>
    %23 = arith.divf %21, %22 : vector<32x64xf32>
    %24 = vector.extract_strided_slice %4 {offsets = [0, 128], sizes = [32, 64], strides = [1, 1]} : vector<32x192xf32> to vector<32x64xf32>
    %25 = vector.extract_strided_slice %7 {offsets = [0, 128], sizes = [32, 64], strides = [1, 1]} : vector<32x192xf32> to vector<32x64xf32>
    %26 = arith.mulf %15, %25 : vector<32x64xf32>
    %27 = arith.addf %24, %26 : vector<32x64xf32>
    %28 = math.tanh %27 : vector<32x64xf32>
    %cst_9 = arith.constant 1.000000e+00 : f32
    %29 = vector.broadcast %cst_9 : f32 to vector<32x64xf32>
    %30 = arith.subf %29, %23 : vector<32x64xf32>
    %31 = arith.mulf %30, %28 : vector<32x64xf32>
    %32 = arith.mulf %23, %2 : vector<32x64xf32>
    %33 = arith.addf %31, %32 : vector<32x64xf32>
    %c1 = arith.constant 1 : index
    %c0_10 = arith.constant 0 : index
    %c0_11 = arith.constant 0 : index
    %34 = vector.load %arg1[%c1, %c0_10, %c0_11] : memref<8x32x192xf32, #tpu.memory_space<vmem>>, vector<1x32x192xf32>
    %35 = vector.shape_cast %34 : vector<1x32x192xf32> to vector<32x192xf32>
    %cst_12 = arith.constant dense<0.000000e+00> : vector<32x192xf32>
    %36 = tpu.matmul %33, %0, %cst_12 {dimension_numbers = #tpu.dot_dimension_numbers<[1], [0], [0], [1], [0, 0, 1, 1], [], []>} : vector<32x64xf32>, vector<64x192xf32>, vector<32x192xf32> -> vector<32x192xf32>
    %37 = vector.broadcast %1 : vector<1x192xf32> to vector<32x192xf32>
    %38 = arith.addf %36, %37 : vector<32x192xf32>
    %39 = vector.extract_strided_slice %35 {offsets = [0, 0], sizes = [32, 64], strides = [1, 1]} : vector<32x192xf32> to vector<32x64xf32>
    %40 = vector.extract_strided_slice %38 {offsets = [0, 0], sizes = [32, 64], strides = [1, 1]} : vector<32x192xf32> to vector<32x64xf32>
    %41 = arith.addf %39, %40 : vector<32x64xf32>
    %42 = arith.negf %41 : vector<32x64xf32>
    %43 = math.exp %42 : vector<32x64xf32>
    %cst_13 = arith.constant 1.000000e+00 : f32
    %44 = vector.broadcast %cst_13 : f32 to vector<32x64xf32>
    %45 = arith.addf %44, %43 : vector<32x64xf32>
    %46 = arith.divf %44, %45 : vector<32x64xf32>
    %47 = vector.extract_strided_slice %35 {offsets = [0, 64], sizes = [32, 64], strides = [1, 1]} : vector<32x192xf32> to vector<32x64xf32>
    %48 = vector.extract_strided_slice %38 {offsets = [0, 64], sizes = [32, 64], strides = [1, 1]} : vector<32x192xf32> to vector<32x64xf32>
    %49 = arith.addf %47, %48 : vector<32x64xf32>
    %50 = arith.negf %49 : vector<32x64xf32>
    %51 = math.exp %50 : vector<32x64xf32>
    %cst_14 = arith.constant 1.000000e+00 : f32
    %52 = vector.broadcast %cst_14 : f32 to vector<32x64xf32>
    %53 = arith.addf %52, %51 : vector<32x64xf32>
    %54 = arith.divf %52, %53 : vector<32x64xf32>
    %55 = vector.extract_strided_slice %35 {offsets = [0, 128], sizes = [32, 64], strides = [1, 1]} : vector<32x192xf32> to vector<32x64xf32>
    %56 = vector.extract_strided_slice %38 {offsets = [0, 128], sizes = [32, 64], strides = [1, 1]} : vector<32x192xf32> to vector<32x64xf32>
    %57 = arith.mulf %46, %56 : vector<32x64xf32>
    %58 = arith.addf %55, %57 : vector<32x64xf32>
    %59 = math.tanh %58 : vector<32x64xf32>
    %cst_15 = arith.constant 1.000000e+00 : f32
    %60 = vector.broadcast %cst_15 : f32 to vector<32x64xf32>
    %61 = arith.subf %60, %54 : vector<32x64xf32>
    %62 = arith.mulf %61, %59 : vector<32x64xf32>
    %63 = arith.mulf %54, %33 : vector<32x64xf32>
    %64 = arith.addf %62, %63 : vector<32x64xf32>
    %c2 = arith.constant 2 : index
    %c0_16 = arith.constant 0 : index
    %c0_17 = arith.constant 0 : index
    %65 = vector.load %arg1[%c2, %c0_16, %c0_17] : memref<8x32x192xf32, #tpu.memory_space<vmem>>, vector<1x32x192xf32>
    %66 = vector.shape_cast %65 : vector<1x32x192xf32> to vector<32x192xf32>
    %cst_18 = arith.constant dense<0.000000e+00> : vector<32x192xf32>
    %67 = tpu.matmul %64, %0, %cst_18 {dimension_numbers = #tpu.dot_dimension_numbers<[1], [0], [0], [1], [0, 0, 1, 1], [], []>} : vector<32x64xf32>, vector<64x192xf32>, vector<32x192xf32> -> vector<32x192xf32>
    %68 = vector.broadcast %1 : vector<1x192xf32> to vector<32x192xf32>
    %69 = arith.addf %67, %68 : vector<32x192xf32>
    %70 = vector.extract_strided_slice %66 {offsets = [0, 0], sizes = [32, 64], strides = [1, 1]} : vector<32x192xf32> to vector<32x64xf32>
    %71 = vector.extract_strided_slice %69 {offsets = [0, 0], sizes = [32, 64], strides = [1, 1]} : vector<32x192xf32> to vector<32x64xf32>
    %72 = arith.addf %70, %71 : vector<32x64xf32>
    %73 = arith.negf %72 : vector<32x64xf32>
    %74 = math.exp %73 : vector<32x64xf32>
    %cst_19 = arith.constant 1.000000e+00 : f32
    %75 = vector.broadcast %cst_19 : f32 to vector<32x64xf32>
    %76 = arith.addf %75, %74 : vector<32x64xf32>
    %77 = arith.divf %75, %76 : vector<32x64xf32>
    %78 = vector.extract_strided_slice %66 {offsets = [0, 64], sizes = [32, 64], strides = [1, 1]} : vector<32x192xf32> to vector<32x64xf32>
    %79 = vector.extract_strided_slice %69 {offsets = [0, 64], sizes = [32, 64], strides = [1, 1]} : vector<32x192xf32> to vector<32x64xf32>
    %80 = arith.addf %78, %79 : vector<32x64xf32>
    %81 = arith.negf %80 : vector<32x64xf32>
    %82 = math.exp %81 : vector<32x64xf32>
    %cst_20 = arith.constant 1.000000e+00 : f32
    %83 = vector.broadcast %cst_20 : f32 to vector<32x64xf32>
    %84 = arith.addf %83, %82 : vector<32x64xf32>
    %85 = arith.divf %83, %84 : vector<32x64xf32>
    %86 = vector.extract_strided_slice %66 {offsets = [0, 128], sizes = [32, 64], strides = [1, 1]} : vector<32x192xf32> to vector<32x64xf32>
    %87 = vector.extract_strided_slice %69 {offsets = [0, 128], sizes = [32, 64], strides = [1, 1]} : vector<32x192xf32> to vector<32x64xf32>
    %88 = arith.mulf %77, %87 : vector<32x64xf32>
    %89 = arith.addf %86, %88 : vector<32x64xf32>
    %90 = math.tanh %89 : vector<32x64xf32>
    %cst_21 = arith.constant 1.000000e+00 : f32
    %91 = vector.broadcast %cst_21 : f32 to vector<32x64xf32>
    %92 = arith.subf %91, %85 : vector<32x64xf32>
    %93 = arith.mulf %92, %90 : vector<32x64xf32>
    %94 = arith.mulf %85, %64 : vector<32x64xf32>
    %95 = arith.addf %93, %94 : vector<32x64xf32>
    %c3 = arith.constant 3 : index
    %c0_22 = arith.constant 0 : index
    %c0_23 = arith.constant 0 : index
    %96 = vector.load %arg1[%c3, %c0_22, %c0_23] : memref<8x32x192xf32, #tpu.memory_space<vmem>>, vector<1x32x192xf32>
    %97 = vector.shape_cast %96 : vector<1x32x192xf32> to vector<32x192xf32>
    %cst_24 = arith.constant dense<0.000000e+00> : vector<32x192xf32>
    %98 = tpu.matmul %95, %0, %cst_24 {dimension_numbers = #tpu.dot_dimension_numbers<[1], [0], [0], [1], [0, 0, 1, 1], [], []>} : vector<32x64xf32>, vector<64x192xf32>, vector<32x192xf32> -> vector<32x192xf32>
    %99 = vector.broadcast %1 : vector<1x192xf32> to vector<32x192xf32>
    %100 = arith.addf %98, %99 : vector<32x192xf32>
    %101 = vector.extract_strided_slice %97 {offsets = [0, 0], sizes = [32, 64], strides = [1, 1]} : vector<32x192xf32> to vector<32x64xf32>
    %102 = vector.extract_strided_slice %100 {offsets = [0, 0], sizes = [32, 64], strides = [1, 1]} : vector<32x192xf32> to vector<32x64xf32>
    %103 = arith.addf %101, %102 : vector<32x64xf32>
    %104 = arith.negf %103 : vector<32x64xf32>
    %105 = math.exp %104 : vector<32x64xf32>
    %cst_25 = arith.constant 1.000000e+00 : f32
    %106 = vector.broadcast %cst_25 : f32 to vector<32x64xf32>
    %107 = arith.addf %106, %105 : vector<32x64xf32>
    %108 = arith.divf %106, %107 : vector<32x64xf32>
    %109 = vector.extract_strided_slice %97 {offsets = [0, 64], sizes = [32, 64], strides = [1, 1]} : vector<32x192xf32> to vector<32x64xf32>
    %110 = vector.extract_strided_slice %100 {offsets = [0, 64], sizes = [32, 64], strides = [1, 1]} : vector<32x192xf32> to vector<32x64xf32>
    %111 = arith.addf %109, %110 : vector<32x64xf32>
    %112 = arith.negf %111 : vector<32x64xf32>
    %113 = math.exp %112 : vector<32x64xf32>
    %cst_26 = arith.constant 1.000000e+00 : f32
    %114 = vector.broadcast %cst_26 : f32 to vector<32x64xf32>
    %115 = arith.addf %114, %113 : vector<32x64xf32>
    %116 = arith.divf %114, %115 : vector<32x64xf32>
    %117 = vector.extract_strided_slice %97 {offsets = [0, 128], sizes = [32, 64], strides = [1, 1]} : vector<32x192xf32> to vector<32x64xf32>
    %118 = vector.extract_strided_slice %100 {offsets = [0, 128], sizes = [32, 64], strides = [1, 1]} : vector<32x192xf32> to vector<32x64xf32>
    %119 = arith.mulf %108, %118 : vector<32x64xf32>
    %120 = arith.addf %117, %119 : vector<32x64xf32>
    %121 = math.tanh %120 : vector<32x64xf32>
    %cst_27 = arith.constant 1.000000e+00 : f32
    %122 = vector.broadcast %cst_27 : f32 to vector<32x64xf32>
    %123 = arith.subf %122, %116 : vector<32x64xf32>
    %124 = arith.mulf %123, %121 : vector<32x64xf32>
    %125 = arith.mulf %116, %95 : vector<32x64xf32>
    %126 = arith.addf %124, %125 : vector<32x64xf32>
    %c4 = arith.constant 4 : index
    %c0_28 = arith.constant 0 : index
    %c0_29 = arith.constant 0 : index
    %127 = vector.load %arg1[%c4, %c0_28, %c0_29] : memref<8x32x192xf32, #tpu.memory_space<vmem>>, vector<1x32x192xf32>
    %128 = vector.shape_cast %127 : vector<1x32x192xf32> to vector<32x192xf32>
    %cst_30 = arith.constant dense<0.000000e+00> : vector<32x192xf32>
    %129 = tpu.matmul %126, %0, %cst_30 {dimension_numbers = #tpu.dot_dimension_numbers<[1], [0], [0], [1], [0, 0, 1, 1], [], []>} : vector<32x64xf32>, vector<64x192xf32>, vector<32x192xf32> -> vector<32x192xf32>
    %130 = vector.broadcast %1 : vector<1x192xf32> to vector<32x192xf32>
    %131 = arith.addf %129, %130 : vector<32x192xf32>
    %132 = vector.extract_strided_slice %128 {offsets = [0, 0], sizes = [32, 64], strides = [1, 1]} : vector<32x192xf32> to vector<32x64xf32>
    %133 = vector.extract_strided_slice %131 {offsets = [0, 0], sizes = [32, 64], strides = [1, 1]} : vector<32x192xf32> to vector<32x64xf32>
    %134 = arith.addf %132, %133 : vector<32x64xf32>
    %135 = arith.negf %134 : vector<32x64xf32>
    %136 = math.exp %135 : vector<32x64xf32>
    %cst_31 = arith.constant 1.000000e+00 : f32
    %137 = vector.broadcast %cst_31 : f32 to vector<32x64xf32>
    %138 = arith.addf %137, %136 : vector<32x64xf32>
    %139 = arith.divf %137, %138 : vector<32x64xf32>
    %140 = vector.extract_strided_slice %128 {offsets = [0, 64], sizes = [32, 64], strides = [1, 1]} : vector<32x192xf32> to vector<32x64xf32>
    %141 = vector.extract_strided_slice %131 {offsets = [0, 64], sizes = [32, 64], strides = [1, 1]} : vector<32x192xf32> to vector<32x64xf32>
    %142 = arith.addf %140, %141 : vector<32x64xf32>
    %143 = arith.negf %142 : vector<32x64xf32>
    %144 = math.exp %143 : vector<32x64xf32>
    %cst_32 = arith.constant 1.000000e+00 : f32
    %145 = vector.broadcast %cst_32 : f32 to vector<32x64xf32>
    %146 = arith.addf %145, %144 : vector<32x64xf32>
    %147 = arith.divf %145, %146 : vector<32x64xf32>
    %148 = vector.extract_strided_slice %128 {offsets = [0, 128], sizes = [32, 64], strides = [1, 1]} : vector<32x192xf32> to vector<32x64xf32>
    %149 = vector.extract_strided_slice %131 {offsets = [0, 128], sizes = [32, 64], strides = [1, 1]} : vector<32x192xf32> to vector<32x64xf32>
    %150 = arith.mulf %139, %149 : vector<32x64xf32>
    %151 = arith.addf %148, %150 : vector<32x64xf32>
    %152 = math.tanh %151 : vector<32x64xf32>
    %cst_33 = arith.constant 1.000000e+00 : f32
    %153 = vector.broadcast %cst_33 : f32 to vector<32x64xf32>
    %154 = arith.subf %153, %147 : vector<32x64xf32>
    %155 = arith.mulf %154, %152 : vector<32x64xf32>
    %156 = arith.mulf %147, %126 : vector<32x64xf32>
    %157 = arith.addf %155, %156 : vector<32x64xf32>
    %c5 = arith.constant 5 : index
    %c0_34 = arith.constant 0 : index
    %c0_35 = arith.constant 0 : index
    %158 = vector.load %arg1[%c5, %c0_34, %c0_35] : memref<8x32x192xf32, #tpu.memory_space<vmem>>, vector<1x32x192xf32>
    %159 = vector.shape_cast %158 : vector<1x32x192xf32> to vector<32x192xf32>
    %cst_36 = arith.constant dense<0.000000e+00> : vector<32x192xf32>
    %160 = tpu.matmul %157, %0, %cst_36 {dimension_numbers = #tpu.dot_dimension_numbers<[1], [0], [0], [1], [0, 0, 1, 1], [], []>} : vector<32x64xf32>, vector<64x192xf32>, vector<32x192xf32> -> vector<32x192xf32>
    %161 = vector.broadcast %1 : vector<1x192xf32> to vector<32x192xf32>
    %162 = arith.addf %160, %161 : vector<32x192xf32>
    %163 = vector.extract_strided_slice %159 {offsets = [0, 0], sizes = [32, 64], strides = [1, 1]} : vector<32x192xf32> to vector<32x64xf32>
    %164 = vector.extract_strided_slice %162 {offsets = [0, 0], sizes = [32, 64], strides = [1, 1]} : vector<32x192xf32> to vector<32x64xf32>
    %165 = arith.addf %163, %164 : vector<32x64xf32>
    %166 = arith.negf %165 : vector<32x64xf32>
    %167 = math.exp %166 : vector<32x64xf32>
    %cst_37 = arith.constant 1.000000e+00 : f32
    %168 = vector.broadcast %cst_37 : f32 to vector<32x64xf32>
    %169 = arith.addf %168, %167 : vector<32x64xf32>
    %170 = arith.divf %168, %169 : vector<32x64xf32>
    %171 = vector.extract_strided_slice %159 {offsets = [0, 64], sizes = [32, 64], strides = [1, 1]} : vector<32x192xf32> to vector<32x64xf32>
    %172 = vector.extract_strided_slice %162 {offsets = [0, 64], sizes = [32, 64], strides = [1, 1]} : vector<32x192xf32> to vector<32x64xf32>
    %173 = arith.addf %171, %172 : vector<32x64xf32>
    %174 = arith.negf %173 : vector<32x64xf32>
    %175 = math.exp %174 : vector<32x64xf32>
    %cst_38 = arith.constant 1.000000e+00 : f32
    %176 = vector.broadcast %cst_38 : f32 to vector<32x64xf32>
    %177 = arith.addf %176, %175 : vector<32x64xf32>
    %178 = arith.divf %176, %177 : vector<32x64xf32>
    %179 = vector.extract_strided_slice %159 {offsets = [0, 128], sizes = [32, 64], strides = [1, 1]} : vector<32x192xf32> to vector<32x64xf32>
    %180 = vector.extract_strided_slice %162 {offsets = [0, 128], sizes = [32, 64], strides = [1, 1]} : vector<32x192xf32> to vector<32x64xf32>
    %181 = arith.mulf %170, %180 : vector<32x64xf32>
    %182 = arith.addf %179, %181 : vector<32x64xf32>
    %183 = math.tanh %182 : vector<32x64xf32>
    %cst_39 = arith.constant 1.000000e+00 : f32
    %184 = vector.broadcast %cst_39 : f32 to vector<32x64xf32>
    %185 = arith.subf %184, %178 : vector<32x64xf32>
    %186 = arith.mulf %185, %183 : vector<32x64xf32>
    %187 = arith.mulf %178, %157 : vector<32x64xf32>
    %188 = arith.addf %186, %187 : vector<32x64xf32>
    %c6 = arith.constant 6 : index
    %c0_40 = arith.constant 0 : index
    %c0_41 = arith.constant 0 : index
    %189 = vector.load %arg1[%c6, %c0_40, %c0_41] : memref<8x32x192xf32, #tpu.memory_space<vmem>>, vector<1x32x192xf32>
    %190 = vector.shape_cast %189 : vector<1x32x192xf32> to vector<32x192xf32>
    %cst_42 = arith.constant dense<0.000000e+00> : vector<32x192xf32>
    %191 = tpu.matmul %188, %0, %cst_42 {dimension_numbers = #tpu.dot_dimension_numbers<[1], [0], [0], [1], [0, 0, 1, 1], [], []>} : vector<32x64xf32>, vector<64x192xf32>, vector<32x192xf32> -> vector<32x192xf32>
    %192 = vector.broadcast %1 : vector<1x192xf32> to vector<32x192xf32>
    %193 = arith.addf %191, %192 : vector<32x192xf32>
    %194 = vector.extract_strided_slice %190 {offsets = [0, 0], sizes = [32, 64], strides = [1, 1]} : vector<32x192xf32> to vector<32x64xf32>
    %195 = vector.extract_strided_slice %193 {offsets = [0, 0], sizes = [32, 64], strides = [1, 1]} : vector<32x192xf32> to vector<32x64xf32>
    %196 = arith.addf %194, %195 : vector<32x64xf32>
    %197 = arith.negf %196 : vector<32x64xf32>
    %198 = math.exp %197 : vector<32x64xf32>
    %cst_43 = arith.constant 1.000000e+00 : f32
    %199 = vector.broadcast %cst_43 : f32 to vector<32x64xf32>
    %200 = arith.addf %199, %198 : vector<32x64xf32>
    %201 = arith.divf %199, %200 : vector<32x64xf32>
    %202 = vector.extract_strided_slice %190 {offsets = [0, 64], sizes = [32, 64], strides = [1, 1]} : vector<32x192xf32> to vector<32x64xf32>
    %203 = vector.extract_strided_slice %193 {offsets = [0, 64], sizes = [32, 64], strides = [1, 1]} : vector<32x192xf32> to vector<32x64xf32>
    %204 = arith.addf %202, %203 : vector<32x64xf32>
    %205 = arith.negf %204 : vector<32x64xf32>
    %206 = math.exp %205 : vector<32x64xf32>
    %cst_44 = arith.constant 1.000000e+00 : f32
    %207 = vector.broadcast %cst_44 : f32 to vector<32x64xf32>
    %208 = arith.addf %207, %206 : vector<32x64xf32>
    %209 = arith.divf %207, %208 : vector<32x64xf32>
    %210 = vector.extract_strided_slice %190 {offsets = [0, 128], sizes = [32, 64], strides = [1, 1]} : vector<32x192xf32> to vector<32x64xf32>
    %211 = vector.extract_strided_slice %193 {offsets = [0, 128], sizes = [32, 64], strides = [1, 1]} : vector<32x192xf32> to vector<32x64xf32>
    %212 = arith.mulf %201, %211 : vector<32x64xf32>
    %213 = arith.addf %210, %212 : vector<32x64xf32>
    %214 = math.tanh %213 : vector<32x64xf32>
    %cst_45 = arith.constant 1.000000e+00 : f32
    %215 = vector.broadcast %cst_45 : f32 to vector<32x64xf32>
    %216 = arith.subf %215, %209 : vector<32x64xf32>
    %217 = arith.mulf %216, %214 : vector<32x64xf32>
    %218 = arith.mulf %209, %188 : vector<32x64xf32>
    %219 = arith.addf %217, %218 : vector<32x64xf32>
    %c7 = arith.constant 7 : index
    %c0_46 = arith.constant 0 : index
    %c0_47 = arith.constant 0 : index
    %220 = vector.load %arg1[%c7, %c0_46, %c0_47] : memref<8x32x192xf32, #tpu.memory_space<vmem>>, vector<1x32x192xf32>
    %221 = vector.shape_cast %220 : vector<1x32x192xf32> to vector<32x192xf32>
    %cst_48 = arith.constant dense<0.000000e+00> : vector<32x192xf32>
    %222 = tpu.matmul %219, %0, %cst_48 {dimension_numbers = #tpu.dot_dimension_numbers<[1], [0], [0], [1], [0, 0, 1, 1], [], []>} : vector<32x64xf32>, vector<64x192xf32>, vector<32x192xf32> -> vector<32x192xf32>
    %223 = vector.broadcast %1 : vector<1x192xf32> to vector<32x192xf32>
    %224 = arith.addf %222, %223 : vector<32x192xf32>
    %225 = vector.extract_strided_slice %221 {offsets = [0, 0], sizes = [32, 64], strides = [1, 1]} : vector<32x192xf32> to vector<32x64xf32>
    %226 = vector.extract_strided_slice %224 {offsets = [0, 0], sizes = [32, 64], strides = [1, 1]} : vector<32x192xf32> to vector<32x64xf32>
    %227 = arith.addf %225, %226 : vector<32x64xf32>
    %228 = arith.negf %227 : vector<32x64xf32>
    %229 = math.exp %228 : vector<32x64xf32>
    %cst_49 = arith.constant 1.000000e+00 : f32
    %230 = vector.broadcast %cst_49 : f32 to vector<32x64xf32>
    %231 = arith.addf %230, %229 : vector<32x64xf32>
    %232 = arith.divf %230, %231 : vector<32x64xf32>
    %233 = vector.extract_strided_slice %221 {offsets = [0, 64], sizes = [32, 64], strides = [1, 1]} : vector<32x192xf32> to vector<32x64xf32>
    %234 = vector.extract_strided_slice %224 {offsets = [0, 64], sizes = [32, 64], strides = [1, 1]} : vector<32x192xf32> to vector<32x64xf32>
    %235 = arith.addf %233, %234 : vector<32x64xf32>
    %236 = arith.negf %235 : vector<32x64xf32>
    %237 = math.exp %236 : vector<32x64xf32>
    %cst_50 = arith.constant 1.000000e+00 : f32
    %238 = vector.broadcast %cst_50 : f32 to vector<32x64xf32>
    %239 = arith.addf %238, %237 : vector<32x64xf32>
    %240 = arith.divf %238, %239 : vector<32x64xf32>
    %241 = vector.extract_strided_slice %221 {offsets = [0, 128], sizes = [32, 64], strides = [1, 1]} : vector<32x192xf32> to vector<32x64xf32>
    %242 = vector.extract_strided_slice %224 {offsets = [0, 128], sizes = [32, 64], strides = [1, 1]} : vector<32x192xf32> to vector<32x64xf32>
    %243 = arith.mulf %232, %242 : vector<32x64xf32>
    %244 = arith.addf %241, %243 : vector<32x64xf32>
    %245 = math.tanh %244 : vector<32x64xf32>
    %cst_51 = arith.constant 1.000000e+00 : f32
    %246 = vector.broadcast %cst_51 : f32 to vector<32x64xf32>
    %247 = arith.subf %246, %240 : vector<32x64xf32>
    %248 = arith.mulf %247, %245 : vector<32x64xf32>
    %249 = arith.mulf %240, %219 : vector<32x64xf32>
    %250 = arith.addf %248, %249 : vector<32x64xf32>
    %251 = vector.extract_strided_slice %250 {offsets = [0, 0], sizes = [32, 32], strides = [1, 1]} : vector<32x64xf32> to vector<32x32xf32>
    %252 = vector.extract_strided_slice %250 {offsets = [0, 32], sizes = [32, 32], strides = [1, 1]} : vector<32x64xf32> to vector<32x32xf32>
    %c0_52 = arith.constant 0 : index
    %c0_53 = arith.constant 0 : index
    %253 = vector.load %arg4[%c0_52, %c0_53] : memref<32x5xf32, #tpu.memory_space<vmem>>, vector<32x5xf32>
    %cst_54 = arith.constant dense<0.000000e+00> : vector<32x5xf32>
    %254 = tpu.matmul %251, %253, %cst_54 {dimension_numbers = #tpu.dot_dimension_numbers<[1], [0], [0], [1], [0, 0, 1, 1], [], []>} : vector<32x32xf32>, vector<32x5xf32>, vector<32x5xf32> -> vector<32x5xf32>
    %c0_55 = arith.constant 0 : index
    %c0_56 = arith.constant 0 : index
    %255 = vector.load %arg5[%c0_55, %c0_56] : memref<1x5xf32, #tpu.memory_space<vmem>>, vector<1x5xf32>
    %256 = vector.broadcast %255 : vector<1x5xf32> to vector<32x5xf32>
    %257 = arith.addf %254, %256 : vector<32x5xf32>
    %cst_57 = arith.constant 0.000000e+00 : f32
    %258 = vector.broadcast %cst_57 : f32 to vector<32x5xf32>
    %259 = arith.maximumf %257, %258 : vector<32x5xf32>
    %c0_58 = arith.constant 0 : index
    %c0_59 = arith.constant 0 : index
    %260 = vector.load %arg6[%c0_58, %c0_59] : memref<1x5xf32, #tpu.memory_space<vmem>>, vector<1x5xf32>
    %261 = vector.broadcast %260 : vector<1x5xf32> to vector<32x5xf32>
    %262 = arith.mulf %259, %261 : vector<32x5xf32>
    %cst_60 = arith.constant dense<0.000000e+00> : vector<32xf32>
    %263 = vector.multi_reduction <add>, %262, %cst_60 [1] : vector<32x5xf32> to vector<32xf32>
    %264 = vector.shape_cast %263 : vector<32xf32> to vector<32x1xf32>
    %c0_61 = arith.constant 0 : index
    %c0_62 = arith.constant 0 : index
    %265 = vector.load %arg7[%c0_61, %c0_62] : memref<1x1xf32, #tpu.memory_space<vmem>>, vector<1x1xf32>
    %266 = vector.broadcast %265 : vector<1x1xf32> to vector<32x1xf32>
    %267 = arith.addf %264, %266 : vector<32x1xf32>
    %268 = arith.negf %267 : vector<32x1xf32>
    %269 = math.exp %268 : vector<32x1xf32>
    %cst_63 = arith.constant 1.000000e+00 : f32
    %270 = vector.broadcast %cst_63 : f32 to vector<32x1xf32>
    %271 = arith.addf %270, %269 : vector<32x1xf32>
    %272 = arith.divf %270, %271 : vector<32x1xf32>
    %c0_64 = arith.constant 0 : index
    %c0_65 = arith.constant 0 : index
    %273 = vector.load %arg8[%c0_64, %c0_65] : memref<32x5xf32, #tpu.memory_space<vmem>>, vector<32x5xf32>
    %cst_66 = arith.constant dense<0.000000e+00> : vector<32x5xf32>
    %274 = tpu.matmul %252, %273, %cst_66 {dimension_numbers = #tpu.dot_dimension_numbers<[1], [0], [0], [1], [0, 0, 1, 1], [], []>} : vector<32x32xf32>, vector<32x5xf32>, vector<32x5xf32> -> vector<32x5xf32>
    %c0_67 = arith.constant 0 : index
    %c0_68 = arith.constant 0 : index
    %275 = vector.load %arg9[%c0_67, %c0_68] : memref<1x5xf32, #tpu.memory_space<vmem>>, vector<1x5xf32>
    %276 = vector.broadcast %275 : vector<1x5xf32> to vector<32x5xf32>
    %277 = arith.addf %274, %276 : vector<32x5xf32>
    %cst_69 = arith.constant 0.000000e+00 : f32
    %278 = vector.broadcast %cst_69 : f32 to vector<32x5xf32>
    %279 = arith.maximumf %277, %278 : vector<32x5xf32>
    %c0_70 = arith.constant 0 : index
    %c0_71 = arith.constant 0 : index
    %280 = vector.load %arg10[%c0_70, %c0_71] : memref<1x5xf32, #tpu.memory_space<vmem>>, vector<1x5xf32>
    %281 = vector.broadcast %280 : vector<1x5xf32> to vector<32x5xf32>
    %282 = arith.mulf %279, %281 : vector<32x5xf32>
    %cst_72 = arith.constant dense<0.000000e+00> : vector<32xf32>
    %283 = vector.multi_reduction <add>, %282, %cst_72 [1] : vector<32x5xf32> to vector<32xf32>
    %284 = vector.shape_cast %283 : vector<32xf32> to vector<32x1xf32>
    %c0_73 = arith.constant 0 : index
    %c0_74 = arith.constant 0 : index
    %285 = vector.load %arg11[%c0_73, %c0_74] : memref<1x1xf32, #tpu.memory_space<vmem>>, vector<1x1xf32>
    %286 = vector.broadcast %285 : vector<1x1xf32> to vector<32x1xf32>
    %287 = arith.addf %284, %286 : vector<32x1xf32>
    %288 = arith.negf %287 : vector<32x1xf32>
    %289 = math.exp %288 : vector<32x1xf32>
    %cst_75 = arith.constant 1.000000e+00 : f32
    %290 = vector.broadcast %cst_75 : f32 to vector<32x1xf32>
    %291 = arith.addf %290, %289 : vector<32x1xf32>
    %292 = arith.divf %290, %291 : vector<32x1xf32>
    %c0_76 = arith.constant 0 : index
    %c0_77 = arith.constant 0 : index
    %293 = vector.load %arg12[%c0_76, %c0_77] : memref<32x1xf32, #tpu.memory_space<vmem>>, vector<32x1xf32>
    tpu.vector_store %arg12[%c0_76, %c0_77], %272 {strides = array<i32>} : memref<32x1xf32, #tpu.memory_space<vmem>>, vector<32x1xf32>,
    %c0_78 = arith.constant 0 : index
    %c0_79 = arith.constant 0 : index
    %294 = vector.load %arg13[%c0_78, %c0_79] : memref<32x1xf32, #tpu.memory_space<vmem>>, vector<32x1xf32>
    tpu.vector_store %arg13[%c0_78, %c0_79], %292 {strides = array<i32>} : memref<32x1xf32, #tpu.memory_space<vmem>>, vector<32x1xf32>,
    return
  }
  func.func @transform_0(%arg0: i32) -> (i32, i32, i32) {
    %c0_i32 = arith.constant 0 : i32
    %c0_i32_0 = arith.constant 0 : i32
    %c0_i32_1 = arith.constant 0 : i32
    %c0_i32_2 = arith.constant 0 : i32
    return %c0_i32, %c0_i32_0, %c0_i32_1 : i32, i32, i32
  }
  func.func @transform_1(%arg0: i32) -> (i32, i32) {
    %c0_i32 = arith.constant 0 : i32
    %c0_i32_0 = arith.constant 0 : i32
    %c0_i32_1 = arith.constant 0 : i32
    return %c0_i32, %c0_i32_0 : i32, i32
  }
  func.func @transform_2(%arg0: i32) -> (i32, i32) {
    %c0_i32 = arith.constant 0 : i32
    %c0_i32_0 = arith.constant 0 : i32
    %c0_i32_1 = arith.constant 0 : i32
    return %c0_i32, %c0_i32_0 : i32, i32
  }
  func.func @transform_3(%arg0: i32) -> (i32, i32) {
    %c0_i32 = arith.constant 0 : i32
    %c0_i32_0 = arith.constant 0 : i32
    %c0_i32_1 = arith.constant 0 : i32
    return %c0_i32, %c0_i32_0 : i32, i32
  }
  func.func @transform_4(%arg0: i32) -> (i32, i32) {
    %c0_i32 = arith.constant 0 : i32
    %c0_i32_0 = arith.constant 0 : i32
    %c0_i32_1 = arith.constant 0 : i32
    return %c0_i32, %c0_i32_0 : i32, i32
  }
  func.func @transform_5(%arg0: i32) -> (i32, i32) {
    %c0_i32 = arith.constant 0 : i32
    %c0_i32_0 = arith.constant 0 : i32
    %c0_i32_1 = arith.constant 0 : i32
    return %c0_i32, %c0_i32_0 : i32, i32
  }
  func.func @transform_6(%arg0: i32) -> (i32, i32) {
    %c0_i32 = arith.constant 0 : i32
    %c0_i32_0 = arith.constant 0 : i32
    %c0_i32_1 = arith.constant 0 : i32
    return %c0_i32, %c0_i32_0 : i32, i32
  }
  func.func @transform_7(%arg0: i32) -> (i32, i32) {
    %c0_i32 = arith.constant 0 : i32
    %c0_i32_0 = arith.constant 0 : i32
    %c0_i32_1 = arith.constant 0 : i32
    return %c0_i32, %c0_i32_0 : i32, i32
  }
  func.func @transform_8(%arg0: i32) -> (i32, i32) {
    %c0_i32 = arith.constant 0 : i32
    %c0_i32_0 = arith.constant 0 : i32
    %c0_i32_1 = arith.constant 0 : i32
    return %c0_i32, %c0_i32_0 : i32, i32
  }
  func.func @transform_9(%arg0: i32) -> (i32, i32) {
    %c0_i32 = arith.constant 0 : i32
    %c0_i32_0 = arith.constant 0 : i32
    %c0_i32_1 = arith.constant 0 : i32
    return %c0_i32, %c0_i32_0 : i32, i32
  }
  func.func @transform_10(%arg0: i32) -> (i32, i32) {
    %c0_i32 = arith.constant 0 : i32
    %c0_i32_0 = arith.constant 0 : i32
    %c0_i32_1 = arith.constant 0 : i32
    return %c0_i32, %c0_i32_0 : i32, i32
  }
  func.func @transform_11(%arg0: i32) -> (i32, i32) {
    %c0_i32 = arith.constant 0 : i32
    %c0_i32_0 = arith.constant 0 : i32
    %c0_i32_1 = arith.constant 0 : i32
    return %c0_i32, %c0_i32_0 : i32, i32
  }
  func.func @transform_12(%arg0: i32) -> (i32, i32) {
    %c0_i32 = arith.constant 0 : i32
    %c0_i32_0 = arith.constant 0 : i32
    %c0_i32_1 = arith.constant 0 : i32
    return %c0_i32, %c0_i32_0 : i32, i32
  }
}

module attributes {stable_mosaic.version = 11 : i64} {
  func.func @kernel(%arg0: i32, %arg1: memref<16x16xf32, #tpu.memory_space<vmem>>, %arg2: memref<16x96xf32, #tpu.memory_space<vmem>>, %arg3: memref<1x96xf32, #tpu.memory_space<vmem>>, %arg4: memref<32x96xf32, #tpu.memory_space<vmem>>, %arg5: memref<1x96xf32, #tpu.memory_space<vmem>>, %arg6: memref<32x16xf32, #tpu.memory_space<vmem>>, %arg7: memref<1x16xf32, #tpu.memory_space<vmem>>, %arg8: memref<2x16xf32, #tpu.memory_space<vmem>>, %arg9: memref<2x16xf32, #tpu.memory_space<vmem>>) attributes {dimension_semantics = [#tpu.dimension_semantics<arbitrary>], iteration_bounds = array<i64: 1>, scalar_prefetch = 0 : i64, scratch_operands = 0 : i64, tpu.core_type = #tpu.core_type<tc>, window_params = [{pipeline_mode = #tpu.pipeline_mode<synchronous>, transform_indices = @transform_0, window_bounds = array<i64: 16, 16>}, {pipeline_mode = #tpu.pipeline_mode<synchronous>, transform_indices = @transform_1, window_bounds = array<i64: 16, 96>}, {pipeline_mode = #tpu.pipeline_mode<synchronous>, transform_indices = @transform_2, window_bounds = array<i64: 1, 96>}, {pipeline_mode = #tpu.pipeline_mode<synchronous>, transform_indices = @transform_3, window_bounds = array<i64: 32, 96>}, {pipeline_mode = #tpu.pipeline_mode<synchronous>, transform_indices = @transform_4, window_bounds = array<i64: 1, 96>}, {pipeline_mode = #tpu.pipeline_mode<synchronous>, transform_indices = @transform_5, window_bounds = array<i64: 32, 16>}, {pipeline_mode = #tpu.pipeline_mode<synchronous>, transform_indices = @transform_6, window_bounds = array<i64: 1, 16>}, {pipeline_mode = #tpu.pipeline_mode<synchronous>, transform_indices = @transform_7, window_bounds = array<i64: 2, 16>}, {pipeline_mode = #tpu.pipeline_mode<synchronous>, transform_indices = @transform_8, window_bounds = array<i64: 2, 16>}]} {
    %c0 = arith.constant 0 : index
    %c0_0 = arith.constant 0 : index
    %0 = vector.load %arg1[%c0, %c0_0] : memref<16x16xf32, #tpu.memory_space<vmem>>, vector<16x16xf32>
    %c0_1 = arith.constant 0 : index
    %c0_2 = arith.constant 0 : index
    %1 = vector.load %arg2[%c0_1, %c0_2] : memref<16x96xf32, #tpu.memory_space<vmem>>, vector<16x96xf32>
    %cst = arith.constant dense<0.000000e+00> : vector<16x96xf32>
    %2 = tpu.matmul %0, %1, %cst {dimension_numbers = #tpu.dot_dimension_numbers<[1], [0], [0], [1], [0, 0, 1, 1], [], []>} : vector<16x16xf32>, vector<16x96xf32>, vector<16x96xf32> -> vector<16x96xf32>
    %c0_3 = arith.constant 0 : index
    %c0_4 = arith.constant 0 : index
    %3 = vector.load %arg3[%c0_3, %c0_4] : memref<1x96xf32, #tpu.memory_space<vmem>>, vector<1x96xf32>
    %4 = vector.broadcast %3 : vector<1x96xf32> to vector<16x96xf32>
    %5 = arith.addf %2, %4 : vector<16x96xf32>
    %c0_5 = arith.constant 0 : index
    %c0_6 = arith.constant 0 : index
    %6 = vector.load %arg4[%c0_5, %c0_6] : memref<32x96xf32, #tpu.memory_space<vmem>>, vector<32x96xf32>
    %c0_7 = arith.constant 0 : index
    %c0_8 = arith.constant 0 : index
    %7 = vector.load %arg5[%c0_7, %c0_8] : memref<1x96xf32, #tpu.memory_space<vmem>>, vector<1x96xf32>
    %cst_9 = arith.constant 0.000000e+00 : f32
    %8 = vector.broadcast %cst_9 : f32 to vector<2x32xf32>
    %9 = vector.extract_strided_slice %5 {offsets = [0, 0], sizes = [2, 96], strides = [1, 1]} : vector<16x96xf32> to vector<2x96xf32>
    %cst_10 = arith.constant dense<0.000000e+00> : vector<2x96xf32>
    %10 = tpu.matmul %8, %6, %cst_10 {dimension_numbers = #tpu.dot_dimension_numbers<[1], [0], [0], [1], [0, 0, 1, 1], [], []>} : vector<2x32xf32>, vector<32x96xf32>, vector<2x96xf32> -> vector<2x96xf32>
    %11 = vector.broadcast %7 : vector<1x96xf32> to vector<2x96xf32>
    %12 = arith.addf %10, %11 : vector<2x96xf32>
    %13 = vector.extract_strided_slice %9 {offsets = [0, 0], sizes = [2, 32], strides = [1, 1]} : vector<2x96xf32> to vector<2x32xf32>
    %14 = vector.extract_strided_slice %12 {offsets = [0, 0], sizes = [2, 32], strides = [1, 1]} : vector<2x96xf32> to vector<2x32xf32>
    %15 = arith.addf %13, %14 : vector<2x32xf32>
    %16 = arith.negf %15 : vector<2x32xf32>
    %17 = math.exp %16 : vector<2x32xf32>
    %cst_11 = arith.constant 1.000000e+00 : f32
    %18 = vector.broadcast %cst_11 : f32 to vector<2x32xf32>
    %19 = arith.addf %18, %17 : vector<2x32xf32>
    %20 = arith.divf %18, %19 : vector<2x32xf32>
    %21 = vector.extract_strided_slice %9 {offsets = [0, 32], sizes = [2, 32], strides = [1, 1]} : vector<2x96xf32> to vector<2x32xf32>
    %22 = vector.extract_strided_slice %12 {offsets = [0, 32], sizes = [2, 32], strides = [1, 1]} : vector<2x96xf32> to vector<2x32xf32>
    %23 = arith.addf %21, %22 : vector<2x32xf32>
    %24 = arith.negf %23 : vector<2x32xf32>
    %25 = math.exp %24 : vector<2x32xf32>
    %cst_12 = arith.constant 1.000000e+00 : f32
    %26 = vector.broadcast %cst_12 : f32 to vector<2x32xf32>
    %27 = arith.addf %26, %25 : vector<2x32xf32>
    %28 = arith.divf %26, %27 : vector<2x32xf32>
    %29 = vector.extract_strided_slice %9 {offsets = [0, 64], sizes = [2, 32], strides = [1, 1]} : vector<2x96xf32> to vector<2x32xf32>
    %30 = vector.extract_strided_slice %12 {offsets = [0, 64], sizes = [2, 32], strides = [1, 1]} : vector<2x96xf32> to vector<2x32xf32>
    %31 = arith.mulf %20, %30 : vector<2x32xf32>
    %32 = arith.addf %29, %31 : vector<2x32xf32>
    %33 = math.tanh %32 : vector<2x32xf32>
    %cst_13 = arith.constant 1.000000e+00 : f32
    %34 = vector.broadcast %cst_13 : f32 to vector<2x32xf32>
    %35 = arith.subf %34, %28 : vector<2x32xf32>
    %36 = arith.mulf %35, %33 : vector<2x32xf32>
    %37 = arith.mulf %28, %8 : vector<2x32xf32>
    %38 = arith.addf %36, %37 : vector<2x32xf32>
    %39 = vector.extract_strided_slice %5 {offsets = [2, 0], sizes = [2, 96], strides = [1, 1]} : vector<16x96xf32> to vector<2x96xf32>
    %cst_14 = arith.constant dense<0.000000e+00> : vector<2x96xf32>
    %40 = tpu.matmul %38, %6, %cst_14 {dimension_numbers = #tpu.dot_dimension_numbers<[1], [0], [0], [1], [0, 0, 1, 1], [], []>} : vector<2x32xf32>, vector<32x96xf32>, vector<2x96xf32> -> vector<2x96xf32>
    %41 = vector.broadcast %7 : vector<1x96xf32> to vector<2x96xf32>
    %42 = arith.addf %40, %41 : vector<2x96xf32>
    %43 = vector.extract_strided_slice %39 {offsets = [0, 0], sizes = [2, 32], strides = [1, 1]} : vector<2x96xf32> to vector<2x32xf32>
    %44 = vector.extract_strided_slice %42 {offsets = [0, 0], sizes = [2, 32], strides = [1, 1]} : vector<2x96xf32> to vector<2x32xf32>
    %45 = arith.addf %43, %44 : vector<2x32xf32>
    %46 = arith.negf %45 : vector<2x32xf32>
    %47 = math.exp %46 : vector<2x32xf32>
    %cst_15 = arith.constant 1.000000e+00 : f32
    %48 = vector.broadcast %cst_15 : f32 to vector<2x32xf32>
    %49 = arith.addf %48, %47 : vector<2x32xf32>
    %50 = arith.divf %48, %49 : vector<2x32xf32>
    %51 = vector.extract_strided_slice %39 {offsets = [0, 32], sizes = [2, 32], strides = [1, 1]} : vector<2x96xf32> to vector<2x32xf32>
    %52 = vector.extract_strided_slice %42 {offsets = [0, 32], sizes = [2, 32], strides = [1, 1]} : vector<2x96xf32> to vector<2x32xf32>
    %53 = arith.addf %51, %52 : vector<2x32xf32>
    %54 = arith.negf %53 : vector<2x32xf32>
    %55 = math.exp %54 : vector<2x32xf32>
    %cst_16 = arith.constant 1.000000e+00 : f32
    %56 = vector.broadcast %cst_16 : f32 to vector<2x32xf32>
    %57 = arith.addf %56, %55 : vector<2x32xf32>
    %58 = arith.divf %56, %57 : vector<2x32xf32>
    %59 = vector.extract_strided_slice %39 {offsets = [0, 64], sizes = [2, 32], strides = [1, 1]} : vector<2x96xf32> to vector<2x32xf32>
    %60 = vector.extract_strided_slice %42 {offsets = [0, 64], sizes = [2, 32], strides = [1, 1]} : vector<2x96xf32> to vector<2x32xf32>
    %61 = arith.mulf %50, %60 : vector<2x32xf32>
    %62 = arith.addf %59, %61 : vector<2x32xf32>
    %63 = math.tanh %62 : vector<2x32xf32>
    %cst_17 = arith.constant 1.000000e+00 : f32
    %64 = vector.broadcast %cst_17 : f32 to vector<2x32xf32>
    %65 = arith.subf %64, %58 : vector<2x32xf32>
    %66 = arith.mulf %65, %63 : vector<2x32xf32>
    %67 = arith.mulf %58, %38 : vector<2x32xf32>
    %68 = arith.addf %66, %67 : vector<2x32xf32>
    %69 = vector.extract_strided_slice %5 {offsets = [4, 0], sizes = [2, 96], strides = [1, 1]} : vector<16x96xf32> to vector<2x96xf32>
    %cst_18 = arith.constant dense<0.000000e+00> : vector<2x96xf32>
    %70 = tpu.matmul %68, %6, %cst_18 {dimension_numbers = #tpu.dot_dimension_numbers<[1], [0], [0], [1], [0, 0, 1, 1], [], []>} : vector<2x32xf32>, vector<32x96xf32>, vector<2x96xf32> -> vector<2x96xf32>
    %71 = vector.broadcast %7 : vector<1x96xf32> to vector<2x96xf32>
    %72 = arith.addf %70, %71 : vector<2x96xf32>
    %73 = vector.extract_strided_slice %69 {offsets = [0, 0], sizes = [2, 32], strides = [1, 1]} : vector<2x96xf32> to vector<2x32xf32>
    %74 = vector.extract_strided_slice %72 {offsets = [0, 0], sizes = [2, 32], strides = [1, 1]} : vector<2x96xf32> to vector<2x32xf32>
    %75 = arith.addf %73, %74 : vector<2x32xf32>
    %76 = arith.negf %75 : vector<2x32xf32>
    %77 = math.exp %76 : vector<2x32xf32>
    %cst_19 = arith.constant 1.000000e+00 : f32
    %78 = vector.broadcast %cst_19 : f32 to vector<2x32xf32>
    %79 = arith.addf %78, %77 : vector<2x32xf32>
    %80 = arith.divf %78, %79 : vector<2x32xf32>
    %81 = vector.extract_strided_slice %69 {offsets = [0, 32], sizes = [2, 32], strides = [1, 1]} : vector<2x96xf32> to vector<2x32xf32>
    %82 = vector.extract_strided_slice %72 {offsets = [0, 32], sizes = [2, 32], strides = [1, 1]} : vector<2x96xf32> to vector<2x32xf32>
    %83 = arith.addf %81, %82 : vector<2x32xf32>
    %84 = arith.negf %83 : vector<2x32xf32>
    %85 = math.exp %84 : vector<2x32xf32>
    %cst_20 = arith.constant 1.000000e+00 : f32
    %86 = vector.broadcast %cst_20 : f32 to vector<2x32xf32>
    %87 = arith.addf %86, %85 : vector<2x32xf32>
    %88 = arith.divf %86, %87 : vector<2x32xf32>
    %89 = vector.extract_strided_slice %69 {offsets = [0, 64], sizes = [2, 32], strides = [1, 1]} : vector<2x96xf32> to vector<2x32xf32>
    %90 = vector.extract_strided_slice %72 {offsets = [0, 64], sizes = [2, 32], strides = [1, 1]} : vector<2x96xf32> to vector<2x32xf32>
    %91 = arith.mulf %80, %90 : vector<2x32xf32>
    %92 = arith.addf %89, %91 : vector<2x32xf32>
    %93 = math.tanh %92 : vector<2x32xf32>
    %cst_21 = arith.constant 1.000000e+00 : f32
    %94 = vector.broadcast %cst_21 : f32 to vector<2x32xf32>
    %95 = arith.subf %94, %88 : vector<2x32xf32>
    %96 = arith.mulf %95, %93 : vector<2x32xf32>
    %97 = arith.mulf %88, %68 : vector<2x32xf32>
    %98 = arith.addf %96, %97 : vector<2x32xf32>
    %99 = vector.extract_strided_slice %5 {offsets = [6, 0], sizes = [2, 96], strides = [1, 1]} : vector<16x96xf32> to vector<2x96xf32>
    %cst_22 = arith.constant dense<0.000000e+00> : vector<2x96xf32>
    %100 = tpu.matmul %98, %6, %cst_22 {dimension_numbers = #tpu.dot_dimension_numbers<[1], [0], [0], [1], [0, 0, 1, 1], [], []>} : vector<2x32xf32>, vector<32x96xf32>, vector<2x96xf32> -> vector<2x96xf32>
    %101 = vector.broadcast %7 : vector<1x96xf32> to vector<2x96xf32>
    %102 = arith.addf %100, %101 : vector<2x96xf32>
    %103 = vector.extract_strided_slice %99 {offsets = [0, 0], sizes = [2, 32], strides = [1, 1]} : vector<2x96xf32> to vector<2x32xf32>
    %104 = vector.extract_strided_slice %102 {offsets = [0, 0], sizes = [2, 32], strides = [1, 1]} : vector<2x96xf32> to vector<2x32xf32>
    %105 = arith.addf %103, %104 : vector<2x32xf32>
    %106 = arith.negf %105 : vector<2x32xf32>
    %107 = math.exp %106 : vector<2x32xf32>
    %cst_23 = arith.constant 1.000000e+00 : f32
    %108 = vector.broadcast %cst_23 : f32 to vector<2x32xf32>
    %109 = arith.addf %108, %107 : vector<2x32xf32>
    %110 = arith.divf %108, %109 : vector<2x32xf32>
    %111 = vector.extract_strided_slice %99 {offsets = [0, 32], sizes = [2, 32], strides = [1, 1]} : vector<2x96xf32> to vector<2x32xf32>
    %112 = vector.extract_strided_slice %102 {offsets = [0, 32], sizes = [2, 32], strides = [1, 1]} : vector<2x96xf32> to vector<2x32xf32>
    %113 = arith.addf %111, %112 : vector<2x32xf32>
    %114 = arith.negf %113 : vector<2x32xf32>
    %115 = math.exp %114 : vector<2x32xf32>
    %cst_24 = arith.constant 1.000000e+00 : f32
    %116 = vector.broadcast %cst_24 : f32 to vector<2x32xf32>
    %117 = arith.addf %116, %115 : vector<2x32xf32>
    %118 = arith.divf %116, %117 : vector<2x32xf32>
    %119 = vector.extract_strided_slice %99 {offsets = [0, 64], sizes = [2, 32], strides = [1, 1]} : vector<2x96xf32> to vector<2x32xf32>
    %120 = vector.extract_strided_slice %102 {offsets = [0, 64], sizes = [2, 32], strides = [1, 1]} : vector<2x96xf32> to vector<2x32xf32>
    %121 = arith.mulf %110, %120 : vector<2x32xf32>
    %122 = arith.addf %119, %121 : vector<2x32xf32>
    %123 = math.tanh %122 : vector<2x32xf32>
    %cst_25 = arith.constant 1.000000e+00 : f32
    %124 = vector.broadcast %cst_25 : f32 to vector<2x32xf32>
    %125 = arith.subf %124, %118 : vector<2x32xf32>
    %126 = arith.mulf %125, %123 : vector<2x32xf32>
    %127 = arith.mulf %118, %98 : vector<2x32xf32>
    %128 = arith.addf %126, %127 : vector<2x32xf32>
    %129 = vector.extract_strided_slice %5 {offsets = [8, 0], sizes = [2, 96], strides = [1, 1]} : vector<16x96xf32> to vector<2x96xf32>
    %cst_26 = arith.constant dense<0.000000e+00> : vector<2x96xf32>
    %130 = tpu.matmul %128, %6, %cst_26 {dimension_numbers = #tpu.dot_dimension_numbers<[1], [0], [0], [1], [0, 0, 1, 1], [], []>} : vector<2x32xf32>, vector<32x96xf32>, vector<2x96xf32> -> vector<2x96xf32>
    %131 = vector.broadcast %7 : vector<1x96xf32> to vector<2x96xf32>
    %132 = arith.addf %130, %131 : vector<2x96xf32>
    %133 = vector.extract_strided_slice %129 {offsets = [0, 0], sizes = [2, 32], strides = [1, 1]} : vector<2x96xf32> to vector<2x32xf32>
    %134 = vector.extract_strided_slice %132 {offsets = [0, 0], sizes = [2, 32], strides = [1, 1]} : vector<2x96xf32> to vector<2x32xf32>
    %135 = arith.addf %133, %134 : vector<2x32xf32>
    %136 = arith.negf %135 : vector<2x32xf32>
    %137 = math.exp %136 : vector<2x32xf32>
    %cst_27 = arith.constant 1.000000e+00 : f32
    %138 = vector.broadcast %cst_27 : f32 to vector<2x32xf32>
    %139 = arith.addf %138, %137 : vector<2x32xf32>
    %140 = arith.divf %138, %139 : vector<2x32xf32>
    %141 = vector.extract_strided_slice %129 {offsets = [0, 32], sizes = [2, 32], strides = [1, 1]} : vector<2x96xf32> to vector<2x32xf32>
    %142 = vector.extract_strided_slice %132 {offsets = [0, 32], sizes = [2, 32], strides = [1, 1]} : vector<2x96xf32> to vector<2x32xf32>
    %143 = arith.addf %141, %142 : vector<2x32xf32>
    %144 = arith.negf %143 : vector<2x32xf32>
    %145 = math.exp %144 : vector<2x32xf32>
    %cst_28 = arith.constant 1.000000e+00 : f32
    %146 = vector.broadcast %cst_28 : f32 to vector<2x32xf32>
    %147 = arith.addf %146, %145 : vector<2x32xf32>
    %148 = arith.divf %146, %147 : vector<2x32xf32>
    %149 = vector.extract_strided_slice %129 {offsets = [0, 64], sizes = [2, 32], strides = [1, 1]} : vector<2x96xf32> to vector<2x32xf32>
    %150 = vector.extract_strided_slice %132 {offsets = [0, 64], sizes = [2, 32], strides = [1, 1]} : vector<2x96xf32> to vector<2x32xf32>
    %151 = arith.mulf %140, %150 : vector<2x32xf32>
    %152 = arith.addf %149, %151 : vector<2x32xf32>
    %153 = math.tanh %152 : vector<2x32xf32>
    %cst_29 = arith.constant 1.000000e+00 : f32
    %154 = vector.broadcast %cst_29 : f32 to vector<2x32xf32>
    %155 = arith.subf %154, %148 : vector<2x32xf32>
    %156 = arith.mulf %155, %153 : vector<2x32xf32>
    %157 = arith.mulf %148, %128 : vector<2x32xf32>
    %158 = arith.addf %156, %157 : vector<2x32xf32>
    %159 = vector.extract_strided_slice %5 {offsets = [10, 0], sizes = [2, 96], strides = [1, 1]} : vector<16x96xf32> to vector<2x96xf32>
    %cst_30 = arith.constant dense<0.000000e+00> : vector<2x96xf32>
    %160 = tpu.matmul %158, %6, %cst_30 {dimension_numbers = #tpu.dot_dimension_numbers<[1], [0], [0], [1], [0, 0, 1, 1], [], []>} : vector<2x32xf32>, vector<32x96xf32>, vector<2x96xf32> -> vector<2x96xf32>
    %161 = vector.broadcast %7 : vector<1x96xf32> to vector<2x96xf32>
    %162 = arith.addf %160, %161 : vector<2x96xf32>
    %163 = vector.extract_strided_slice %159 {offsets = [0, 0], sizes = [2, 32], strides = [1, 1]} : vector<2x96xf32> to vector<2x32xf32>
    %164 = vector.extract_strided_slice %162 {offsets = [0, 0], sizes = [2, 32], strides = [1, 1]} : vector<2x96xf32> to vector<2x32xf32>
    %165 = arith.addf %163, %164 : vector<2x32xf32>
    %166 = arith.negf %165 : vector<2x32xf32>
    %167 = math.exp %166 : vector<2x32xf32>
    %cst_31 = arith.constant 1.000000e+00 : f32
    %168 = vector.broadcast %cst_31 : f32 to vector<2x32xf32>
    %169 = arith.addf %168, %167 : vector<2x32xf32>
    %170 = arith.divf %168, %169 : vector<2x32xf32>
    %171 = vector.extract_strided_slice %159 {offsets = [0, 32], sizes = [2, 32], strides = [1, 1]} : vector<2x96xf32> to vector<2x32xf32>
    %172 = vector.extract_strided_slice %162 {offsets = [0, 32], sizes = [2, 32], strides = [1, 1]} : vector<2x96xf32> to vector<2x32xf32>
    %173 = arith.addf %171, %172 : vector<2x32xf32>
    %174 = arith.negf %173 : vector<2x32xf32>
    %175 = math.exp %174 : vector<2x32xf32>
    %cst_32 = arith.constant 1.000000e+00 : f32
    %176 = vector.broadcast %cst_32 : f32 to vector<2x32xf32>
    %177 = arith.addf %176, %175 : vector<2x32xf32>
    %178 = arith.divf %176, %177 : vector<2x32xf32>
    %179 = vector.extract_strided_slice %159 {offsets = [0, 64], sizes = [2, 32], strides = [1, 1]} : vector<2x96xf32> to vector<2x32xf32>
    %180 = vector.extract_strided_slice %162 {offsets = [0, 64], sizes = [2, 32], strides = [1, 1]} : vector<2x96xf32> to vector<2x32xf32>
    %181 = arith.mulf %170, %180 : vector<2x32xf32>
    %182 = arith.addf %179, %181 : vector<2x32xf32>
    %183 = math.tanh %182 : vector<2x32xf32>
    %cst_33 = arith.constant 1.000000e+00 : f32
    %184 = vector.broadcast %cst_33 : f32 to vector<2x32xf32>
    %185 = arith.subf %184, %178 : vector<2x32xf32>
    %186 = arith.mulf %185, %183 : vector<2x32xf32>
    %187 = arith.mulf %178, %158 : vector<2x32xf32>
    %188 = arith.addf %186, %187 : vector<2x32xf32>
    %189 = vector.extract_strided_slice %5 {offsets = [12, 0], sizes = [2, 96], strides = [1, 1]} : vector<16x96xf32> to vector<2x96xf32>
    %cst_34 = arith.constant dense<0.000000e+00> : vector<2x96xf32>
    %190 = tpu.matmul %188, %6, %cst_34 {dimension_numbers = #tpu.dot_dimension_numbers<[1], [0], [0], [1], [0, 0, 1, 1], [], []>} : vector<2x32xf32>, vector<32x96xf32>, vector<2x96xf32> -> vector<2x96xf32>
    %191 = vector.broadcast %7 : vector<1x96xf32> to vector<2x96xf32>
    %192 = arith.addf %190, %191 : vector<2x96xf32>
    %193 = vector.extract_strided_slice %189 {offsets = [0, 0], sizes = [2, 32], strides = [1, 1]} : vector<2x96xf32> to vector<2x32xf32>
    %194 = vector.extract_strided_slice %192 {offsets = [0, 0], sizes = [2, 32], strides = [1, 1]} : vector<2x96xf32> to vector<2x32xf32>
    %195 = arith.addf %193, %194 : vector<2x32xf32>
    %196 = arith.negf %195 : vector<2x32xf32>
    %197 = math.exp %196 : vector<2x32xf32>
    %cst_35 = arith.constant 1.000000e+00 : f32
    %198 = vector.broadcast %cst_35 : f32 to vector<2x32xf32>
    %199 = arith.addf %198, %197 : vector<2x32xf32>
    %200 = arith.divf %198, %199 : vector<2x32xf32>
    %201 = vector.extract_strided_slice %189 {offsets = [0, 32], sizes = [2, 32], strides = [1, 1]} : vector<2x96xf32> to vector<2x32xf32>
    %202 = vector.extract_strided_slice %192 {offsets = [0, 32], sizes = [2, 32], strides = [1, 1]} : vector<2x96xf32> to vector<2x32xf32>
    %203 = arith.addf %201, %202 : vector<2x32xf32>
    %204 = arith.negf %203 : vector<2x32xf32>
    %205 = math.exp %204 : vector<2x32xf32>
    %cst_36 = arith.constant 1.000000e+00 : f32
    %206 = vector.broadcast %cst_36 : f32 to vector<2x32xf32>
    %207 = arith.addf %206, %205 : vector<2x32xf32>
    %208 = arith.divf %206, %207 : vector<2x32xf32>
    %209 = vector.extract_strided_slice %189 {offsets = [0, 64], sizes = [2, 32], strides = [1, 1]} : vector<2x96xf32> to vector<2x32xf32>
    %210 = vector.extract_strided_slice %192 {offsets = [0, 64], sizes = [2, 32], strides = [1, 1]} : vector<2x96xf32> to vector<2x32xf32>
    %211 = arith.mulf %200, %210 : vector<2x32xf32>
    %212 = arith.addf %209, %211 : vector<2x32xf32>
    %213 = math.tanh %212 : vector<2x32xf32>
    %cst_37 = arith.constant 1.000000e+00 : f32
    %214 = vector.broadcast %cst_37 : f32 to vector<2x32xf32>
    %215 = arith.subf %214, %208 : vector<2x32xf32>
    %216 = arith.mulf %215, %213 : vector<2x32xf32>
    %217 = arith.mulf %208, %188 : vector<2x32xf32>
    %218 = arith.addf %216, %217 : vector<2x32xf32>
    %219 = vector.extract_strided_slice %5 {offsets = [14, 0], sizes = [2, 96], strides = [1, 1]} : vector<16x96xf32> to vector<2x96xf32>
    %cst_38 = arith.constant dense<0.000000e+00> : vector<2x96xf32>
    %220 = tpu.matmul %218, %6, %cst_38 {dimension_numbers = #tpu.dot_dimension_numbers<[1], [0], [0], [1], [0, 0, 1, 1], [], []>} : vector<2x32xf32>, vector<32x96xf32>, vector<2x96xf32> -> vector<2x96xf32>
    %221 = vector.broadcast %7 : vector<1x96xf32> to vector<2x96xf32>
    %222 = arith.addf %220, %221 : vector<2x96xf32>
    %223 = vector.extract_strided_slice %219 {offsets = [0, 0], sizes = [2, 32], strides = [1, 1]} : vector<2x96xf32> to vector<2x32xf32>
    %224 = vector.extract_strided_slice %222 {offsets = [0, 0], sizes = [2, 32], strides = [1, 1]} : vector<2x96xf32> to vector<2x32xf32>
    %225 = arith.addf %223, %224 : vector<2x32xf32>
    %226 = arith.negf %225 : vector<2x32xf32>
    %227 = math.exp %226 : vector<2x32xf32>
    %cst_39 = arith.constant 1.000000e+00 : f32
    %228 = vector.broadcast %cst_39 : f32 to vector<2x32xf32>
    %229 = arith.addf %228, %227 : vector<2x32xf32>
    %230 = arith.divf %228, %229 : vector<2x32xf32>
    %231 = vector.extract_strided_slice %219 {offsets = [0, 32], sizes = [2, 32], strides = [1, 1]} : vector<2x96xf32> to vector<2x32xf32>
    %232 = vector.extract_strided_slice %222 {offsets = [0, 32], sizes = [2, 32], strides = [1, 1]} : vector<2x96xf32> to vector<2x32xf32>
    %233 = arith.addf %231, %232 : vector<2x32xf32>
    %234 = arith.negf %233 : vector<2x32xf32>
    %235 = math.exp %234 : vector<2x32xf32>
    %cst_40 = arith.constant 1.000000e+00 : f32
    %236 = vector.broadcast %cst_40 : f32 to vector<2x32xf32>
    %237 = arith.addf %236, %235 : vector<2x32xf32>
    %238 = arith.divf %236, %237 : vector<2x32xf32>
    %239 = vector.extract_strided_slice %219 {offsets = [0, 64], sizes = [2, 32], strides = [1, 1]} : vector<2x96xf32> to vector<2x32xf32>
    %240 = vector.extract_strided_slice %222 {offsets = [0, 64], sizes = [2, 32], strides = [1, 1]} : vector<2x96xf32> to vector<2x32xf32>
    %241 = arith.mulf %230, %240 : vector<2x32xf32>
    %242 = arith.addf %239, %241 : vector<2x32xf32>
    %243 = math.tanh %242 : vector<2x32xf32>
    %cst_41 = arith.constant 1.000000e+00 : f32
    %244 = vector.broadcast %cst_41 : f32 to vector<2x32xf32>
    %245 = arith.subf %244, %238 : vector<2x32xf32>
    %246 = arith.mulf %245, %243 : vector<2x32xf32>
    %247 = arith.mulf %238, %218 : vector<2x32xf32>
    %248 = arith.addf %246, %247 : vector<2x32xf32>
    %c0_42 = arith.constant 0 : index
    %c0_43 = arith.constant 0 : index
    %249 = vector.load %arg6[%c0_42, %c0_43] : memref<32x16xf32, #tpu.memory_space<vmem>>, vector<32x16xf32>
    %cst_44 = arith.constant dense<0.000000e+00> : vector<2x16xf32>
    %250 = tpu.matmul %248, %249, %cst_44 {dimension_numbers = #tpu.dot_dimension_numbers<[1], [0], [0], [1], [0, 0, 1, 1], [], []>} : vector<2x32xf32>, vector<32x16xf32>, vector<2x16xf32> -> vector<2x16xf32>
    %c0_45 = arith.constant 0 : index
    %c0_46 = arith.constant 0 : index
    %251 = vector.load %arg7[%c0_45, %c0_46] : memref<1x16xf32, #tpu.memory_space<vmem>>, vector<1x16xf32>
    %252 = vector.broadcast %251 : vector<1x16xf32> to vector<2x16xf32>
    %253 = arith.addf %250, %252 : vector<2x16xf32>
    %cst_47 = arith.constant 5.000000e-01 : f32
    %254 = vector.broadcast %cst_47 : f32 to vector<2x16xf32>
    %255 = arith.mulf %253, %254 : vector<2x16xf32>
    %c0_48 = arith.constant 0 : index
    %c0_49 = arith.constant 0 : index
    %256 = vector.load %arg8[%c0_48, %c0_49] : memref<2x16xf32, #tpu.memory_space<vmem>>, vector<2x16xf32>
    %257 = arith.addf %255, %256 : vector<2x16xf32>
    %258 = arith.negf %257 : vector<2x16xf32>
    %259 = math.exp %258 : vector<2x16xf32>
    %cst_50 = arith.constant 1.000000e+00 : f32
    %260 = vector.broadcast %cst_50 : f32 to vector<2x16xf32>
    %261 = arith.addf %260, %259 : vector<2x16xf32>
    %262 = arith.divf %260, %261 : vector<2x16xf32>
    %c0_51 = arith.constant 0 : index
    %c0_52 = arith.constant 0 : index
    %263 = vector.load %arg9[%c0_51, %c0_52] : memref<2x16xf32, #tpu.memory_space<vmem>>, vector<2x16xf32>
    tpu.vector_store %arg9[%c0_51, %c0_52], %262 {strides = array<i32>} : memref<2x16xf32, #tpu.memory_space<vmem>>, vector<2x16xf32>,
    return
  }
  func.func @transform_0(%arg0: i32) -> (i32, i32) {
    %c0_i32 = arith.constant 0 : i32
    %c0_i32_0 = arith.constant 0 : i32
    %c0_i32_1 = arith.constant 0 : i32
    return %c0_i32, %c0_i32_0 : i32, i32
  }
  func.func @transform_1(%arg0: i32) -> (i32, i32) {
    %c0_i32 = arith.constant 0 : i32
    %c0_i32_0 = arith.constant 0 : i32
    %c0_i32_1 = arith.constant 0 : i32
    return %c0_i32, %c0_i32_0 : i32, i32
  }
  func.func @transform_2(%arg0: i32) -> (i32, i32) {
    %c0_i32 = arith.constant 0 : i32
    %c0_i32_0 = arith.constant 0 : i32
    %c0_i32_1 = arith.constant 0 : i32
    return %c0_i32, %c0_i32_0 : i32, i32
  }
  func.func @transform_3(%arg0: i32) -> (i32, i32) {
    %c0_i32 = arith.constant 0 : i32
    %c0_i32_0 = arith.constant 0 : i32
    %c0_i32_1 = arith.constant 0 : i32
    return %c0_i32, %c0_i32_0 : i32, i32
  }
  func.func @transform_4(%arg0: i32) -> (i32, i32) {
    %c0_i32 = arith.constant 0 : i32
    %c0_i32_0 = arith.constant 0 : i32
    %c0_i32_1 = arith.constant 0 : i32
    return %c0_i32, %c0_i32_0 : i32, i32
  }
  func.func @transform_5(%arg0: i32) -> (i32, i32) {
    %c0_i32 = arith.constant 0 : i32
    %c0_i32_0 = arith.constant 0 : i32
    %c0_i32_1 = arith.constant 0 : i32
    return %c0_i32, %c0_i32_0 : i32, i32
  }
  func.func @transform_6(%arg0: i32) -> (i32, i32) {
    %c0_i32 = arith.constant 0 : i32
    %c0_i32_0 = arith.constant 0 : i32
    %c0_i32_1 = arith.constant 0 : i32
    return %c0_i32, %c0_i32_0 : i32, i32
  }
  func.func @transform_7(%arg0: i32) -> (i32, i32) {
    %c0_i32 = arith.constant 0 : i32
    %c0_i32_0 = arith.constant 0 : i32
    %c0_i32_1 = arith.constant 0 : i32
    return %c0_i32, %c0_i32_0 : i32, i32
  }
  func.func @transform_8(%arg0: i32) -> (i32, i32) {
    %c0_i32 = arith.constant 0 : i32
    %c0_i32_0 = arith.constant 0 : i32
    %c0_i32_1 = arith.constant 0 : i32
    return %c0_i32, %c0_i32_0 : i32, i32
  }
}

</mosaic_0001>

<bundles_post_ra>
// kernel: mul.12
= control target key start
LH: loop header
LB: loop body
LE: loop exit
PB: predicated region body
PF: predicated region fallthrough
CT: control target
= control target key end

     0   :  { %vm42_vm0 = vcmask 1047556   ;;  %vm44_vm1 = vcmask 130048   ;;  %vm54_vm2 = vcmask 261248   ;;  %s111_s0 = inlined_call_operand.vmem [shape: f32[8,2,16], index: 0, kind: input, shape index: {}]   ;;  %s112_s1 = inlined_call_operand.vmem [shape: f32[8,32], index: 1, kind: output, shape index: {}]  }
   0x1   :  { %v62_v0 = vld [vmem:[%s111_s0 + $0xe] sm:$0x3]  ;;  %v63_v1 = vld [vmem:[%s111_s0 + $0xc] sm:$0x3]  ;;  %v64_v2 = vld [vmem:[%s111_s0 + $0xa] sm:$0x3] }
   0x2   :  { %8 = vst [vmem:[#allocation0 + $0x38] sm:$0x3] %v62_v0  ;;  %13 = vst [vmem:[#allocation0 + $0x30] sm:$0x3] %v63_v1  ;;  %v65_v3 = vld [vmem:[%s111_s0 + $0x8] sm:$0x3] }
   0x3   :  { %18 = vst [vmem:[#allocation0 + $0x28] sm:$0x3] %v64_v2  ;;  %v66_v4 = vld [vmem:[%s111_s0 + $0x6] sm:$0x3]  ;;  %v67_v5 = vld [vmem:[%s111_s0 + $0x4] sm:$0x3] }
   0x4   :  { %23 = vst [vmem:[#allocation0 + $0x20] sm:$0x3] %v65_v3  ;;  %28 = vst [vmem:[#allocation0 + $0x18] sm:$0x3] %v66_v4  ;;  %v68_v6 = vld [vmem:[%s111_s0 + $0x2] sm:$0x3] }
   0x5   :  { %33 = vst [vmem:[#allocation0 + $0x10] sm:$0x3] %v67_v5  ;;  %v38_v7 = vld [vmem:[%s111_s0] sm:$0x3]  ;;  %37 = vst [vmem:[#allocation0 + $0x8] sm:$0x3] %v68_v6 }
   0x6   :  { %39 = vst [vmem:[#allocation0] sm:$0x3] %v38_v7  ;;  %s70_s0 = smov 16  }
   0xb   :  { %v41_v8 = vld [vmem:[#allocation0] ss:$8 sm:$0xf0]   ;;  %v49_v9 = vld [vmem:[#allocation0 + $0x1] ss:$8 sm:$0xf0]  }
   0xd   :  { %v40_v10 = vld [vmem:[#allocation0] ss:$8 sm:$0xf]   ;;  %v47_v11 = vld [vmem:[#allocation0 + $0x1] ss:$8 sm:$0xf]  }
   0xe   :  { %v43_v12 = vsel %vm42_vm0, %v41_v8, %v40_v10  ;;  %v51_v13 = vsel %vm42_vm0, %v49_v9, %v47_v11 }
   0xf   :  { %52 = vrot.lane.b32.xlu0 %v51_v13, %s70_s0  ;;  %45 = vst.msk [vmem:[%s112_s1] sm:$0xff] %vm44_vm1, %v43_v12  }
  0x81   :  { %v53_v14 = vpop.permute.xlu0 %52  }
  0x82   :  { %55 = vst.msk [vmem:[%s112_s1] sm:$0xff] %vm54_vm2, %v53_v14  }

// kernel: custom-call.11
= control target key start
LH: loop header
LB: loop body
LE: loop exit
PB: predicated region body
PF: predicated region fallthrough
CT: control target
= control target key end

     0   :  { %5 = vsyncpa [#allocation4], 0  ;;  %s963_s0 = inlined_call_operand.vmem [shape: f32[2,16,16], index: 0, kind: input, shape index: {}]   ;;  %s964_s1 = inlined_call_operand.vmem [shape: f32[2,16,16], index: 1, kind: output, shape index: {0}]   ;;  %s965_s2 = inlined_call_operand.hbm [shape: s32[2,16], index: 2, kind: output, shape index: {1}]   ;;  %s966_s3 = inlined_call_operand.vmem [shape: s32[2,16], index: 3, kind: output, shape index: {2}]  }
   0x1   :  { %7 = vsyncpa [#allocation4 + $0x1], 0  ;;  %s755_s12 = smov 0   ;;  %s757_s13 = smov 0  }
   0x2   :  { %s759_s14 = smov 0   ;;  %s761_s15 = smov 0  }
   0x3 LB: > { %s776_s16 = sadd.s32 4294967295, %s723_s15   ;;  %s565_s17 = sadd.s32 4294967294, %s723_s15   ;;  %s723_s15 = sphi %s761_s15, %s974_s15   ;;  %s719_s14 = sphi %s759_s14, %s973_s14   ;;  %s715_s13 = sphi %s757_s13, %s972_s13   ;;  %s711_s12 = sphi %s755_s12, %s971_s12  }
   0x4   : > { %s780_s18 = sadd.s32 1, %s723_s15   ;;  %s17_s19 = sshrl.u32 %s723_s15, 3 }
   0x5   : > { %s18_s20 = sshrl.u32 %s780_s18, 3  ;;  %s22_s21 = sadd.s32 1, %s719_s14 }
   0x6   : > { %s19_s22 = ssub.s32 %s17_s19, %s18_s20  ;;  %p32_p0 = scmp.ne.s32.totalorder %s719_s14, %s715_s13 }
   0x7   : > { %p20_p1 = scmp.eq.s32.totalorder %s19_s22, 0  ;;  %p33_p2 = scmp.eq.s32.totalorder %s776_s16, 1 }
   0x8   : > { %p38_p3 = scmp.ne.s32.totalorder %s715_s13, %s711_s12  ;;  %p39_p4 = scmp.eq.s32.totalorder %s565_s17, 1 }
   0x9   : > { %s791_s23 = scalar_select %p20_p1, %s719_s14, %s22_s21  }
   0xa   : > { %p793_p5 = por %p33_p2, %p32_p0  ;;  %p797_p6 = por %p39_p4, %p38_p3 }
   0xb   : > { %p567_p7 = scmp.ge.s32.totalorder %s723_s15, 2 }
   0xc   : > { %s85_s26 = sand.u32 (!%p567_p7), 1, %s723_s15   ;;  %s569_s27 = sshll.u32 (!%p567_p7), %s723_s15, 4 }
   0xd   : > { %83 = sbr.rel (%p567_p7) target bundleno = 20 (0x14), region = 16  ;;  %s568_s28 = sshll.u32 (!%p567_p7), %s85_s26, 4 }
   0xe   : > { %s89_s4 = scalar_lea.vmem (!%p567_p7), %s963_s0, %s569_s27  ;;  %s87_s5 = scalar_lea.vmem (!%p567_p7), [#allocation0], %s568_s28 }
   0xf   : > { %v102_v0 = vld [vmem:[%s89_s4] sm:$0xff] (!%p567_p7)  ;;  %v104_v1 = vld [vmem:[%s89_s4 + $0x8] sm:$0xff] (!%p567_p7) }
  0x10   : > { %103 = vst [vmem:[%s87_s5] sm:$0xff] (!%p567_p7), %v102_v0  ;;  %105 = vst [vmem:[%s87_s5 + $0x8] sm:$0xff] (!%p567_p7), %v104_v1 }
  0x14 PF: > { %p570_p8 = scmp.ge.s32.totalorder %s723_s15, 1  ;;  %p110_p9 = scmp.lt.s32.totalorder %s723_s15, 3 }
  0x16   : > { %p111_p10 = pnand %p570_p8, %p110_p9 }
  0x18   : > { %114 = sbr.rel (%p111_p10) target bundleno = 450 (0x1c2), region = 39 }
  0x1f   : > { %s117_s6 = sand.u32 1, %s776_s16   ;;  %s132_s7 = sand.u32 1, %s715_s13   ;;  %v154_v2 = vlaneseq  ;;  %v733_v6 = vmov 0  }
  0x20   : > { %s571_s8 = sshll.u32 %s117_s6, 4  ;;  %s815_s9 = sshll.u32 %s132_s7, 1 }
  0x21   : > { %v818_v3 = vshrl.u32 %v154_v2, 7  ;;  %s119_s10 = scalar_lea.vmem [#allocation0], %s571_s8  ;;  %s820_s11 = scalar_lea.vmem [#allocation1], %s571_s8 }
  0x22   : > { %v143_v4 = vld [vmem:[%s119_s10] sm:$0xff]  ;;  %v575_v5 = vld [vmem:[%s119_s10 + $0x8] sm:$0xff]  ;;  %s149_s17 = sand.u32 7, %s776_s16   ;;  %s134_s20 = scalar_lea.vmem [#allocation3], %s815_s9 }
  0x23   : > { %144 = vst [vmem:[%s820_s11] sm:$0xff] %v143_v4  ;;  %576 = vst [vmem:[%s820_s11 + $0x8] sm:$0xff] %v575_v5  ;;  %s825_s19 = scalar_lea.vmem [#allocation2], %s149_s17  ;;  %s140_s21 = scalar_lea.vmem [#allocation6], %s815_s9 }
  0x24   : > { %153 = vst [vmem:[%s825_s19] sm:$0x1] %v733_v6  ;;  %s830_s22 = scalar_lea.vmem [#allocation5], %s149_s17  ;;  %s725_s26 = smov 0  }
  0x25 LB: >> { %s577_s27 = sshll.u32 %s727_s26, 3  ;;  %s162_s26 = sadd.s32 1, %s727_s26   ;;  %s727_s26 = sphi %s725_s26, %s162_s26  }
  0x26   : >> { %v166_v7 = vstv %s577_s27  ;;  %s164_s28 = scalar_lea.vmem [#allocation7], %s577_s27  ;;  %p159_p11 = scmp.ge.s32.totalorder %s162_s26, 2  }
  0x27   : >> { %v167_v8 = vadd.s32 %v166_v7, %v818_v3  ;;  %s833_s29 = smov (%p159_p11), 0  }
  0x28   : > { %161 = sbr.rel (!%p159_p11) target bundleno = 37 (0x25), region = 191 }
  0x29   : >> { %168 = vst [vmem:[%s164_s28] sm:$0xff] %v167_v8 }
  0x2f LB: >> { %v179_v9 = vld [vmem:[%s820_s11] sm:$0xff]  ;;  %v580_v10 = vld [vmem:[%s820_s11 + $0x8] sm:$0xff]  ;;  %v841_v11 = vadd.s32 8, %v818_v3  ;;  %v844_v13 = vstv %s731_s29  ;;  %s237_s30 = ssub.s32 128, %s731_s29  ;;  %v243_v46 = vand.u32 127, %v154_v2  ;;  %s249_s4 = scalar_lea.vmem %s820_s11, %s731_s29 [#allocation1]  ;;  %s731_s29 = sphi %s833_s29, %s174_s29  }
  0x30   : >> { %v180_v12 = vand.u32 2147483647, %v179_v9  ;;  %v192_v14 = vand.u32 2147483647, %v580_v10  ;;  %vm183_vm0 = vcmp.ge.s32.totalorder %v818_v3, %v844_v13  ;;  %v246_v49 = vld [vmem:[%s825_s19] ss:$0 sm:$0xff] }
  0x31   : >> { %vm195_vm3 = vcmp.ge.s32.totalorder %v841_v11, %v844_v13  ;;  %vm267_vm13 = vcmp.gt.s32.totalorder %v243_v46, %v844_v13  ;;  %vm290_vm14 = vcmp.gt.s32.totalorder %v841_v11, %v844_v13  ;;  %vm244_vm15 = vcmp.eq.s32.totalorder %v243_v46, %v844_v13  ;;  %v251_v50 = vld [vmem:[%s249_s4] ss:$0 sm:$0xff]  ;;  %s255_s6 = scalar_lea.vmem [#allocation7], %s731_s29  ;;  %s174_s29 = sadd.s32 1, %s731_s29  }
  0x32   : >> { %vm579_vm1 = vcmp.gt.f32.partialorder %v180_v12, -inf  ;;  %v257_v51 = vld [vmem:[%s255_s6] ss:$0 sm:$0xff]  ;;  %p171_p12 = scmp.ge.s32.totalorder %s174_s29, 16  }
  0x33   : >> { %vm187_vm2 = vmand %vm183_vm0, %vm579_vm1  ;;  %s400_s17 = sshrl.u32 (%p171_p12), %s776_s16, 3  ;;  %s586_s26 = sshll.u32 (%p171_p12), %s776_s16, 4 }
  0x34   : >> { %v188_v15 = vsel %vm187_vm2, %v818_v3, %v844_v13  ;;  %v189_v16 = vsel %vm187_vm2, %v180_v12, -inf  ;;  %vm864_vm0 = vmand %vm290_vm14, %vm244_vm15  ;;  %vm275_vm2 = vcmp.gt.s32.totalorder %v818_v3, %v844_v13  ;;  %s587_s27 = sshll.u32 (%p171_p12), %s400_s17, 5  ;;  %s377_s29 = scalar_lea.vmem (%p171_p12), %s964_s1, %s586_s26 }
  0x35   : >> { %vm198_vm4 = vcmp.lt.f32.partialorder %v189_v16, %v192_v14  ;;  %s734_s26 = smov (%p171_p12), [#allocation3]  }
  0x36   : >> { %vm199_vm5 = vmand %vm195_vm3, %vm198_vm4 }
  0x37   : >> { %v200_v17 = vsel %vm199_vm5, %v841_v11, %v188_v15  ;;  %v201_v18 = vsel %vm199_vm5, %v192_v14, %v189_v16  ;;  %vm279_vm4 = vmand %vm275_vm2, %vm244_vm15 }
  0x38   : >> { %v202_v19 = vrot.slane %v201_v18, 1  ;;  %v203_v20 = vrot.slane %v200_v17, 1 }
  0x3a   : >> { %vm204_vm6 = vcmp.ge.f32.partialorder %v202_v19, %v201_v18  ;;  %v207_v21 = vrot.slane %v202_v19, 1  ;;  %v208_v22 = vrot.slane %v203_v20, 1 }
  0x3b   : >> { %v205_v23 = vsel %vm204_vm6, %v202_v19, %v201_v18  ;;  %v206_v24 = vsel %vm204_vm6, %v203_v20, %v200_v17 }
  0x3c   : >> { %vm209_vm7 = vcmp.ge.f32.partialorder %v207_v21, %v205_v23  ;;  %v212_v25 = vrot.slane %v207_v21, 1  ;;  %v213_v26 = vrot.slane %v208_v22, 1 }
  0x3d   : >> { %v210_v27 = vsel %vm209_vm7, %v207_v21, %v205_v23  ;;  %v211_v28 = vsel %vm209_vm7, %v208_v22, %v206_v24 }
  0x3e   : >> { %vm214_vm8 = vcmp.ge.f32.partialorder %v212_v25, %v210_v27  ;;  %v217_v29 = vrot.slane %v212_v25, 1  ;;  %v218_v30 = vrot.slane %v213_v26, 1 }
  0x3f   : >> { %v215_v31 = vsel %vm214_vm8, %v212_v25, %v210_v27  ;;  %v216_v32 = vsel %vm214_vm8, %v213_v26, %v211_v28 }
  0x40   : >> { %vm219_vm9 = vcmp.ge.f32.partialorder %v217_v29, %v215_v31  ;;  %v222_v33 = vrot.slane %v217_v29, 1  ;;  %v223_v34 = vrot.slane %v218_v30, 1 }
  0x41   : >> { %v220_v35 = vsel %vm219_vm9, %v217_v29, %v215_v31  ;;  %v221_v36 = vsel %vm219_vm9, %v218_v30, %v216_v32 }
  0x42   : >> { %vm224_vm10 = vcmp.ge.f32.partialorder %v222_v33, %v220_v35  ;;  %v227_v37 = vrot.slane %v222_v33, 1  ;;  %v228_v38 = vrot.slane %v223_v34, 1 }
  0x43   : >> { %v225_v39 = vsel %vm224_vm10, %v222_v33, %v220_v35  ;;  %v226_v40 = vsel %vm224_vm10, %v223_v34, %v221_v36 }
  0x44   : >> { %vm229_vm11 = vcmp.ge.f32.partialorder %v227_v37, %v225_v39  ;;  %v232_v41 = vrot.slane %v227_v37, 1  ;;  %v233_v42 = vrot.slane %v228_v38, 1 }
  0x45   : >> { %v230_v43 = vsel %vm229_vm11, %v227_v37, %v225_v39  ;;  %v231_v44 = vsel %vm229_vm11, %v228_v38, %v226_v40 }
  0x46   : >> { %vm234_vm12 = vcmp.ge.f32.partialorder %v232_v41, %v230_v43 }
  0x47   : >> { %v236_v45 = vsel %vm234_vm12, %v233_v42, %v231_v44 }
  0x48   : >> { %238 = vrot.lane.b32.xlu0 %v236_v45, %s237_s30 }
  0xba   : >> { %v239_v48 = vpop.permute.xlu0 %238 }
  0xbb   : >> { %591 = vpush %v239_v48 }
  0xec   : >> { %s592_s5 = spop %591 }
  0xed   : >> { %v245_v52 = vstv %s592_s5  ;;  %s250_s8 = scalar_lea.vmem %s820_s11, %s592_s5 [#allocation1]  ;;  %s256_s10 = scalar_lea.vmem [#allocation7], %s592_s5 }
  0xee   : >> { %v247_v53 = vsel %vm244_vm15, %v245_v52, %v246_v49  ;;  %v252_v54 = vld [vmem:[%s250_s8] ss:$0 sm:$0xff]  ;;  %s910_s5 = scalar_lea.hbm (%p171_p12), %s965_s2, %s587_s27 }
  0xef   : >> { %v258_v55 = vld [vmem:[%s256_s10] ss:$0 sm:$0xff]  ;;  %248 = vst [vmem:[%s825_s19] sm:$0x1] %v247_v53  ;;  %253 = vst [vmem:[%s250_s8] sm:$0x1] %v251_v50  ;;  %vm261_vm1 = vcmp.ne.f32.partialorder %v252_v54, 0.0  ;;  %v268_v5 = vsel %vm267_vm13, %v252_v54, 0.0 }
  0xf0   : >> { %259 = vst [vmem:[%s256_s10] sm:$0x1] %v257_v51  ;;  %254 = vst [vmem:[%s249_s4] sm:$0x1] %v252_v54  ;;  %s368_s8 = scalar_lea.sflag (%p171_p12), [#allocation4], %s132_s7  ;;  %s657_s19 = sshll.u32 (%p171_p12), %s734_s26, 4  ;;  %s658_s19 = int_to_ptr.vmem [resolvable:$false] %s657_s19 }
  0xf1   : >> { %260 = vst [vmem:[%s255_s6] sm:$0x1] %v258_v55  ;;  %vm262_vm3 = vmand %vm244_vm15, %vm261_vm1  ;;  %s407_s6 = sshll.u32 (%p171_p12), %s134_s20, 4  ;;  %s408_s6 = int_to_ptr.vmem [resolvable:$true] %s407_s6 }
  0xf2   : >> { %v263_v56 = vsel %vm262_vm3, %v252_v54, 1.0  ;;  %s653_s10 = scalar_lea.vmem (%p171_p12), %s408_s6, 32  ;;  %p660_p2 = scmp.lt.s32.totalorder (%p171_p12), %s408_s6, %s658_s19 }
  0xf3   : >> { %v291_v57 = vsel %vm290_vm14, %v263_v56, 1.0  ;;  %v276_v58 = vsel %vm275_vm2, %v263_v56, 1.0  ;;  %p654_p13 = scmp.ne.s32.totalorder (%p171_p12), %s408_s6, %s653_s10 }
  0xf4   : >> { %649 = vrcp.f32 %v291_v57 }
  0xf5   : >> { %651 = vrcp.f32 %v276_v58  ;;  %p655_p0 = pnand (%p171_p12), %p654_p13, %p793_p5 }
  0xf6   : > { %v354_v14 = vld [vmem:[#allocation2] sm:$0x3] (%p171_p12) }
  0xf7   : >> { %v581_v60 = vld [vmem:[%s820_s11 + $0x8] sm:$0xff]  ;;  %v272_v63 = vld [vmem:[%s820_s11] sm:$0xff]  ;;  %356 = vst [vmem:[%s134_s20] sm:$0x3] (%p171_p12), %v354_v14  ;;  %p656_p1 = pneg (%p171_p12), %p655_p0 }
  0xf8   : > { %v301_v12 = vld [vmem:[#allocation7] sm:$0xff] (%p171_p12)  ;;  %v303_v13 = vld [vmem:[#allocation7 + $0x8] sm:$0xff] (%p171_p12) }
  0xfe   : >> { %v650_v59 = vpop.eup %649 }
  0xff   : >> { %v652_v61 = vpop.eup %651  ;;  %v293_v62 = vmul.f32 %v650_v59, %v581_v60 }
 0x100   : >> { %v278_v0 = vmul.f32 %v652_v61, %v272_v63 }
 0x101   : >> { %v295_v1 = vsel %vm864_vm0, %v293_v62, 0.0 }
 0x102   : >> { %296 = vadd.xlane.f32.xlu1 %v295_v1  ;;  %v280_v4 = vsel %vm279_vm4, %v278_v0, 0.0 }
 0x103   : >> { %281 = vadd.xlane.f32.xlu0 %v280_v4 }
 0x130   : > { %318 = vxpose.xlu0.b32.start [1/2] (short) (narrow) (%p171_p12), %v301_v12, 8 }
 0x134   : > { %319 = vxpose.xlu0.b32.end [2/2] (short) (narrow) (%p171_p12), %v303_v13, 8 }
 0x18f   : >> { %v297_v6 = vpop.xlane.xlu1 %296  ;;  %173 = sbr.rel (!%p171_p12) target bundleno = 47 (0x2f), region = 202 }
 0x190   : >> { %v298_v7 = vmul.f32 %v297_v6, %v268_v5  ;;  %v282_v8 = vpop.xlane.xlu0 %281 }
 0x191   : >> { %v283_v9 = vmul.f32 %v282_v8, %v268_v5 }
 0x192   : >> { %v299_v10 = vsub.f32 %v293_v62, %v298_v7 }
 0x193   : >> { %v284_v11 = vsub.f32 %v278_v0, %v283_v9 }
 0x194   : >> { %582 = vst [vmem:[%s820_s11 + $0x8] sm:$0xff] %v299_v10 }
 0x195   : >> { %285 = vst [vmem:[%s820_s11] sm:$0xff] %v284_v11 }
 0x19b   : > { %v392_v3 = vld [vmem:[%s820_s11 + $0x8] sm:$0xff] }
 0x19c   : > { %v390_v2 = vld [vmem:[%s820_s11] sm:$0xff]  ;;  %393 = vst [vmem:[%s377_s29 + $0x8] sm:$0xff] %v392_v3  ;;  %s659_s11 = scalar_lea.vmem %s658_s19, 64 }
 0x19d   : > { %391 = vst [vmem:[%s377_s29] sm:$0xff] %v390_v2  ;;  %p661_p3 = scmp.lt.s32.totalorder %s659_s11, %s653_s10 }
 0x19f   : > { %p662_p4 = por %p661_p3, %p660_p2 }
 0x1a1   : > { %p663_p8 = pnand %p662_p4, %p656_p1 }
 0x1a3   : > { %666 = shalt.err (!%p663_p8)
}
 0x1a4   : > { %s667_s7 = scalar_lea.hbm %s910_s5, 32  ;;  %s671_s28 = scalar_lea.hbm %s965_s2, 32 }
 0x1a5   : > { %p668_p9 = scmp.ne.s32.totalorder %s910_s5, %s667_s7  ;;  %p672_p12 = scmp.lt.u32.totalorder %s910_s5, %s965_s2 }
 0x1a6   : > { %p673_p13 = scmp.lt.u32.totalorder %s671_s28, %s667_s7  ;;  %p675_p1 = scmp.lt.u32.totalorder %s667_s7, %s910_s5 }
 0x1a7   : > { %p669_p10 = pnand %p668_p9, %p793_p5 }
 0x1a8   : > { %p674_p0 = por %p673_p13, %p672_p12 }
 0x1a9   : > { %p670_p11 = pneg %p669_p10 }
 0x1aa   : > { %p676_p2 = por %p675_p1, %p674_p0 }
 0x1ac   : > { %p677_p3 = pnand %p676_p2, %p670_p11 }
 0x1ae   : > { %680 = shalt.err (!%p677_p3)
}
 0x1af   : > { %593 = dma.vmem_to_hbm [thread:$0]  (%p793_p5), %s408_s6, 32, %s910_s5, %s368_s8  }
 0x1b0   : > { %v334_v15 = vpop.trf.xlu0  ;;  %s588_s4 = sshll.u32 (%p793_p5), %s400_s17, 1 }
 0x1b1   : > { %350 = vst [vmem:[%s830_s22] sm:$0x1] %v334_v15  ;;  %s416_s19 = scalar_lea.vmem (%p793_p5), %s966_s3, %s588_s4 }
 0x1b3   : > { %413 = sbr.rel (!%p793_p5) target bundleno = 450 (0x1c2), region = 80 }
 0x1b8   : > { %v360_v16 = vld [vmem:[#allocation5] sm:$0x3] }
 0x1b9   : > { %362 = vst [vmem:[%s140_s21] sm:$0x3] %v360_v16 }
 0x1c0   : > { %v432_v17 = vld [vmem:[%s140_s21] sm:$0x3] }
 0x1c1   : > { %433 = vst [vmem:[%s416_s19] sm:$0x3] %v432_v17 }
 0x1c2 PF: > { %s460_s22 = sand.u32 1, %s711_s12   ;;  %p596_p5 = pnand %p567_p7, %p797_p6 }
 0x1c3   : > { %s461_s24 = scalar_lea.sflag [#allocation4], %s460_s22 }
 0x1c4   : > { %706 = dma.done.wait (!%p596_p5), %s461_s24, 32  }
 0x1c5   : > { %708 = vsyncadd (!%p596_p5), %s461_s24, 4294967264  ;;  %p10_p4 = scmp.ge.s32.totalorder %s780_s18, 4   ;;  %s971_s12 = smov %s715_s13 }
 0x1c6   : > { %s972_s13 = smov %s719_s14  ;;  %s973_s14 = smov %s791_s23 }
 0x1c7   : > { %s974_s15 = smov %s780_s18  ;;  %12 = sbr.rel (!%p10_p4) target bundleno = 3 (0x3), region = 213 }
 0x1ce   :  { %473 = vsyncpa [#allocation4], 1 }
 0x1cf   :  { %475 = vsyncpa [#allocation4 + $0x1], 1 }

// kernel: custom-call.13
= control target key start
LH: loop header
LB: loop body
LE: loop exit
PB: predicated region body
PF: predicated region fallthrough
CT: control target
= control target key end

     0   :  { %s552_s6 = smov 0   ;;  %s554_s7 = smov 0   ;;  %s641_s0 = inlined_call_operand.vmem [shape: f32[2,1,16,16], index: 0, kind: input, shape index: {}]   ;;  %s642_s1 = inlined_call_operand.vmem [shape: f32[2,1,16,16], index: 1, kind: output, shape index: {}]  }
   0x1   :  { %s556_s8 = smov 0  }
   0x2 LB: > { %s468_s9 = sadd.s32 4294967295, %s538_s8   ;;  %s33_s10 = sadd.s32 1, %s534_s7  ;;  %s538_s8 = sphi %s556_s8, %s7_s8   ;;  %s534_s7 = sphi %s554_s7, %s644_s7   ;;  %s530_s6 = sphi %s552_s6, %s643_s6  }
   0x3   : > { %p35_p0 = scmp.ge.s32.totalorder %s33_s10, 2  ;;  %p470_p1 = scmp.ge.s32.totalorder %s538_s8, 2 }
   0x4   : > { %s49_s11 = sand.u32 (!%p470_p1), 1, %s538_s8   ;;  %s484_s12 = sshll.u32 (!%p470_p1), %s534_s7, 4 }
   0x5   : > { %s646_s10 = smov (%p35_p0, %s33_s10), 0  ;;  %47 = sbr.rel (%p470_p1) target bundleno = 12 (0xc), region = 16 }
   0x6   : > { %s471_s13 = sshll.u32 (!%p470_p1), %s49_s11, 4  ;;  %s58_s16 = scalar_lea.vmem (!%p470_p1), %s641_s0, %s484_s12 }
   0x7   : > { %v88_v0 = vld [vmem:[%s58_s16] sm:$0xff] (!%p470_p1)  ;;  %v90_v1 = vld [vmem:[%s58_s16 + $0x8] sm:$0xff] (!%p470_p1)  ;;  %s51_s17 = scalar_lea.vmem (!%p470_p1), [#allocation0], %s471_s13 }
   0x8   : > { %89 = vst [vmem:[%s51_s17] sm:$0xff] (!%p470_p1), %v88_v0  ;;  %91 = vst [vmem:[%s51_s17 + $0x8] sm:$0xff] (!%p470_p1), %v90_v1 }
   0xc PF: > { %p474_p2 = scmp.ge.s32.totalorder %s538_s8, 1  ;;  %p96_p3 = scmp.lt.s32.totalorder %s538_s8, 3 }
   0xe   : > { %p97_p4 = pnand %p474_p2, %p96_p3 }
  0x10   : > { %100 = sbr.rel (%p97_p4) target bundleno = 2373 (0x945), region = 54 }
  0x17   : > { %s103_s18 = sand.u32 1, %s468_s9   ;;  %v114_v2 = vlaneseq  ;;  %v540_v11 = vmov -1.0   ;;  %v541_v55 = vmov 0.0   ;;  %s485_s21 = sshll.u32 %s530_s6, 4 }
  0x18   : > { %s475_s19 = sshll.u32 %s103_s18, 4  ;;  %s368_s24 = scalar_lea.vmem %s642_s1, %s485_s21 }
  0x19   : > { %v579_v3 = vand.u32 127, %v114_v2  ;;  %v118_v4 = vshrl.u32 %v114_v2, 7  ;;  %s581_s20 = scalar_lea.vmem [#allocation0], %s475_s19 }
  0x1a   : > { %v121_v5 = vld [vmem:[%s581_s20] sm:$0xff]  ;;  %v477_v38 = vld [vmem:[%s581_s20 + $0x8] sm:$0xff] }
  0x1b   : > { %vm120_vm0 = vcmp.eq.s32.totalorder %v118_v4, %v579_v3  ;;  %vm116_vm1 = vcmp.lt.s32.totalorder %v579_v3, 16  ;;  %vm125_vm2 = vcmp.ge.s32.totalorder %v118_v4, %v579_v3  ;;  %vm155_vm4 = vcmp.eq.s32.totalorder %v579_v3, 0 }
  0x1c   : > { %v122_v6 = vsel %vm120_vm0, %v121_v5, 0.0  ;;  %vm126_vm3 = vmand %vm125_vm2, %vm116_vm1  ;;  %vm152_vm5 = vcmp.eq.s32.totalorder %v579_v3, %v118_v4  ;;  %v156_v12 = vsel %vm155_vm4, 1.0, %v540_v11  ;;  %vm170_vm6 = vcmp.eq.s32.totalorder %v579_v3, 1 }
  0x1d   : > { %123 = vadd.xlane.f32.xlu0 %v122_v6  ;;  %v127_v8 = vsel %vm126_vm3, %v121_v5, 0.0  ;;  %v157_v13 = vsel %vm152_vm5, %v156_v12, 0.0  ;;  %vm180_vm7 = vcmp.eq.s32.totalorder %v579_v3, 2  ;;  %vm190_vm8 = vcmp.eq.s32.totalorder %v579_v3, 3 }
  0x1e   : > { %vm200_vm9 = vcmp.eq.s32.totalorder %v579_v3, 4  ;;  %v135_v33 = vadd.s32 8, %v118_v4  ;;  %vm210_vm11 = vcmp.eq.s32.totalorder %v579_v3, 5  ;;  %vm220_vm14 = vcmp.eq.s32.totalorder %v579_v3, 6 }
  0x1f   : > { %vm230_vm0 = vcmp.eq.s32.totalorder %v579_v3, 7  ;;  %vm254_vm2 = vcmp.eq.s32.totalorder %v579_v3, 9  ;;  %vm268_vm3 = vcmp.eq.s32.totalorder %v579_v3, 10  ;;  %vm282_vm4 = vcmp.eq.s32.totalorder %v579_v3, 11 }
  0x20   : > { %vm136_vm10 = vcmp.eq.s32.totalorder %v135_v33, %v579_v3  ;;  %vm141_vm12 = vcmp.ge.s32.totalorder %v135_v33, %v579_v3  ;;  %vm163_vm15 = vcmp.eq.s32.totalorder %v579_v3, %v135_v33  ;;  %vm296_vm5 = vcmp.eq.s32.totalorder %v579_v3, 12 }
  0x21   : > { %v138_v39 = vsel %vm136_vm10, %v477_v38, 0.0  ;;  %vm142_vm13 = vmand %vm141_vm12, %vm116_vm1  ;;  %v164_v56 = vsel %vm163_vm15, -1.0, %v541_v55  ;;  %vm240_vm1 = vcmp.eq.s32.totalorder %v579_v3, 8 }
  0x22   : > { %v143_v46 = vsel %vm142_vm13, %v477_v38, 0.0 }
  0xaa   : > { %v585_v7 = vpop.xlane.xlu0 %123 }
  0xab   : > { %512 = vrcp.f32 %v585_v7  ;;  %vm349_vm10 = vweird.f32 %v585_v7 }
  0xb5   : > { %v592_v9 = vpop.eup %512 }
  0xb6   : > { %v129_v10 = vmul.f32 %v592_v9, %v127_v8 }
  0xb8   : > { %130 = vst [vmem:[#allocation2] sm:$0xff] %v129_v10 }
  0xbf   : > { %v166_v14 = vld [vmem:[#allocation2 + $0x1] ss:$0 sm:$0xff]  ;;  %v176_v17 = vld [vmem:[#allocation2 + $0x2] ss:$0 sm:$0xff]  ;;  %v186_v22 = vld [vmem:[#allocation2 + $0x3] ss:$0 sm:$0xff] }
  0xc0   : > { %v167_v15 = vxor.u32 2147483648, %v166_v14  ;;  %v177_v19 = vxor.u32 2147483648, %v176_v17  ;;  %v187_v24 = vxor.u32 2147483648, %v186_v22  ;;  %v196_v27 = vld [vmem:[#allocation2 + $0x4] ss:$0 sm:$0xff] }
  0xc1   : > { %v197_v29 = vxor.u32 2147483648, %v196_v27  ;;  %v206_v32 = vld [vmem:[#allocation2 + $0x5] ss:$0 sm:$0xff]  ;;  %v216_v40 = vld [vmem:[#allocation2 + $0x6] ss:$0 sm:$0xff] }
  0xc2   : > { %v171_v16 = vmul.f32 %v167_v15, %v157_v13  ;;  %v207_v35 = vxor.u32 2147483648, %v206_v32  ;;  %v217_v42 = vxor.u32 2147483648, %v216_v40  ;;  %v226_v49 = vld [vmem:[#allocation2 + $0x7] ss:$0 sm:$0xff] }
  0xc3   : > { %v227_v52 = vxor.u32 2147483648, %v226_v49 }
  0xc4   : > { %172 = vadd.xlane.f32.xlu0 %v171_v16 }
 0x151   : > { %v173_v18 = vpop.xlane.xlu0 %172 }
 0x152   : > { %v174_v20 = vsel %vm170_vm6, %v173_v18, %v157_v13  ;;  %vm310_vm6 = vcmp.eq.s32.totalorder %v579_v3, 13 }
 0x153   : > { %v181_v21 = vmul.f32 %v177_v19, %v174_v20 }
 0x155   : > { %182 = vadd.xlane.f32.xlu1 %v181_v21 }
 0x1e2   : > { %v183_v23 = vpop.xlane.xlu1 %182 }
 0x1e3   : > { %v184_v25 = vsel %vm180_vm7, %v183_v23, %v174_v20  ;;  %vm324_vm7 = vcmp.eq.s32.totalorder %v579_v3, 14 }
 0x1e4   : > { %v191_v26 = vmul.f32 %v187_v24, %v184_v25 }
 0x1e6   : > { %192 = vadd.xlane.f32.xlu1 %v191_v26 }
 0x273   : > { %v193_v28 = vpop.xlane.xlu1 %192 }
 0x274   : > { %v194_v30 = vsel %vm190_vm8, %v193_v28, %v184_v25  ;;  %vm338_vm8 = vcmp.eq.s32.totalorder %v579_v3, 15 }
 0x275   : > { %v201_v31 = vmul.f32 %v197_v29, %v194_v30 }
 0x277   : > { %202 = vadd.xlane.f32.xlu0 %v201_v31 }
 0x304   : > { %v203_v34 = vpop.xlane.xlu0 %202 }
 0x305   : > { %v204_v36 = vsel %vm200_vm9, %v203_v34, %v194_v30 }
 0x306   : > { %v211_v37 = vmul.f32 %v207_v35, %v204_v36 }
 0x308   : > { %212 = vadd.xlane.f32.xlu1 %v211_v37 }
 0x30c   : > { %139 = vadd.xlane.f32.xlu1 %v138_v39 }
 0x395   : > { %v213_v41 = vpop.xlane.xlu1 %212 }
 0x396   : > { %v214_v43 = vsel %vm210_vm11, %v213_v41, %v204_v36 }
 0x397   : > { %v221_v44 = vmul.f32 %v217_v42, %v214_v43 }
 0x399   : > { %222 = vadd.xlane.f32.xlu0 %v221_v44  ;;  %v604_v45 = vpop.xlane.xlu1 %139 }
 0x39a   : > { %514 = vrcp.f32 %v604_v45  ;;  %vm354_vm9 = vweird.f32 %v604_v45 }
 0x3a4   : > { %v610_v47 = vpop.eup %514 }
 0x3a5   : > { %v145_v48 = vmul.f32 %v610_v47, %v143_v46 }
 0x3a7   : > { %146 = vst [vmem:[#allocation2 + $0x8] sm:$0xff] %v145_v48 }
 0x3ae   : > { %v236_v50 = vld [vmem:[#allocation2 + $0x8] ss:$0 sm:$0xff]  ;;  %v250_v61 = vld [vmem:[#allocation2 + $0x9] ss:$0 sm:$0xff]  ;;  %v264_v6 = vld [vmem:[#allocation2 + $0xa] ss:$0 sm:$0xff] }
 0x3af   : > { %v237_v53 = vxor.u32 2147483648, %v236_v50  ;;  %v251_v0 = vxor.u32 2147483648, %v250_v61  ;;  %v265_v11 = vxor.u32 2147483648, %v264_v6  ;;  %v278_v16 = vld [vmem:[#allocation2 + $0xb] ss:$0 sm:$0xff] }
 0x3b0   : > { %v279_v19 = vxor.u32 2147483648, %v278_v16  ;;  %v292_v24 = vld [vmem:[#allocation2 + $0xc] ss:$0 sm:$0xff]  ;;  %v306_v32 = vld [vmem:[#allocation2 + $0xd] ss:$0 sm:$0xff] }
 0x3b1   : > { %v245_v58 = vmul.f32 %v237_v53, %v164_v56  ;;  %v293_v27 = vxor.u32 2147483648, %v292_v24  ;;  %v307_v35 = vxor.u32 2147483648, %v306_v32  ;;  %v320_v40 = vld [vmem:[#allocation2 + $0xe] ss:$0 sm:$0xff]  ;;  %v334_v50 = vld [vmem:[#allocation2 + $0xf] ss:$0 sm:$0xff] }
 0x426   : > { %v223_v51 = vpop.xlane.xlu0 %222 }
 0x427   : > { %v224_v54 = vsel %vm220_vm14, %v223_v51, %v214_v43  ;;  %v321_v43 = vxor.u32 2147483648, %v320_v40 }
 0x428   : > { %v231_v57 = vmul.f32 %v227_v52, %v224_v54 }
 0x42a   : > { %232 = vadd.xlane.f32.xlu0 %v231_v57 }
 0x42e   : > { %246 = vadd.xlane.f32.xlu0 %v245_v58 }
 0x4b7   : > { %v233_v59 = vpop.xlane.xlu0 %232 }
 0x4b8   : > { %v234_v60 = vsel %vm230_vm0, %v233_v59, %v224_v54 }
 0x4b9   : > { %v241_v62 = vmul.f32 %v237_v53, %v234_v60  ;;  %v335_v53 = vxor.u32 2147483648, %v334_v50 }
 0x4bb   : > { %v247_v63 = vpop.xlane.xlu0 %246  ;;  %242 = vadd.xlane.f32.xlu1 %v241_v62 }
 0x4bc   : > { %v248_v1 = vsel %vm240_vm1, %v247_v63, %v164_v56 }
 0x4bd   : > { %v259_v2 = vmul.f32 %v251_v0, %v248_v1 }
 0x4bf   : > { %260 = vadd.xlane.f32.xlu0 %v259_v2 }
 0x548   : > { %v243_v4 = vpop.xlane.xlu1 %242 }
 0x549   : > { %v244_v5 = vsel %vm240_vm1, %v243_v4, %v234_v60 }
 0x54a   : > { %v255_v8 = vmul.f32 %v251_v0, %v244_v5 }
 0x54c   : > { %v261_v10 = vpop.xlane.xlu0 %260  ;;  %256 = vadd.xlane.f32.xlu1 %v255_v8 }
 0x54d   : > { %v262_v12 = vsel %vm254_vm2, %v261_v10, %v248_v1 }
 0x54e   : > { %v273_v13 = vmul.f32 %v265_v11, %v262_v12 }
 0x550   : > { %274 = vadd.xlane.f32.xlu0 %v273_v13 }
 0x5d9   : > { %v257_v14 = vpop.xlane.xlu1 %256 }
 0x5da   : > { %v258_v15 = vsel %vm254_vm2, %v257_v14, %v244_v5 }
 0x5db   : > { %v269_v17 = vmul.f32 %v265_v11, %v258_v15 }
 0x5dd   : > { %v275_v18 = vpop.xlane.xlu0 %274  ;;  %270 = vadd.xlane.f32.xlu1 %v269_v17 }
 0x5de   : > { %v276_v20 = vsel %vm268_vm3, %v275_v18, %v262_v12 }
 0x5df   : > { %v287_v21 = vmul.f32 %v279_v19, %v276_v20 }
 0x5e1   : > { %288 = vadd.xlane.f32.xlu0 %v287_v21 }
 0x66a   : > { %v271_v22 = vpop.xlane.xlu1 %270 }
 0x66b   : > { %v272_v23 = vsel %vm268_vm3, %v271_v22, %v258_v15 }
 0x66c   : > { %v283_v25 = vmul.f32 %v279_v19, %v272_v23 }
 0x66e   : > { %v289_v26 = vpop.xlane.xlu0 %288  ;;  %284 = vadd.xlane.f32.xlu1 %v283_v25 }
 0x66f   : > { %v290_v28 = vsel %vm282_vm4, %v289_v26, %v276_v20 }
 0x670   : > { %v301_v29 = vmul.f32 %v293_v27, %v290_v28 }
 0x672   : > { %302 = vadd.xlane.f32.xlu0 %v301_v29 }
 0x6fb   : > { %v285_v30 = vpop.xlane.xlu1 %284 }
 0x6fc   : > { %v286_v31 = vsel %vm282_vm4, %v285_v30, %v272_v23 }
 0x6fd   : > { %v297_v33 = vmul.f32 %v293_v27, %v286_v31 }
 0x6ff   : > { %v303_v34 = vpop.xlane.xlu0 %302  ;;  %298 = vadd.xlane.f32.xlu1 %v297_v33 }
 0x700   : > { %v304_v36 = vsel %vm296_vm5, %v303_v34, %v290_v28 }
 0x701   : > { %v315_v37 = vmul.f32 %v307_v35, %v304_v36 }
 0x703   : > { %316 = vadd.xlane.f32.xlu0 %v315_v37 }
 0x78c   : > { %v299_v38 = vpop.xlane.xlu1 %298 }
 0x78d   : > { %v300_v39 = vsel %vm296_vm5, %v299_v38, %v286_v31 }
 0x78e   : > { %v311_v41 = vmul.f32 %v307_v35, %v300_v39 }
 0x790   : > { %v317_v42 = vpop.xlane.xlu0 %316  ;;  %312 = vadd.xlane.f32.xlu1 %v311_v41 }
 0x791   : > { %v318_v44 = vsel %vm310_vm6, %v317_v42, %v304_v36 }
 0x792   : > { %v329_v46 = vmul.f32 %v321_v43, %v318_v44 }
 0x794   : > { %330 = vadd.xlane.f32.xlu0 %v329_v46 }
 0x81d   : > { %v313_v48 = vpop.xlane.xlu1 %312 }
 0x81e   : > { %v314_v49 = vsel %vm310_vm6, %v313_v48, %v300_v39 }
 0x81f   : > { %v325_v51 = vmul.f32 %v321_v43, %v314_v49 }
 0x821   : > { %v331_v52 = vpop.xlane.xlu0 %330  ;;  %326 = vadd.xlane.f32.xlu1 %v325_v51 }
 0x822   : > { %v332_v54 = vsel %vm324_vm7, %v331_v52, %v318_v44 }
 0x823   : > { %v343_v55 = vmul.f32 %v335_v53, %v332_v54 }
 0x825   : > { %344 = vadd.xlane.f32.xlu0 %v343_v55 }
 0x8ae   : > { %v327_v56 = vpop.xlane.xlu1 %326 }
 0x8af   : > { %v328_v57 = vsel %vm324_vm7, %v327_v56, %v314_v49 }
 0x8b0   : > { %v339_v58 = vmul.f32 %v335_v53, %v328_v57 }
 0x8b2   : > { %v345_v59 = vpop.xlane.xlu0 %344  ;;  %340 = vadd.xlane.f32.xlu1 %v339_v58 }
 0x8b3   : > { %v346_v60 = vsel %vm338_vm8, %v345_v59, %v332_v54 }
 0x8b4   : > { %v353_v61 = vmul.f32 %v610_v47, %v346_v60 }
 0x8b6   : > { %v355_v62 = vsel %vm354_vm9, %v346_v60, %v353_v61 }
 0x8b7   : > { %401 = vst [vmem:[%s368_s24 + $0x8] sm:$0xff] %v355_v62 }
 0x93f   : > { %v341_v63 = vpop.xlane.xlu1 %340 }
 0x940   : > { %v342_v0 = vsel %vm338_vm8, %v341_v63, %v328_v57 }
 0x941   : > { %v348_v1 = vmul.f32 %v592_v9, %v342_v0 }
 0x943   : > { %v350_v3 = vsel %vm349_vm10, %v342_v0, %v348_v1 }
 0x944   : > { %399 = vst [vmem:[%s368_s24] sm:$0xff] %v350_v3 }
 0x945 PF: > { %s7_s8 = sadd.s32 1, %s538_s8   ;;  %s643_s6 = smov %s534_s7 }
 0x946   : > { %p4_p5 = scmp.ge.s32.totalorder %s7_s8, 4   ;;  %s644_s7 = smov %s646_s10 }
 0x948   :  { %6 = sbr.rel (!%p4_p5) target bundleno = 2 (0x2), region = 136 }

// kernel: model_forward.3
= control target key start
LH: loop header
LB: loop body
LE: loop exit
PB: predicated region body
PF: predicated region fallthrough
CT: control target
= control target key end

     0   :  { %vm18_vm0 = vcmask 130048   ;;  %vm130_vm1 = vcmask 785408   ;;  %s229_s0 = inlined_call_operand.vmem [shape: f32[16,16], index: 0, kind: input, shape index: {}]   ;;  %s230_s2 = inlined_call_operand.vmem [shape: f32[16,96], index: 2, kind: input, shape index: {}]   ;;  %s231_s1 = inlined_call_operand.vmem [shape: f32[16,16], index: 1, kind: input, shape index: {}]   ;;  %s232_s3 = inlined_call_operand.vmem [shape: f32[16,16], index: 3, kind: output, shape index: {0}]   ;;  %s233_s4 = inlined_call_operand.vmem [shape: f32[16,96], index: 4, kind: output, shape index: {1}]  }
   0x1   :  { %v16_v0 = vld [vmem:[%s229_s0] sm:$0xff]  ;;  %v17_v1 = vld [vmem:[%s229_s0 + $0x8] sm:$0xff] }
   0x2   :  { %v19_v2 = vsel %vm18_vm0, %v16_v0, -inf  ;;  %v22_v3 = vsel %vm18_vm0, %v17_v1, -inf  ;;  %v47_v14 = vld [vmem:[%s230_s2] sm:$0xff]  ;;  %v48_v15 = vld [vmem:[%s230_s2 + $0x8] sm:$0xff] }
   0x3   :  { %20 = vmax.xlane.f32.xlu0 %v19_v2  ;;  %v154_v16 = vpack.c.bf16 %v48_v15, %v47_v14  ;;  %v41_v20 = vld [vmem:[%s231_s1] sm:$0xff]  ;;  %v42_v24 = vld [vmem:[%s231_s1 + $0x8] sm:$0xff] }
   0x5   :  { %155 = vmatprep.subr.bf16.mxu0 %v154_v16 }
   0x6   :  { %157 = vmatpush3.bf16.msra.mxu0 %v154_v16 }
   0x7   :  { %23 = vmax.xlane.f32.xlu0 %v22_v3 }
  0x90   :  { %v21_v4 = vpop.xlane.xlu0 %20 }
  0x91   :  { %v25_v5 = vsub.f32 %v16_v0, %v21_v4 }
  0x93   :  { %v27_v6 = vmul.f32 1.442695, %v25_v5 }
  0x94   :  { %v24_v7 = vpop.xlane.xlu0 %23 }
  0x95   :  { %158 = vpow2.f32 %v27_v6  ;;  %v26_v8 = vsub.f32 %v17_v1, %v24_v7 }
  0x97   :  { %v29_v9 = vmul.f32 1.442695, %v26_v8 }
  0x99   :  { %160 = vpow2.f32 %v29_v9 }
  0x9f   :  { %v159_v10 = vpop.eup %158 }
  0xa0   :  { %v31_v11 = vsel %vm18_vm0, %v159_v10, 0.0 }
  0xa1   :  { %32 = vadd.xlane.f32.xlu1 %v31_v11 }
  0xa3   :  { %v161_v12 = vpop.eup %160 }
  0xa4   :  { %v34_v13 = vsel %vm18_vm0, %v161_v12, 0.0 }
  0xa5   :  { %35 = vadd.xlane.f32.xlu1 %v34_v13 }
 0x12e   :  { %v33_v17 = vpop.xlane.xlu1 %32 }
 0x12f   :  { %162 = vrcp.f32 %v33_v17 }
 0x132   :  { %v36_v18 = vpop.xlane.xlu1 %35 }
 0x133   :  { %164 = vrcp.f32 %v36_v18 }
 0x139   :  { %v163_v19 = vpop.eup %162 }
 0x13a   :  { %v38_v21 = vmul.f32 %v163_v19, %v159_v10 }
 0x13c   :  { %v43_v22 = vmul.f32 %v41_v20, %v38_v21 }
 0x13d   :  { %v165_v23 = vpop.eup %164 }
 0x13e   :  { %v40_v25 = vmul.f32 %v165_v23, %v161_v12  ;;  %45 = vst.msk [vmem:[%s232_s3] sm:$0xff] %vm18_vm0, %v43_v22  ;;  %151 = vmatprep.mubr.msk.f32.mxu0 %vm18_vm0, %v43_v22 }
 0x140   :  { %v44_v26 = vmul.f32 %v42_v24, %v40_v25 }
 0x142   :  { %46 = vst.msk [vmem:[%s232_s3 + $0x8] sm:$0xff] %vm18_vm0, %v44_v26  ;;  %152 = vmatmul.mubr.msk.f32.vlgmr.msra.gmra.mrb[0].mxu0 %vm18_vm0, %v44_v26 }
 0x215   :  { %v153_v27 = vpop.f32.mrb[0].mxu0 }
 0x216   :  { %132 = vst.msk [vmem:[%s233_s4 + $0x8] sm:$0xff] %vm130_vm1, %v153_v27  ;;  %v121_v28 = vpop.f32.mrb[1].mxu0 }
 0x217   :  { %131 = vst.msk [vmem:[%s233_s4] sm:$0xff] %vm130_vm1, %v121_v28 }

// kernel: custom-call.12
= control target key start
LH: loop header
LB: loop body
LE: loop exit
PB: predicated region body
PF: predicated region fallthrough
CT: control target
= control target key end

     0   :  { %s551_s6 = smov 0   ;;  %s553_s7 = smov 0   ;;  %s674_s0 = inlined_call_operand.vmem [shape: f32[2,1,16,16], index: 0, kind: input, shape index: {}]   ;;  %s675_s1 = inlined_call_operand.vmem [shape: f32[2,1,16,16], index: 1, kind: output, shape index: {}]  }
   0x1   :  { %s555_s8 = smov 0  }
   0x2 LB: > { %s467_s9 = sadd.s32 4294967295, %s537_s8   ;;  %s33_s10 = sadd.s32 1, %s533_s7  ;;  %s537_s8 = sphi %s555_s8, %s7_s8   ;;  %s533_s7 = sphi %s553_s7, %s677_s7   ;;  %s529_s6 = sphi %s551_s6, %s676_s6  }
   0x3   : > { %p35_p0 = scmp.ge.s32.totalorder %s33_s10, 2  ;;  %p469_p1 = scmp.ge.s32.totalorder %s537_s8, 2 }
   0x4   : > { %s49_s11 = sand.u32 (!%p469_p1), 1, %s537_s8   ;;  %s483_s12 = sshll.u32 (!%p469_p1), %s533_s7, 4 }
   0x5   : > { %s679_s10 = smov (%p35_p0, %s33_s10), 0  ;;  %47 = sbr.rel (%p469_p1) target bundleno = 12 (0xc), region = 16 }
   0x6   : > { %s470_s13 = sshll.u32 (!%p469_p1), %s49_s11, 4  ;;  %s58_s16 = scalar_lea.vmem (!%p469_p1), %s674_s0, %s483_s12 }
   0x7   : > { %v88_v0 = vld [vmem:[%s58_s16] sm:$0xff] (!%p469_p1)  ;;  %v90_v1 = vld [vmem:[%s58_s16 + $0x8] sm:$0xff] (!%p469_p1)  ;;  %s51_s17 = scalar_lea.vmem (!%p469_p1), [#allocation0], %s470_s13 }
   0x8   : > { %89 = vst [vmem:[%s51_s17] sm:$0xff] (!%p469_p1), %v88_v0  ;;  %91 = vst [vmem:[%s51_s17 + $0x8] sm:$0xff] (!%p469_p1), %v90_v1 }
   0xc PF: > { %p473_p2 = scmp.ge.s32.totalorder %s537_s8, 1  ;;  %p96_p3 = scmp.lt.s32.totalorder %s537_s8, 3 }
   0xe   : > { %p97_p4 = pnand %p473_p2, %p96_p3 }
  0x10   : > { %100 = sbr.rel (%p97_p4) target bundleno = 2375 (0x947), region = 54 }
  0x17   : > { %s103_s18 = sand.u32 1, %s467_s9   ;;  %v114_v2 = vlaneseq  ;;  %v539_v12 = vmov -1.0   ;;  %v540_v49 = vmov 0.0   ;;  %s484_s21 = sshll.u32 %s529_s6, 4 }
  0x18   : > { %s474_s19 = sshll.u32 %s103_s18, 4  ;;  %s367_s24 = scalar_lea.vmem %s675_s1, %s484_s21 }
  0x19   : > { %v578_v3 = vand.u32 127, %v114_v2  ;;  %v580_v4 = vshrl.u32 %v114_v2, 7  ;;  %s584_s20 = scalar_lea.vmem [#allocation0], %s474_s19 }
  0x1a   : > { %v476_v6 = vld [vmem:[%s584_s20 + $0x8] sm:$0xff]  ;;  %v121_v38 = vld [vmem:[%s584_s20] sm:$0xff] }
  0x1b   : > { %vm116_vm0 = vcmp.lt.s32.totalorder %v578_v3, 16  ;;  %v135_v5 = vadd.s32 8, %v580_v4  ;;  %vm162_vm4 = vcmp.eq.s32.totalorder %v578_v3, 15  ;;  %vm170_vm6 = vcmp.eq.s32.totalorder %v578_v3, 14 }
  0x1c   : > { %v163_v13 = vsel %vm162_vm4, 1.0, %v539_v12  ;;  %vm180_vm7 = vcmp.eq.s32.totalorder %v578_v3, 13  ;;  %vm190_vm8 = vcmp.eq.s32.totalorder %v578_v3, 12  ;;  %vm200_vm9 = vcmp.eq.s32.totalorder %v578_v3, 11 }
  0x1d   : > { %vm136_vm1 = vcmp.eq.s32.totalorder %v135_v5, %v578_v3  ;;  %vm141_vm2 = vcmp.le.s32.totalorder %v135_v5, %v578_v3  ;;  %vm159_vm5 = vcmp.eq.s32.totalorder %v578_v3, %v135_v5  ;;  %vm120_vm10 = vcmp.eq.s32.totalorder %v580_v4, %v578_v3 }
  0x1e   : > { %v138_v7 = vsel %vm136_vm1, %v476_v6, 0.0  ;;  %vm142_vm3 = vmand %vm141_vm2, %vm116_vm0  ;;  %v164_v14 = vsel %vm159_vm5, %v163_v13, 0.0  ;;  %v122_v39 = vsel %vm120_vm10, %v121_v38, 0.0  ;;  %vm210_vm11 = vcmp.eq.s32.totalorder %v578_v3, 10 }
  0x1f   : > { %v143_v8 = vsel %vm142_vm3, %v476_v6, 0.0  ;;  %139 = vadd.xlane.f32.xlu0 %v138_v7  ;;  %vm125_vm12 = vcmp.le.s32.totalorder %v580_v4, %v578_v3  ;;  %vm152_vm14 = vcmp.eq.s32.totalorder %v578_v3, %v580_v4  ;;  %vm220_vm15 = vcmp.eq.s32.totalorder %v578_v3, 9 }
  0x20   : > { %vm126_vm13 = vmand %vm125_vm12, %vm116_vm0  ;;  %v153_v50 = vsel %vm152_vm14, -1.0, %v540_v49  ;;  %vm240_vm0 = vcmp.eq.s32.totalorder %v578_v3, 7  ;;  %vm230_vm1 = vcmp.eq.s32.totalorder %v578_v3, 8  ;;  %vm254_vm2 = vcmp.eq.s32.totalorder %v578_v3, 6 }
  0x21   : > { %v127_v46 = vsel %vm126_vm13, %v121_v38, 0.0  ;;  %vm268_vm3 = vcmp.eq.s32.totalorder %v578_v3, 5  ;;  %vm282_vm4 = vcmp.eq.s32.totalorder %v578_v3, 4  ;;  %vm296_vm5 = vcmp.eq.s32.totalorder %v578_v3, 3 }
  0xac   : > { %v591_v9 = vpop.xlane.xlu0 %139 }
  0xad   : > { %511 = vrcp.f32 %v591_v9  ;;  %vm353_vm10 = vweird.f32 %v591_v9 }
  0xb7   : > { %v594_v10 = vpop.eup %511 }
  0xb8   : > { %v145_v11 = vmul.f32 %v594_v10, %v143_v8 }
  0xba   : > { %146 = vst [vmem:[#allocation2 + $0x8] sm:$0xff] %v145_v11 }
  0xc1   : > { %v166_v15 = vld [vmem:[#allocation2 + $0xe] ss:$0 sm:$0xff]  ;;  %v176_v18 = vld [vmem:[#allocation2 + $0xd] ss:$0 sm:$0xff]  ;;  %v186_v23 = vld [vmem:[#allocation2 + $0xc] ss:$0 sm:$0xff] }
  0xc2   : > { %v167_v16 = vxor.u32 2147483648, %v166_v15  ;;  %v177_v20 = vxor.u32 2147483648, %v176_v18  ;;  %v187_v25 = vxor.u32 2147483648, %v186_v23  ;;  %v196_v28 = vld [vmem:[#allocation2 + $0xb] ss:$0 sm:$0xff] }
  0xc3   : > { %v197_v30 = vxor.u32 2147483648, %v196_v28  ;;  %v206_v33 = vld [vmem:[#allocation2 + $0xa] ss:$0 sm:$0xff]  ;;  %v216_v40 = vld [vmem:[#allocation2 + $0x9] ss:$0 sm:$0xff] }
  0xc4   : > { %v171_v17 = vmul.f32 %v167_v16, %v164_v14  ;;  %v207_v35 = vxor.u32 2147483648, %v206_v33  ;;  %v217_v42 = vxor.u32 2147483648, %v216_v40  ;;  %v226_v54 = vld [vmem:[#allocation2 + $0x8] ss:$0 sm:$0xff] }
  0xc5   : > { %v227_v56 = vxor.u32 2147483648, %v226_v54 }
  0xc6   : > { %172 = vadd.xlane.f32.xlu0 %v171_v17 }
 0x153   : > { %v173_v19 = vpop.xlane.xlu0 %172 }
 0x154   : > { %v174_v21 = vsel %vm170_vm6, %v173_v19, %v164_v14  ;;  %vm310_vm6 = vcmp.eq.s32.totalorder %v578_v3, 2 }
 0x155   : > { %v181_v22 = vmul.f32 %v177_v20, %v174_v21 }
 0x157   : > { %182 = vadd.xlane.f32.xlu1 %v181_v22 }
 0x1e4   : > { %v183_v24 = vpop.xlane.xlu1 %182 }
 0x1e5   : > { %v184_v26 = vsel %vm180_vm7, %v183_v24, %v174_v21  ;;  %vm324_vm7 = vcmp.eq.s32.totalorder %v578_v3, 1 }
 0x1e6   : > { %v191_v27 = vmul.f32 %v187_v25, %v184_v26 }
 0x1e8   : > { %192 = vadd.xlane.f32.xlu1 %v191_v27 }
 0x275   : > { %v193_v29 = vpop.xlane.xlu1 %192 }
 0x276   : > { %v194_v31 = vsel %vm190_vm8, %v193_v29, %v184_v26  ;;  %vm337_vm8 = vcmp.eq.s32.totalorder %v578_v3, 0 }
 0x277   : > { %v201_v32 = vmul.f32 %v197_v30, %v194_v31 }
 0x279   : > { %202 = vadd.xlane.f32.xlu0 %v201_v32 }
 0x306   : > { %v203_v34 = vpop.xlane.xlu0 %202 }
 0x307   : > { %v204_v36 = vsel %vm200_vm9, %v203_v34, %v194_v31 }
 0x308   : > { %v211_v37 = vmul.f32 %v207_v35, %v204_v36 }
 0x30a   : > { %212 = vadd.xlane.f32.xlu1 %v211_v37 }
 0x30e   : > { %123 = vadd.xlane.f32.xlu1 %v122_v39 }
 0x397   : > { %v213_v41 = vpop.xlane.xlu1 %212 }
 0x398   : > { %v214_v43 = vsel %vm210_vm11, %v213_v41, %v204_v36 }
 0x399   : > { %v221_v44 = vmul.f32 %v217_v42, %v214_v43 }
 0x39b   : > { %222 = vadd.xlane.f32.xlu0 %v221_v44  ;;  %v607_v45 = vpop.xlane.xlu1 %123 }
 0x39c   : > { %513 = vrcp.f32 %v607_v45  ;;  %vm348_vm9 = vweird.f32 %v607_v45 }
 0x3a6   : > { %v614_v47 = vpop.eup %513 }
 0x3a7   : > { %v129_v48 = vmul.f32 %v614_v47, %v127_v46 }
 0x3a9   : > { %130 = vst [vmem:[#allocation2] sm:$0xff] %v129_v48 }
 0x3b0   : > { %v236_v51 = vld [vmem:[#allocation2 + $0x7] ss:$0 sm:$0xff]  ;;  %v250_v59 = vld [vmem:[#allocation2 + $0x6] ss:$0 sm:$0xff]  ;;  %v264_v4 = vld [vmem:[#allocation2 + $0x5] ss:$0 sm:$0xff] }
 0x3b1   : > { %v237_v52 = vxor.u32 2147483648, %v236_v51  ;;  %v251_v60 = vxor.u32 2147483648, %v250_v59  ;;  %v265_v6 = vxor.u32 2147483648, %v264_v4  ;;  %v278_v14 = vld [vmem:[#allocation2 + $0x4] ss:$0 sm:$0xff] }
 0x3b2   : > { %v279_v16 = vxor.u32 2147483648, %v278_v14  ;;  %v292_v22 = vld [vmem:[#allocation2 + $0x3] ss:$0 sm:$0xff]  ;;  %v306_v30 = vld [vmem:[#allocation2 + $0x2] ss:$0 sm:$0xff] }
 0x3b3   : > { %v241_v53 = vmul.f32 %v237_v52, %v153_v50  ;;  %v293_v24 = vxor.u32 2147483648, %v292_v22  ;;  %v307_v32 = vxor.u32 2147483648, %v306_v30  ;;  %v320_v38 = vld [vmem:[#allocation2 + $0x1] ss:$0 sm:$0xff]  ;;  %v333_v48 = vld [vmem:[#allocation2] ss:$0 sm:$0xff] }
 0x3b4   : > { %v321_v40 = vxor.u32 2147483648, %v320_v38 }
 0x3b5   : > { %242 = vadd.xlane.f32.xlu1 %v241_v53 }
 0x428   : > { %v223_v55 = vpop.xlane.xlu0 %222 }
 0x429   : > { %v224_v57 = vsel %vm220_vm15, %v223_v55, %v214_v43 }
 0x42a   : > { %v231_v58 = vmul.f32 %v227_v56, %v224_v57 }
 0x42c   : > { %232 = vadd.xlane.f32.xlu0 %v231_v58 }
 0x442   : > { %v243_v61 = vpop.xlane.xlu1 %242 }
 0x443   : > { %v244_v62 = vsel %vm240_vm0, %v243_v61, %v153_v50  ;;  %v334_v50 = vxor.u32 2147483648, %v333_v48 }
 0x444   : > { %v255_v63 = vmul.f32 %v251_v60, %v244_v62 }
 0x446   : > { %256 = vadd.xlane.f32.xlu1 %v255_v63 }
 0x4b9   : > { %v233_v0 = vpop.xlane.xlu0 %232 }
 0x4ba   : > { %v234_v1 = vsel %vm230_vm1, %v233_v0, %v224_v57 }
 0x4bb   : > { %v245_v2 = vmul.f32 %v237_v52, %v234_v1 }
 0x4bd   : > { %246 = vadd.xlane.f32.xlu0 %v245_v2 }
 0x4d3   : > { %v257_v5 = vpop.xlane.xlu1 %256 }
 0x4d4   : > { %v258_v7 = vsel %vm254_vm2, %v257_v5, %v244_v62 }
 0x4d5   : > { %v269_v8 = vmul.f32 %v265_v6, %v258_v7 }
 0x4d7   : > { %270 = vadd.xlane.f32.xlu1 %v269_v8 }
 0x54a   : > { %v247_v11 = vpop.xlane.xlu0 %246 }
 0x54b   : > { %v248_v12 = vsel %vm240_vm0, %v247_v11, %v234_v1 }
 0x54c   : > { %v259_v13 = vmul.f32 %v251_v60, %v248_v12 }
 0x54e   : > { %260 = vadd.xlane.f32.xlu0 %v259_v13 }
 0x564   : > { %v271_v15 = vpop.xlane.xlu1 %270 }
 0x565   : > { %v272_v17 = vsel %vm268_vm3, %v271_v15, %v258_v7 }
 0x566   : > { %v283_v18 = vmul.f32 %v279_v16, %v272_v17 }
 0x568   : > { %284 = vadd.xlane.f32.xlu1 %v283_v18 }
 0x5db   : > { %v261_v19 = vpop.xlane.xlu0 %260 }
 0x5dc   : > { %v262_v20 = vsel %vm254_vm2, %v261_v19, %v248_v12 }
 0x5dd   : > { %v273_v21 = vmul.f32 %v265_v6, %v262_v20 }
 0x5df   : > { %274 = vadd.xlane.f32.xlu0 %v273_v21 }
 0x5f5   : > { %v285_v23 = vpop.xlane.xlu1 %284 }
 0x5f6   : > { %v286_v25 = vsel %vm282_vm4, %v285_v23, %v272_v17 }
 0x5f7   : > { %v297_v26 = vmul.f32 %v293_v24, %v286_v25 }
 0x5f9   : > { %298 = vadd.xlane.f32.xlu1 %v297_v26 }
 0x66c   : > { %v275_v27 = vpop.xlane.xlu0 %274 }
 0x66d   : > { %v276_v28 = vsel %vm268_vm3, %v275_v27, %v262_v20 }
 0x66e   : > { %v287_v29 = vmul.f32 %v279_v16, %v276_v28 }
 0x670   : > { %288 = vadd.xlane.f32.xlu0 %v287_v29 }
 0x686   : > { %v299_v31 = vpop.xlane.xlu1 %298 }
 0x687   : > { %v300_v33 = vsel %vm296_vm5, %v299_v31, %v286_v25 }
 0x688   : > { %v311_v34 = vmul.f32 %v307_v32, %v300_v33 }
 0x68a   : > { %312 = vadd.xlane.f32.xlu1 %v311_v34 }
 0x6fd   : > { %v289_v35 = vpop.xlane.xlu0 %288 }
 0x6fe   : > { %v290_v36 = vsel %vm282_vm4, %v289_v35, %v276_v28 }
 0x6ff   : > { %v301_v37 = vmul.f32 %v293_v24, %v290_v36 }
 0x701   : > { %302 = vadd.xlane.f32.xlu0 %v301_v37 }
 0x717   : > { %v313_v39 = vpop.xlane.xlu1 %312 }
 0x718   : > { %v314_v41 = vsel %vm310_vm6, %v313_v39, %v300_v33 }
 0x719   : > { %v325_v42 = vmul.f32 %v321_v40, %v314_v41 }
 0x71b   : > { %326 = vadd.xlane.f32.xlu1 %v325_v42 }
 0x78e   : > { %v303_v43 = vpop.xlane.xlu0 %302 }
 0x78f   : > { %v304_v44 = vsel %vm296_vm5, %v303_v43, %v290_v36 }
 0x790   : > { %v315_v46 = vmul.f32 %v307_v32, %v304_v44 }
 0x792   : > { %316 = vadd.xlane.f32.xlu0 %v315_v46 }
 0x7a8   : > { %v327_v49 = vpop.xlane.xlu1 %326 }
 0x7a9   : > { %v328_v51 = vsel %vm324_vm7, %v327_v49, %v314_v41 }
 0x7aa   : > { %v338_v52 = vmul.f32 %v334_v50, %v328_v51 }
 0x7ac   : > { %339 = vadd.xlane.f32.xlu1 %v338_v52 }
 0x81f   : > { %v317_v53 = vpop.xlane.xlu0 %316 }
 0x820   : > { %v318_v54 = vsel %vm310_vm6, %v317_v53, %v304_v44 }
 0x821   : > { %v329_v55 = vmul.f32 %v321_v40, %v318_v54 }
 0x823   : > { %330 = vadd.xlane.f32.xlu0 %v329_v55 }
 0x839   : > { %v340_v56 = vpop.xlane.xlu1 %339 }
 0x83a   : > { %v341_v57 = vsel %vm337_vm8, %v340_v56, %v328_v51 }
 0x83b   : > { %v347_v58 = vmul.f32 %v614_v47, %v341_v57 }
 0x83d   : > { %v349_v59 = vsel %vm348_vm9, %v341_v57, %v347_v58 }
 0x83e   : > { %398 = vst [vmem:[%s367_s24] sm:$0xff] %v349_v59 }
 0x8b0   : > { %v331_v60 = vpop.xlane.xlu0 %330 }
 0x8b1   : > { %v332_v61 = vsel %vm324_vm7, %v331_v60, %v318_v54 }
 0x8b2   : > { %v342_v62 = vmul.f32 %v334_v50, %v332_v61 }
 0x8b4   : > { %343 = vadd.xlane.f32.xlu0 %v342_v62 }
 0x941   : > { %v344_v63 = vpop.xlane.xlu0 %343 }
 0x942   : > { %v345_v0 = vsel %vm337_vm8, %v344_v63, %v332_v61 }
 0x943   : > { %v352_v1 = vmul.f32 %v594_v10, %v345_v0 }
 0x945   : > { %v354_v2 = vsel %vm353_vm10, %v345_v0, %v352_v1 }
 0x946   : > { %400 = vst [vmem:[%s367_s24 + $0x8] sm:$0xff] %v354_v2 }
 0x947 PF: > { %s7_s8 = sadd.s32 1, %s537_s8   ;;  %s676_s6 = smov %s533_s7 }
 0x948   : > { %p4_p5 = scmp.ge.s32.totalorder %s7_s8, 4   ;;  %s677_s7 = smov %s679_s10 }
 0x94a   :  { %6 = sbr.rel (!%p4_p5) target bundleno = 2 (0x2), region = 135 }

// kernel: model_forward.5
= control target key start
LH: loop header
LB: loop body
LE: loop exit
PB: predicated region body
PF: predicated region fallthrough
CT: control target
= control target key end

     0   :  { %v2499_v3 = vmov 0.0   ;;  %v70_v25 = vlaneseq  ;;  %s2500_s15 = smov 64   ;;  %vm80_vm0 = vcmask 523264   ;;  %vm1598_vm1 = vcmask 261120   ;;  %s3288_s1 = inlined_call_operand.vmem [shape: f32[64,192], index: 1, kind: input, shape index: {}]   ;;  %s3289_s2 = inlined_call_operand.vmem [shape: f32[1,192], index: 2, kind: input, shape index: {}]   ;;  %s3290_s0 = inlined_call_operand.vmem [shape: f32[8,32,192], index: 0, kind: input, shape index: {}]   ;;  %s3291_s7 = inlined_call_operand.vmem [shape: f32[32,5], index: 7, kind: input, shape index: {}]   ;;  %s3292_s3 = inlined_call_operand.vmem [shape: f32[32,5], index: 3, kind: input, shape index: {}]   ;;  %s3293_s6 = inlined_call_operand.<no memory space> [shape: f32[1,1], index: 6, kind: input, shape index: {}]   ;;  %s3294_s4 = inlined_call_operand.vmem [shape: f32[1,5], index: 4, kind: input, shape index: {}]   ;;  %s3295_s8 = inlined_call_operand.vmem [shape: f32[1,5], index: 8, kind: input, shape index: {}]   ;;  %s3296_s9 = inlined_call_operand.vmem [shape: f32[1,5], index: 9, kind: input, shape index: {}]   ;;  %s3297_s5 = inlined_call_operand.vmem [shape: f32[1,5], index: 5, kind: input, shape index: {}]   ;;  %s3298_s10 = inlined_call_operand.<no memory space> [shape: f32[1,1], index: 10, kind: input, shape index: {}]   ;;  %s3299_s11 = inlined_call_operand.vmem [shape: f32[32,1], index: 11, kind: output, shape index: {0}]   ;;  %s3300_s12 = inlined_call_operand.vmem [shape: f32[32,1], index: 12, kind: output, shape index: {1}]  }
   0x1   :  { %v45_v0 = vld [vmem:[%s3288_s1 + $0x8] sm:$0xff]  ;;  %v47_v1 = vld [vmem:[%s3288_s1 + $0x18] sm:$0xff]  ;;  %v44_v2 = vld [vmem:[%s3288_s1] sm:$0xff]  ;;  %148 = vmatprep.mubr.f32.mxu0 %v2499_v3  ;;  %338 = vmatprep.mubr.f32.mxu1 %v2499_v3  ;;  %vm1707_vm2 = vcmask 39936   ;;  %vm1929_vm3 = vcmask 7168  }
   0x2   :  { %v2578_v4 = vpack.c.bf16 %v47_v1, %v45_v0  ;;  %v46_v5 = vld [vmem:[%s3288_s1 + $0x10] sm:$0xff]  ;;  %v49_v6 = vld [vmem:[%s3288_s1 + $0x28] sm:$0xff]  ;;  %v51_v7 = vld [vmem:[%s3288_s1 + $0x38] sm:$0xff]  ;;  %v71_v26 = vshrl.u32 %v70_v25, 7 }
   0x3   :  { %v2589_v8 = vpack.c.bf16 %v46_v5, %v44_v2  ;;  %v2591_v9 = vpack.c.bf16 %v51_v7, %v49_v6  ;;  %v48_v10 = vld [vmem:[%s3288_s1 + $0x20] sm:$0xff]  ;;  %v50_v11 = vld [vmem:[%s3288_s1 + $0x30] sm:$0xff]  ;;  %v53_v12 = vld [vmem:[%s3288_s1 + $0x48] sm:$0xff] }
   0x4   :  { %2129 = vmatprep.subr.bf16.mxu0 %v2578_v4  ;;  %v55_v13 = vld [vmem:[%s3288_s1 + $0x58] sm:$0xff]  ;;  %2145 = vmatprep.subr.bf16.mxu1 %v2578_v4  ;;  %v2608_v14 = vpack.c.bf16 %v50_v11, %v48_v10  ;;  %v52_v16 = vld [vmem:[%s3288_s1 + $0x40] sm:$0xff]  ;;  %v54_v17 = vld [vmem:[%s3288_s1 + $0x50] sm:$0xff]  ;;  %v72_v27 = vsub.s32 0, %v71_v26  ;;  %v76_v57 = vsub.s32 1, %v71_v26 }
   0x5   :  { %2131 = vmatpush1.bf16.msra.mxu0 %v2589_v8  ;;  %2147 = vmatpush1.bf16.msra.mxu1 %v2589_v8  ;;  %v2612_v15 = vpack.c.bf16 %v55_v13, %v53_v12  ;;  %v57_v18 = vld [vmem:[%s3288_s1 + $0x68] sm:$0xff]  ;;  %v59_v19 = vld [vmem:[%s3288_s1 + $0x78] sm:$0xff]  ;;  %v2628_v20 = vpack.c.bf16 %v54_v17, %v52_v16  ;;  %v56_v22 = vld [vmem:[%s3288_s1 + $0x60] sm:$0xff] }
   0x6   :  { %2133 = vmatprep.subr.bf16.mxu0 %v2591_v9  ;;  %2149 = vmatprep.subr.bf16.mxu1 %v2591_v9  ;;  %v2632_v21 = vpack.c.bf16 %v59_v19, %v57_v18  ;;  %v58_v23 = vld [vmem:[%s3288_s1 + $0x70] sm:$0xff]  ;;  %v60_v28 = vld [vmem:[%s3289_s2] sm:$0x3]  ;;  %v62_v1 = vld [vmem:[%s3290_s0 + $0x8] sm:$0xff] }
   0x7   :  { %v2642_v24 = vpack.c.bf16 %v58_v23, %v56_v22  ;;  %v2670_v29 = vrot.slane %v60_v28, %v72_v27  ;;  %v61_v30 = vld [vmem:[%s3290_s0] sm:$0xff]  ;;  %v63_v35 = vld [vmem:[%s3290_s0 + $0x10] sm:$0xff]  ;;  %v2688_v60 = vrot.slane %v60_v28, %v76_v57  ;;  %v64_v11 = vld [vmem:[%s3290_s0 + $0x18] sm:$0xff] }
   0x8   :  { %v65_v41 = vld [vmem:[%s3290_s0 + $0x20] sm:$0xff]  ;;  %v67_v47 = vld [vmem:[%s3290_s0 + $0x30] sm:$0xff]  ;;  %v66_v18 = vld [vmem:[%s3290_s0 + $0x28] sm:$0xff] }
   0x9   :  { %2135 = vmatpush1.bf16.msra.mxu0 %v2608_v14  ;;  %2151 = vmatpush1.bf16.msra.mxu1 %v2608_v14  ;;  %v68_v26 = vld [vmem:[%s3290_s0 + $0x38] sm:$0xff] }
   0xa   :  { %2137 = vmatprep.subr.bf16.mxu0 %v2612_v15  ;;  %2153 = vmatprep.subr.bf16.mxu1 %v2612_v15 }
   0xd   :  { %2139 = vmatpush1.bf16.msra.mxu0 %v2628_v20  ;;  %2155 = vmatpush1.bf16.msra.mxu1 %v2628_v20 }
   0xe   :  { %2141 = vmatprep.subr.bf16.mxu0 %v2632_v21  ;;  %2157 = vmatprep.subr.bf16.mxu1 %v2632_v21 }
  0x11   :  { %2143 = vmatpush1.bf16.msra.mxu0 %v2642_v24  ;;  %2159 = vmatpush1.bf16.msra.mxu1 %v2642_v24 }
  0x12   :  { %2161 = vmatprep.subr.bf16.mxu0 %v2578_v4  ;;  %2177 = vmatprep.subr.bf16.mxu1 %v2578_v4 }
  0x14   :  { %149 = vmatmul.mubr.f32.vlgmr.msra.gmra.mrb[0].mxu0 %v2499_v3 }
  0x15   :  { %154 = vmatprep.mubr.f32.mxu0 %v2499_v3  ;;  %2163 = vmatpush1.bf16.msra.mxu0 %v2589_v8 }
  0x16   :  { %2165 = vmatprep.subr.bf16.mxu0 %v2591_v9 }
  0x18   :  { %155 = vmatmul.mubr.f32.gmra.mrb[2].mxu0 %v2499_v3 }
  0x19   :  { %160 = vmatprep.mubr.f32.mxu0 %v2499_v3  ;;  %2167 = vmatpush1.bf16.msra.mxu0 %v2608_v14 }
  0x1a   :  { %2169 = vmatprep.subr.bf16.mxu0 %v2612_v15 }
  0x1c   :  { %161 = vmatmul.mubr.f32.gmra.mrb[4].mxu0 %v2499_v3 }
  0x1d   :  { %166 = vmatprep.mubr.f32.mxu0 %v2499_v3  ;;  %2171 = vmatpush1.bf16.msra.mxu0 %v2628_v20 }
  0x1e   :  { %2173 = vmatprep.subr.bf16.mxu0 %v2632_v21 }
  0x20   :  { %167 = vmatmul.mubr.f32.gmra.mrb[6].mxu0 %v2499_v3 }
  0x21   :  { %2175 = vmatpush1.bf16.msra.mxu0 %v2642_v24  ;;  %528 = vmatprep.mubr.f32.mxu0 %v2499_v3 }
  0x22   :  { %2193 = vmatprep.subr.bf16.mxu0 %v2578_v4 }
  0xe7   :  { %v150_v31 = vpop.f32.mrb[0].mxu0 }
  0xe8   :  { %v151_v32 = vadd.f32 %v150_v31, %v2670_v29  ;;  %v152_v33 = vpop.f32.mrb[1].mxu0 }
  0xe9   :  { %v153_v63 = vadd.f32 %v152_v33, %v2688_v60 }
  0xea   :  { %v173_v34 = vadd.f32 %v151_v32, %v61_v30 }
  0xeb   :  { %v156_v36 = vpop.f32.mrb[2].mxu0 }
  0xec   :  { %v1946_v37 = vmul.f32 -1.442695, %v173_v34  ;;  %v157_v38 = vadd.f32 %v156_v36, %v2670_v29  ;;  %v158_v39 = vpop.f32.mrb[3].mxu0 }
  0xed   :  { %v159_v7 = vadd.f32 %v158_v39, %v2688_v60 }
  0xee   :  { %2275 = vpow2.f32 %v1946_v37  ;;  %v174_v40 = vadd.f32 %v157_v38, %v63_v35 }
  0xef   :  { %v162_v42 = vpop.f32.mrb[4].mxu0 }
  0xf0   :  { %v1947_v43 = vmul.f32 -1.442695, %v174_v40  ;;  %v163_v44 = vadd.f32 %v162_v42, %v2670_v29  ;;  %v164_v45 = vpop.f32.mrb[5].mxu0 }
  0xf1   :  { %v165_v16 = vadd.f32 %v164_v45, %v2688_v60 }
  0xf2   :  { %2277 = vpow2.f32 %v1947_v43  ;;  %v175_v46 = vadd.f32 %v163_v44, %v65_v41 }
  0xf3   :  { %v168_v48 = vpop.f32.mrb[6].mxu0 }
  0xf4   :  { %v1948_v49 = vmul.f32 -1.442695, %v175_v46  ;;  %v169_v50 = vadd.f32 %v168_v48, %v2670_v29  ;;  %v170_v51 = vpop.f32.mrb[7].mxu0 }
  0xf5   :  { %v171_v23 = vadd.f32 %v170_v51, %v2688_v60 }
  0xf6   :  { %2279 = vpow2.f32 %v1948_v49  ;;  %v176_v52 = vadd.f32 %v169_v50, %v67_v47 }
  0xf8   :  { %v2276_v53 = vpop.eup %2275  ;;  %v1949_v54 = vmul.f32 -1.442695, %v176_v52 }
  0xf9   :  { %v189_v55 = vadd.f32 1.0, %v2276_v53 }
  0xfa   :  { %2281 = vpow2.f32 %v1949_v54 }
  0xfb   :  { %2283 = vrcp.f32 %v189_v55 }
  0xfc   :  { %v2278_v56 = vpop.eup %2277 }
  0xfd   :  { %v190_v58 = vadd.f32 1.0, %v2278_v56 }
  0xff   :  { %2285 = vrcp.f32 %v190_v58  ;;  %v1950_v58 = vld [vmem:[%s3290_s0 + $0x40] sm:$0xff] }
 0x100   :  { %v2280_v59 = vpop.eup %2279 }
 0x101   :  { %v191_v61 = vadd.f32 1.0, %v2280_v59 }
 0x103   :  { %2287 = vrcp.f32 %v191_v61 }
 0x104   :  { %v2282_v62 = vpop.eup %2281 }
 0x105   :  { %v2284_v0 = vpop.eup %2283  ;;  %v192_v2 = vadd.f32 1.0, %v2282_v62 }
 0x106   :  { %v201_v5 = vmul.f32 %v2284_v0, %v153_v63  ;;  %v213_v34 = vsub.f32 1.0, %v2284_v0  ;;  %v237_v36 = vmul.f32 0.0, %v2284_v0  ;;  %v1952_v0 = vld [vmem:[%s3290_s0 + $0x50] sm:$0xff] }
 0x107   :  { %2289 = vrcp.f32 %v192_v2 }
 0x108   :  { %v205_v6 = vadd.f32 %v201_v5, %v62_v1 }
 0x109   :  { %v2286_v10 = vpop.eup %2285 }
 0x10a   :  { %2291 = vtanh.f32 %v205_v6  ;;  %v202_v12 = vmul.f32 %v2286_v10, %v159_v7  ;;  %v214_v39 = vsub.f32 1.0, %v2286_v10  ;;  %v238_v41 = vmul.f32 0.0, %v2286_v10  ;;  %v1954_v10 = vld [vmem:[%s3290_s0 + $0x60] sm:$0xff] }
 0x10c   :  { %v206_v13 = vadd.f32 %v202_v12, %v64_v11 }
 0x10d   :  { %v2288_v17 = vpop.eup %2287 }
 0x10e   :  { %2293 = vtanh.f32 %v206_v13  ;;  %v203_v19 = vmul.f32 %v2288_v17, %v165_v16  ;;  %v215_v44 = vsub.f32 1.0, %v2288_v17  ;;  %v239_v46 = vmul.f32 0.0, %v2288_v17 }
 0x110   :  { %v207_v22 = vadd.f32 %v203_v19, %v66_v18  ;;  %v1956_v18 = vld [vmem:[%s3290_s0 + $0x70] sm:$0xff] }
 0x111   :  { %v2290_v25 = vpop.eup %2289 }
 0x112   :  { %2295 = vtanh.f32 %v207_v22  ;;  %v204_v27 = vmul.f32 %v2290_v25, %v171_v23  ;;  %v216_v49 = vsub.f32 1.0, %v2290_v25  ;;  %v240_v51 = vmul.f32 0.0, %v2290_v25 }
 0x114   :  { %v2292_v28 = vpop.eup %2291  ;;  %v208_v30 = vadd.f32 %v204_v27, %v68_v26 }
 0x115   :  { %221 = vrot.lane.b32.xlu0 %v2292_v28, %s2500_s15 }
 0x116   :  { %2297 = vtanh.f32 %v208_v30 }
 0x118   :  { %v2294_v31 = vpop.eup %2293 }
 0x119   :  { %223 = vrot.lane.b32.xlu0 %v2294_v31, %s2500_s15 }
 0x11c   :  { %v2296_v32 = vpop.eup %2295 }
 0x11d   :  { %225 = vrot.lane.b32.xlu1 %v2296_v32, %s2500_s15 }
 0x120   :  { %v2298_v33 = vpop.eup %2297 }
 0x121   :  { %227 = vrot.lane.b32.xlu1 %v2298_v33, %s2500_s15 }
 0x187   :  { %v222_v35 = vpop.permute.xlu0 %221 }
 0x188   :  { %v233_v37 = vmul.f32 %v222_v35, %v213_v34 }
 0x18a   :  { %v2710_v38 = vadd.f32 %v237_v36, %v233_v37 }
 0x18b   :  { %v224_v40 = vpop.permute.xlu0 %223 }
 0x18c   :  { %v234_v42 = vmul.f32 %v224_v40, %v214_v39  ;;  %258 = vrot.lane.b32.xlu0 %v2710_v38, %s2500_s15  ;;  %v1951_v39 = vld [vmem:[%s3290_s0 + $0x48] sm:$0xff] }
 0x18e   :  { %v2714_v43 = vadd.f32 %v238_v41, %v234_v42 }
 0x18f   :  { %v226_v45 = vpop.permute.xlu1 %225 }
 0x190   :  { %v235_v47 = vmul.f32 %v226_v45, %v215_v44  ;;  %260 = vrot.lane.b32.xlu1 %v2714_v43, %s2500_s15 }
 0x192   :  { %v2718_v48 = vadd.f32 %v239_v46, %v235_v47  ;;  %v1953_v46 = vld [vmem:[%s3290_s0 + $0x58] sm:$0xff] }
 0x193   :  { %v228_v50 = vpop.permute.xlu1 %227 }
 0x194   :  { %v236_v52 = vmul.f32 %v228_v50, %v216_v49  ;;  %262 = vrot.lane.b32.xlu0 %v2718_v48, %s2500_s15 }
 0x196   :  { %v2722_v53 = vadd.f32 %v240_v51, %v236_v52  ;;  %v1955_v52 = vld [vmem:[%s3290_s0 + $0x68] sm:$0xff] }
 0x198   :  { %264 = vrot.lane.b32.xlu1 %v2722_v53, %s2500_s15 }
 0x1fe   :  { %v259_v54 = vpop.permute.xlu0 %258 }
 0x1ff   :  { %1958 = vmatmul.mubr.msk.f32.vlgmr.msra.gmra.mrb[0].mxu1 %vm80_vm0, %v259_v54 }
 0x200   :  { %344 = vmatprep.mubr.f32.mxu1 %v2499_v3  ;;  %2179 = vmatpush1.bf16.msra.mxu1 %v2589_v8 }
 0x201   :  { %2181 = vmatprep.subr.bf16.mxu1 %v2591_v9 }
 0x202   :  { %v261_v55 = vpop.permute.xlu1 %260 }
 0x203   :  { %1959 = vmatmul.mubr.msk.f32.gmra.mrb[2].mxu1 %vm80_vm0, %v261_v55 }
 0x204   :  { %350 = vmatprep.mubr.f32.mxu1 %v2499_v3  ;;  %2183 = vmatpush1.bf16.msra.mxu1 %v2608_v14 }
 0x205   :  { %2185 = vmatprep.subr.bf16.mxu1 %v2612_v15 }
 0x206   :  { %v263_v56 = vpop.permute.xlu0 %262 }
 0x207   :  { %1960 = vmatmul.mubr.msk.f32.gmra.mrb[4].mxu1 %vm80_vm0, %v263_v56 }
 0x208   :  { %356 = vmatprep.mubr.f32.mxu1 %v2499_v3  ;;  %2187 = vmatpush1.bf16.msra.mxu1 %v2628_v20 }
 0x209   :  { %2189 = vmatprep.subr.bf16.mxu1 %v2632_v21 }
 0x20a   :  { %v265_v57 = vpop.permute.xlu1 %264 }
 0x20b   :  { %1961 = vmatmul.mubr.msk.f32.gmra.mrb[6].mxu1 %vm80_vm0, %v265_v57 }
 0x20c   :  { %2191 = vmatpush1.bf16.msra.mxu1 %v2642_v24  ;;  %718 = vmatprep.mubr.f32.mxu1 %v2499_v3 }
 0x20d   :  { %2209 = vmatprep.subr.bf16.mxu1 %v2578_v4 }
 0x2d2   :  { %v340_v59 = vpop.f32.mrb[0].mxu1 }
 0x2d3   :  { %v341_v61 = vadd.f32 %v340_v59, %v2670_v29  ;;  %v342_v62 = vpop.f32.mrb[1].mxu1 }
 0x2d4   :  { %v343_v36 = vadd.f32 %v342_v62, %v2688_v60 }
 0x2d5   :  { %v363_v63 = vadd.f32 %v1950_v58, %v341_v61  ;;  %v1957_v58 = vld [vmem:[%s3290_s0 + $0x78] sm:$0xff] }
 0x2d6   :  { %v346_v1 = vpop.f32.mrb[2].mxu1 }
 0x2d7   :  { %v1962_v2 = vmul.f32 -1.442695, %v363_v63  ;;  %v347_v5 = vadd.f32 %v346_v1, %v2670_v29  ;;  %v348_v6 = vpop.f32.mrb[3].mxu1 }
 0x2d8   :  { %v349_v44 = vadd.f32 %v348_v6, %v2688_v60 }
 0x2d9   :  { %2299 = vpow2.f32 %v1962_v2  ;;  %v364_v7 = vadd.f32 %v1952_v0, %v347_v5 }
 0x2da   :  { %v352_v11 = vpop.f32.mrb[4].mxu1 }
 0x2db   :  { %v1963_v12 = vmul.f32 -1.442695, %v364_v7  ;;  %v353_v13 = vadd.f32 %v352_v11, %v2670_v29  ;;  %v354_v16 = vpop.f32.mrb[5].mxu1 }
 0x2dc   :  { %v355_v50 = vadd.f32 %v354_v16, %v2688_v60 }
 0x2dd   :  { %2301 = vpow2.f32 %v1963_v12  ;;  %v365_v17 = vadd.f32 %v1954_v10, %v353_v13 }
 0x2de   :  { %v358_v19 = vpop.f32.mrb[6].mxu1 }
 0x2df   :  { %v1964_v22 = vmul.f32 -1.442695, %v365_v17  ;;  %v359_v23 = vadd.f32 %v358_v19, %v2670_v29  ;;  %v360_v25 = vpop.f32.mrb[7].mxu1 }
 0x2e0   :  { %v361_v56 = vadd.f32 %v360_v25, %v2688_v60 }
 0x2e1   :  { %2303 = vpow2.f32 %v1964_v22  ;;  %v366_v26 = vadd.f32 %v1956_v18, %v359_v23 }
 0x2e3   :  { %v2300_v27 = vpop.eup %2299  ;;  %v1965_v28 = vmul.f32 -1.442695, %v366_v26 }
 0x2e4   :  { %v379_v30 = vadd.f32 1.0, %v2300_v27 }
 0x2e5   :  { %2305 = vpow2.f32 %v1965_v28 }
 0x2e6   :  { %2307 = vrcp.f32 %v379_v30 }
 0x2e7   :  { %v2302_v31 = vpop.eup %2301 }
 0x2e8   :  { %v380_v32 = vadd.f32 1.0, %v2302_v31 }
 0x2ea   :  { %2309 = vrcp.f32 %v380_v32  ;;  %v1966_v32 = vld [vmem:[%s3290_s0 + $0x80] sm:$0xff] }
 0x2eb   :  { %v2304_v33 = vpop.eup %2303 }
 0x2ec   :  { %v381_v34 = vadd.f32 1.0, %v2304_v33 }
 0x2ee   :  { %2311 = vrcp.f32 %v381_v34 }
 0x2ef   :  { %v2306_v35 = vpop.eup %2305 }
 0x2f0   :  { %v2308_v37 = vpop.eup %2307  ;;  %v382_v40 = vadd.f32 1.0, %v2306_v35 }
 0x2f1   :  { %v391_v41 = vmul.f32 %v2308_v37, %v343_v36  ;;  %v403_v2 = vsub.f32 1.0, %v2308_v37  ;;  %v427_v6 = vmul.f32 %v2308_v37, %v2710_v38  ;;  %v1968_v37 = vld [vmem:[%s3290_s0 + $0x90] sm:$0xff] }
 0x2f2   :  { %2313 = vrcp.f32 %v382_v40 }
 0x2f3   :  { %v395_v42 = vadd.f32 %v1951_v39, %v391_v41 }
 0x2f4   :  { %v2310_v45 = vpop.eup %2309 }
 0x2f5   :  { %2315 = vtanh.f32 %v395_v42  ;;  %v392_v47 = vmul.f32 %v2310_v45, %v349_v44  ;;  %v404_v11 = vsub.f32 1.0, %v2310_v45  ;;  %v428_v13 = vmul.f32 %v2310_v45, %v2714_v43  ;;  %v1970_v45 = vld [vmem:[%s3290_s0 + $0xa0] sm:$0xff] }
 0x2f7   :  { %v396_v49 = vadd.f32 %v1953_v46, %v392_v47 }
 0x2f8   :  { %v2312_v51 = vpop.eup %2311 }
 0x2f9   :  { %2317 = vtanh.f32 %v396_v49  ;;  %v393_v54 = vmul.f32 %v2312_v51, %v355_v50  ;;  %v405_v18 = vsub.f32 1.0, %v2312_v51  ;;  %v429_v22 = vmul.f32 %v2312_v51, %v2718_v48 }
 0x2fb   :  { %v397_v55 = vadd.f32 %v1955_v52, %v393_v54  ;;  %v1972_v52 = vld [vmem:[%s3290_s0 + $0xb0] sm:$0xff] }
 0x2fc   :  { %v2314_v57 = vpop.eup %2313 }
 0x2fd   :  { %2319 = vtanh.f32 %v397_v55  ;;  %v394_v59 = vmul.f32 %v2314_v57, %v361_v56  ;;  %v406_v25 = vsub.f32 1.0, %v2314_v57  ;;  %v430_v43 = vmul.f32 %v2314_v57, %v2722_v53 }
 0x2ff   :  { %v2316_v61 = vpop.eup %2315  ;;  %v398_v62 = vadd.f32 %v1957_v58, %v394_v59 }
 0x300   :  { %411 = vrot.lane.b32.xlu0 %v2316_v61, %s2500_s15 }
 0x301   :  { %2321 = vtanh.f32 %v398_v62 }
 0x303   :  { %v2318_v63 = vpop.eup %2317 }
 0x304   :  { %413 = vrot.lane.b32.xlu1 %v2318_v63, %s2500_s15 }
 0x307   :  { %v2320_v0 = vpop.eup %2319 }
 0x308   :  { %415 = vrot.lane.b32.xlu0 %v2320_v0, %s2500_s15 }
 0x30b   :  { %v2322_v1 = vpop.eup %2321 }
 0x30c   :  { %417 = vrot.lane.b32.xlu1 %v2322_v1, %s2500_s15 }
 0x372   :  { %v412_v5 = vpop.permute.xlu0 %411 }
 0x373   :  { %v423_v7 = vmul.f32 %v412_v5, %v403_v2 }
 0x375   :  { %v2779_v10 = vadd.f32 %v427_v6, %v423_v7 }
 0x376   :  { %v414_v12 = vpop.permute.xlu1 %413 }
 0x377   :  { %v424_v16 = vmul.f32 %v414_v12, %v404_v11  ;;  %448 = vrot.lane.b32.xlu0 %v2779_v10, %s2500_s15  ;;  %v1967_v11 = vld [vmem:[%s3290_s0 + $0x88] sm:$0xff] }
 0x379   :  { %v2784_v17 = vadd.f32 %v428_v13, %v424_v16 }
 0x37a   :  { %v416_v19 = vpop.permute.xlu0 %415 }
 0x37b   :  { %v425_v23 = vmul.f32 %v416_v19, %v405_v18  ;;  %450 = vrot.lane.b32.xlu1 %v2784_v17, %s2500_s15 }
 0x37d   :  { %v2789_v38 = vadd.f32 %v429_v22, %v425_v23  ;;  %v1969_v22 = vld [vmem:[%s3290_s0 + $0x98] sm:$0xff] }
 0x37e   :  { %v418_v26 = vpop.permute.xlu1 %417 }
 0x37f   :  { %v426_v27 = vmul.f32 %v418_v26, %v406_v25  ;;  %452 = vrot.lane.b32.xlu0 %v2789_v38, %s2500_s15 }
 0x381   :  { %v2794_v28 = vadd.f32 %v430_v43, %v426_v27  ;;  %v1971_v27 = vld [vmem:[%s3290_s0 + $0xa8] sm:$0xff] }
 0x383   :  { %454 = vrot.lane.b32.xlu1 %v2794_v28, %s2500_s15 }
 0x3e9   :  { %v449_v48 = vpop.permute.xlu0 %448 }
 0x3ea   :  { %1974 = vmatmul.mubr.msk.f32.vlgmr.msra.gmra.mrb[8].mxu0 %vm80_vm0, %v449_v48 }
 0x3eb   :  { %534 = vmatprep.mubr.f32.mxu0 %v2499_v3  ;;  %2195 = vmatpush1.bf16.msra.mxu0 %v2589_v8 }
 0x3ec   :  { %2197 = vmatprep.subr.bf16.mxu0 %v2591_v9 }
 0x3ed   :  { %v451_v30 = vpop.permute.xlu1 %450 }
 0x3ee   :  { %1975 = vmatmul.mubr.msk.f32.gmra.mrb[10].mxu0 %vm80_vm0, %v451_v30 }
 0x3ef   :  { %540 = vmatprep.mubr.f32.mxu0 %v2499_v3  ;;  %2199 = vmatpush1.bf16.msra.mxu0 %v2608_v14 }
 0x3f0   :  { %2201 = vmatprep.subr.bf16.mxu0 %v2612_v15 }
 0x3f1   :  { %v453_v53 = vpop.permute.xlu0 %452 }
 0x3f2   :  { %1976 = vmatmul.mubr.msk.f32.gmra.mrb[12].mxu0 %vm80_vm0, %v453_v53 }
 0x3f3   :  { %546 = vmatprep.mubr.f32.mxu0 %v2499_v3  ;;  %2203 = vmatpush1.bf16.msra.mxu0 %v2628_v20 }
 0x3f4   :  { %2205 = vmatprep.subr.bf16.mxu0 %v2632_v21 }
 0x3f5   :  { %v455_v31 = vpop.permute.xlu1 %454 }
 0x3f6   :  { %1977 = vmatmul.mubr.msk.f32.gmra.mrb[14].mxu0 %vm80_vm0, %v455_v31 }
 0x3f7   :  { %2207 = vmatpush1.bf16.msra.mxu0 %v2642_v24  ;;  %908 = vmatprep.mubr.f32.mxu0 %v2499_v3 }
 0x3f8   :  { %2225 = vmatprep.subr.bf16.mxu0 %v2578_v4 }
 0x4bd   :  { %v530_v33 = vpop.f32.mrb[8].mxu0 }
 0x4be   :  { %v531_v34 = vadd.f32 %v530_v33, %v2670_v29  ;;  %v532_v35 = vpop.f32.mrb[9].mxu0 }
 0x4bf   :  { %v533_v6 = vadd.f32 %v532_v35, %v2688_v60 }
 0x4c0   :  { %v553_v36 = vadd.f32 %v1966_v32, %v531_v34  ;;  %v1973_v32 = vld [vmem:[%s3290_s0 + $0xb8] sm:$0xff] }
 0x4c1   :  { %v536_v39 = vpop.f32.mrb[10].mxu0 }
 0x4c2   :  { %v1978_v40 = vmul.f32 -1.442695, %v553_v36  ;;  %v537_v41 = vadd.f32 %v536_v39, %v2670_v29  ;;  %v538_v42 = vpop.f32.mrb[11].mxu0 }
 0x4c3   :  { %v539_v18 = vadd.f32 %v538_v42, %v2688_v60 }
 0x4c4   :  { %2323 = vpow2.f32 %v1978_v40  ;;  %v554_v44 = vadd.f32 %v1968_v37, %v537_v41 }
 0x4c5   :  { %v542_v46 = vpop.f32.mrb[12].mxu0 }
 0x4c6   :  { %v1979_v47 = vmul.f32 -1.442695, %v554_v44  ;;  %v543_v49 = vadd.f32 %v542_v46, %v2670_v29  ;;  %v544_v50 = vpop.f32.mrb[13].mxu0 }
 0x4c7   :  { %v545_v26 = vadd.f32 %v544_v50, %v2688_v60 }
 0x4c8   :  { %2325 = vpow2.f32 %v1979_v47  ;;  %v555_v51 = vadd.f32 %v1970_v45, %v543_v49 }
 0x4c9   :  { %v548_v54 = vpop.f32.mrb[14].mxu0 }
 0x4ca   :  { %v1980_v55 = vmul.f32 -1.442695, %v555_v51  ;;  %v549_v56 = vadd.f32 %v548_v54, %v2670_v29  ;;  %v550_v57 = vpop.f32.mrb[15].mxu0 }
 0x4cb   :  { %v551_v53 = vadd.f32 %v550_v57, %v2688_v60 }
 0x4cc   :  { %2327 = vpow2.f32 %v1980_v55  ;;  %v556_v58 = vadd.f32 %v1972_v52, %v549_v56 }
 0x4ce   :  { %v2324_v59 = vpop.eup %2323  ;;  %v1981_v61 = vmul.f32 -1.442695, %v556_v58 }
 0x4cf   :  { %v569_v62 = vadd.f32 1.0, %v2324_v59 }
 0x4d0   :  { %2329 = vpow2.f32 %v1981_v61 }
 0x4d1   :  { %2331 = vrcp.f32 %v569_v62 }
 0x4d2   :  { %v2326_v63 = vpop.eup %2325 }
 0x4d3   :  { %v570_v0 = vadd.f32 1.0, %v2326_v63 }
 0x4d5   :  { %2333 = vrcp.f32 %v570_v0  ;;  %v1982_v0 = vld [vmem:[%s3290_s0 + $0xc0] sm:$0xff] }
 0x4d6   :  { %v2328_v1 = vpop.eup %2327 }
 0x4d7   :  { %v571_v2 = vadd.f32 1.0, %v2328_v1 }
 0x4d9   :  { %2335 = vrcp.f32 %v571_v2 }
 0x4da   :  { %v2330_v5 = vpop.eup %2329 }
 0x4db   :  { %v2332_v7 = vpop.eup %2331  ;;  %v572_v12 = vadd.f32 1.0, %v2330_v5 }
 0x4dc   :  { %v581_v13 = vmul.f32 %v2332_v7, %v533_v6  ;;  %v593_v40 = vsub.f32 1.0, %v2332_v7  ;;  %v617_v42 = vmul.f32 %v2332_v7, %v2779_v10  ;;  %v1984_v7 = vld [vmem:[%s3290_s0 + $0xd0] sm:$0xff] }
 0x4dd   :  { %2337 = vrcp.f32 %v572_v12 }
 0x4de   :  { %v585_v16 = vadd.f32 %v1967_v11, %v581_v13 }
 0x4df   :  { %v2334_v19 = vpop.eup %2333 }
 0x4e0   :  { %2339 = vtanh.f32 %v585_v16  ;;  %v582_v23 = vmul.f32 %v2334_v19, %v539_v18  ;;  %v594_v46 = vsub.f32 1.0, %v2334_v19  ;;  %v618_v49 = vmul.f32 %v2334_v19, %v2784_v17  ;;  %v1986_v18 = vld [vmem:[%s3290_s0 + $0xe0] sm:$0xff] }
 0x4e2   :  { %v586_v25 = vadd.f32 %v1969_v22, %v582_v23 }
 0x4e3   :  { %v2336_v43 = vpop.eup %2335 }
 0x4e4   :  { %2341 = vtanh.f32 %v586_v25  ;;  %v583_v48 = vmul.f32 %v2336_v43, %v545_v26  ;;  %v595_v52 = vsub.f32 1.0, %v2336_v43  ;;  %v619_v55 = vmul.f32 %v2336_v43, %v2789_v38  ;;  %v1988_v43 = vld [vmem:[%s3290_s0 + $0xf0] sm:$0xff] }
 0x4e6   :  { %v587_v30 = vadd.f32 %v1971_v27, %v583_v48 }
 0x4e7   :  { %v2338_v31 = vpop.eup %2337 }
 0x4e8   :  { %2343 = vtanh.f32 %v587_v30  ;;  %v584_v33 = vmul.f32 %v2338_v31, %v551_v53  ;;  %v596_v57 = vsub.f32 1.0, %v2338_v31  ;;  %v620_v17 = vmul.f32 %v2338_v31, %v2794_v28 }
 0x4ea   :  { %v2340_v34 = vpop.eup %2339  ;;  %v588_v35 = vadd.f32 %v1973_v32, %v584_v33 }
 0x4eb   :  { %601 = vrot.lane.b32.xlu0 %v2340_v34, %s2500_s15 }
 0x4ec   :  { %2345 = vtanh.f32 %v588_v35 }
 0x4ee   :  { %v2342_v36 = vpop.eup %2341 }
 0x4ef   :  { %603 = vrot.lane.b32.xlu1 %v2342_v36, %s2500_s15 }
 0x4f2   :  { %v2344_v37 = vpop.eup %2343 }
 0x4f3   :  { %605 = vrot.lane.b32.xlu0 %v2344_v37, %s2500_s15 }
 0x4f6   :  { %v2346_v39 = vpop.eup %2345 }
 0x4f7   :  { %607 = vrot.lane.b32.xlu1 %v2346_v39, %s2500_s15 }
 0x55d   :  { %v602_v41 = vpop.permute.xlu0 %601 }
 0x55e   :  { %v613_v44 = vmul.f32 %v602_v41, %v593_v40 }
 0x560   :  { %v2851_v45 = vadd.f32 %v617_v42, %v613_v44  ;;  %v1983_v44 = vld [vmem:[%s3290_s0 + $0xc8] sm:$0xff] }
 0x561   :  { %v604_v47 = vpop.permute.xlu1 %603 }
 0x562   :  { %v614_v50 = vmul.f32 %v604_v47, %v594_v46  ;;  %638 = vrot.lane.b32.xlu0 %v2851_v45, %s2500_s15 }
 0x564   :  { %v2856_v51 = vadd.f32 %v618_v49, %v614_v50 }
 0x565   :  { %v606_v54 = vpop.permute.xlu0 %605 }
 0x566   :  { %v615_v56 = vmul.f32 %v606_v54, %v595_v52  ;;  %640 = vrot.lane.b32.xlu1 %v2856_v51, %s2500_s15  ;;  %v1985_v54 = vld [vmem:[%s3290_s0 + $0xd8] sm:$0xff] }
 0x568   :  { %v2861_v10 = vadd.f32 %v619_v55, %v615_v56 }
 0x569   :  { %v608_v58 = vpop.permute.xlu1 %607 }
 0x56a   :  { %v616_v59 = vmul.f32 %v608_v58, %v596_v57  ;;  %642 = vrot.lane.b32.xlu0 %v2861_v10, %s2500_s15 }
 0x56c   :  { %v2866_v61 = vadd.f32 %v620_v17, %v616_v59  ;;  %v1987_v17 = vld [vmem:[%s3290_s0 + $0xe8] sm:$0xff] }
 0x56e   :  { %644 = vrot.lane.b32.xlu1 %v2866_v61, %s2500_s15 }
 0x5d4   :  { %v639_v38 = vpop.permute.xlu0 %638 }
 0x5d5   :  { %1990 = vmatmul.mubr.msk.f32.vlgmr.msra.gmra.mrb[8].mxu1 %vm80_vm0, %v639_v38 }
 0x5d6   :  { %724 = vmatprep.mubr.f32.mxu1 %v2499_v3  ;;  %2211 = vmatpush1.bf16.msra.mxu1 %v2589_v8 }
 0x5d7   :  { %2213 = vmatprep.subr.bf16.mxu1 %v2591_v9 }
 0x5d8   :  { %v641_v62 = vpop.permute.xlu1 %640 }
 0x5d9   :  { %1991 = vmatmul.mubr.msk.f32.gmra.mrb[10].mxu1 %vm80_vm0, %v641_v62 }
 0x5da   :  { %730 = vmatprep.mubr.f32.mxu1 %v2499_v3  ;;  %2215 = vmatpush1.bf16.msra.mxu1 %v2608_v14 }
 0x5db   :  { %2217 = vmatprep.subr.bf16.mxu1 %v2612_v15 }
 0x5dc   :  { %v643_v28 = vpop.permute.xlu0 %642 }
 0x5dd   :  { %1992 = vmatmul.mubr.msk.f32.gmra.mrb[12].mxu1 %vm80_vm0, %v643_v28 }
 0x5de   :  { %736 = vmatprep.mubr.f32.mxu1 %v2499_v3  ;;  %2219 = vmatpush1.bf16.msra.mxu1 %v2628_v20 }
 0x5df   :  { %2221 = vmatprep.subr.bf16.mxu1 %v2632_v21 }
 0x5e0   :  { %v645_v63 = vpop.permute.xlu1 %644 }
 0x5e1   :  { %1993 = vmatmul.mubr.msk.f32.gmra.mrb[14].mxu1 %vm80_vm0, %v645_v63  ;;  %v1989_v63 = vld [vmem:[%s3290_s0 + $0xf8] sm:$0xff] }
 0x5e2   :  { %2223 = vmatpush1.bf16.msra.mxu1 %v2642_v24  ;;  %1098 = vmatprep.mubr.f32.mxu1 %v2499_v3 }
 0x5e3   :  { %2241 = vmatprep.subr.bf16.mxu1 %v2578_v4 }
 0x6a8   :  { %v720_v1 = vpop.f32.mrb[8].mxu1 }
 0x6a9   :  { %v721_v2 = vadd.f32 %v720_v1, %v2670_v29  ;;  %v722_v5 = vpop.f32.mrb[9].mxu1 }
 0x6aa   :  { %v723_v41 = vadd.f32 %v722_v5, %v2688_v60 }
 0x6ab   :  { %v743_v6 = vadd.f32 %v1982_v0, %v721_v2 }
 0x6ac   :  { %v726_v11 = vpop.f32.mrb[10].mxu1 }
 0x6ad   :  { %v1994_v12 = vmul.f32 -1.442695, %v743_v6  ;;  %v727_v13 = vadd.f32 %v726_v11, %v2670_v29  ;;  %v728_v16 = vpop.f32.mrb[11].mxu1 }
 0x6ae   :  { %v729_v50 = vadd.f32 %v728_v16, %v2688_v60 }
 0x6af   :  { %2347 = vpow2.f32 %v1994_v12  ;;  %v744_v4 = vadd.f32 %v1984_v7, %v727_v13 }
 0x6b0   :  { %v732_v19 = vpop.f32.mrb[12].mxu1 }
 0x6b1   :  { %v1995_v22 = vmul.f32 -1.442695, %v744_v4  ;;  %v733_v23 = vadd.f32 %v732_v19, %v2670_v29  ;;  %v734_v25 = vpop.f32.mrb[13].mxu1 }
 0x6b2   :  { %v735_v57 = vadd.f32 %v734_v25, %v2688_v60 }
 0x6b3   :  { %2349 = vpow2.f32 %v1995_v22  ;;  %v745_v26 = vadd.f32 %v1986_v18, %v733_v23 }
 0x6b4   :  { %v738_v27 = vpop.f32.mrb[14].mxu1 }
 0x6b5   :  { %v1996_v48 = vmul.f32 -1.442695, %v745_v26  ;;  %v739_v30 = vadd.f32 %v738_v27, %v2670_v29  ;;  %v740_v53 = vpop.f32.mrb[15].mxu1 }
 0x6b6   :  { %v741_v62 = vadd.f32 %v740_v53, %v2688_v60 }
 0x6b7   :  { %2351 = vpow2.f32 %v1996_v48  ;;  %v746_v31 = vadd.f32 %v1988_v43, %v739_v30 }
 0x6b9   :  { %v2348_v32 = vpop.eup %2347  ;;  %v1997_v33 = vmul.f32 -1.442695, %v746_v31 }
 0x6ba   :  { %v759_v34 = vadd.f32 1.0, %v2348_v32 }
 0x6bb   :  { %2353 = vpow2.f32 %v1997_v33 }
 0x6bc   :  { %2355 = vrcp.f32 %v759_v34 }
 0x6bd   :  { %v2350_v35 = vpop.eup %2349 }
 0x6be   :  { %v760_v36 = vadd.f32 1.0, %v2350_v35  ;;  %v1998_v35 = vld [vmem:[%s3290_s0 + $0x100] sm:$0xff] }
 0x6c0   :  { %2357 = vrcp.f32 %v760_v36 }
 0x6c1   :  { %v2352_v37 = vpop.eup %2351 }
 0x6c2   :  { %v761_v39 = vadd.f32 1.0, %v2352_v37 }
 0x6c4   :  { %2359 = vrcp.f32 %v761_v39 }
 0x6c5   :  { %v2354_v40 = vpop.eup %2353 }
 0x6c6   :  { %v2356_v42 = vpop.eup %2355  ;;  %v762_v46 = vadd.f32 1.0, %v2354_v40 }
 0x6c7   :  { %v771_v47 = vmul.f32 %v2356_v42, %v723_v41  ;;  %v783_v11 = vsub.f32 1.0, %v2356_v42  ;;  %v807_v13 = vmul.f32 %v2356_v42, %v2851_v45  ;;  %v2000_v41 = vld [vmem:[%s3290_s0 + $0x110] sm:$0xff] }
 0x6c8   :  { %2361 = vrcp.f32 %v762_v46 }
 0x6c9   :  { %v775_v49 = vadd.f32 %v1983_v44, %v771_v47 }
 0x6ca   :  { %v2358_v52 = vpop.eup %2357 }
 0x6cb   :  { %2363 = vtanh.f32 %v775_v49  ;;  %v772_v55 = vmul.f32 %v2358_v52, %v729_v50  ;;  %v784_v18 = vsub.f32 1.0, %v2358_v52  ;;  %v808_v22 = vmul.f32 %v2358_v52, %v2856_v51  ;;  %v2002_v50 = vld [vmem:[%s3290_s0 + $0x120] sm:$0xff] }
 0x6cd   :  { %v776_v56 = vadd.f32 %v1985_v54, %v772_v55 }
 0x6ce   :  { %v2360_v58 = vpop.eup %2359 }
 0x6cf   :  { %2365 = vtanh.f32 %v776_v56  ;;  %v773_v59 = vmul.f32 %v2360_v58, %v735_v57  ;;  %v785_v26 = vsub.f32 1.0, %v2360_v58  ;;  %v809_v27 = vmul.f32 %v2360_v58, %v2861_v10  ;;  %v2004_v58 = vld [vmem:[%s3290_s0 + $0x130] sm:$0xff] }
 0x6d1   :  { %v777_v38 = vadd.f32 %v1987_v17, %v773_v59 }
 0x6d2   :  { %v2362_v28 = vpop.eup %2361 }
 0x6d3   :  { %2367 = vtanh.f32 %v777_v38  ;;  %v774_v0 = vmul.f32 %v2362_v28, %v741_v62  ;;  %v786_v30 = vsub.f32 1.0, %v2362_v28  ;;  %v810_v51 = vmul.f32 %v2362_v28, %v2866_v61 }
 0x6d5   :  { %v2364_v1 = vpop.eup %2363  ;;  %v778_v2 = vadd.f32 %v1989_v63, %v774_v0 }
 0x6d6   :  { %791 = vrot.lane.b32.xlu0 %v2364_v1, %s2500_s15 }
 0x6d7   :  { %2369 = vtanh.f32 %v778_v2 }
 0x6d9   :  { %v2366_v5 = vpop.eup %2365 }
 0x6da   :  { %793 = vrot.lane.b32.xlu1 %v2366_v5, %s2500_s15 }
 0x6dd   :  { %v2368_v6 = vpop.eup %2367 }
 0x6de   :  { %795 = vrot.lane.b32.xlu0 %v2368_v6, %s2500_s15 }
 0x6e1   :  { %v2370_v7 = vpop.eup %2369 }
 0x6e2   :  { %797 = vrot.lane.b32.xlu1 %v2370_v7, %s2500_s15 }
 0x748   :  { %v792_v12 = vpop.permute.xlu0 %791 }
 0x749   :  { %v803_v16 = vmul.f32 %v792_v12, %v783_v11 }
 0x74b   :  { %v2923_v4 = vadd.f32 %v807_v13, %v803_v16  ;;  %v1999_v16 = vld [vmem:[%s3290_s0 + $0x108] sm:$0xff] }
 0x74c   :  { %v794_v19 = vpop.permute.xlu1 %793 }
 0x74d   :  { %v804_v23 = vmul.f32 %v794_v19, %v784_v18  ;;  %828 = vrot.lane.b32.xlu0 %v2923_v4, %s2500_s15 }
 0x74f   :  { %v2928_v25 = vadd.f32 %v808_v22, %v804_v23 }
 0x750   :  { %v796_v43 = vpop.permute.xlu0 %795 }
 0x751   :  { %v805_v48 = vmul.f32 %v796_v43, %v785_v26  ;;  %830 = vrot.lane.b32.xlu1 %v2928_v25, %s2500_s15  ;;  %v2001_v43 = vld [vmem:[%s3290_s0 + $0x118] sm:$0xff] }
 0x753   :  { %v2933_v45 = vadd.f32 %v809_v27, %v805_v48 }
 0x754   :  { %v798_v53 = vpop.permute.xlu1 %797 }
 0x755   :  { %v806_v31 = vmul.f32 %v798_v53, %v786_v30  ;;  %832 = vrot.lane.b32.xlu0 %v2933_v45, %s2500_s15 }
 0x757   :  { %v2938_v32 = vadd.f32 %v810_v51, %v806_v31  ;;  %v2003_v51 = vld [vmem:[%s3290_s0 + $0x128] sm:$0xff] }
 0x759   :  { %834 = vrot.lane.b32.xlu1 %v2938_v32, %s2500_s15 }
 0x7bf   :  { %v829_v10 = vpop.permute.xlu0 %828 }
 0x7c0   :  { %2006 = vmatmul.mubr.msk.f32.vlgmr.msra.gmra.mrb[16].mxu0 %vm80_vm0, %v829_v10 }
 0x7c1   :  { %914 = vmatprep.mubr.f32.mxu0 %v2499_v3  ;;  %2227 = vmatpush1.bf16.msra.mxu0 %v2589_v8 }
 0x7c2   :  { %2229 = vmatprep.subr.bf16.mxu0 %v2591_v9 }
 0x7c3   :  { %v831_v33 = vpop.permute.xlu1 %830 }
 0x7c4   :  { %2007 = vmatmul.mubr.msk.f32.gmra.mrb[18].mxu0 %vm80_vm0, %v831_v33 }
 0x7c5   :  { %920 = vmatprep.mubr.f32.mxu0 %v2499_v3  ;;  %2231 = vmatpush1.bf16.msra.mxu0 %v2608_v14 }
 0x7c6   :  { %2233 = vmatprep.subr.bf16.mxu0 %v2612_v15 }
 0x7c7   :  { %v833_v61 = vpop.permute.xlu0 %832 }
 0x7c8   :  { %2008 = vmatmul.mubr.msk.f32.gmra.mrb[20].mxu0 %vm80_vm0, %v833_v61 }
 0x7c9   :  { %926 = vmatprep.mubr.f32.mxu0 %v2499_v3  ;;  %2235 = vmatpush1.bf16.msra.mxu0 %v2628_v20 }
 0x7ca   :  { %2237 = vmatprep.subr.bf16.mxu0 %v2632_v21 }
 0x7cb   :  { %v835_v34 = vpop.permute.xlu1 %834 }
 0x7cc   :  { %2009 = vmatmul.mubr.msk.f32.gmra.mrb[22].mxu0 %vm80_vm0, %v835_v34  ;;  %v2005_v34 = vld [vmem:[%s3290_s0 + $0x138] sm:$0xff] }
 0x7cd   :  { %2239 = vmatpush1.bf16.msra.mxu0 %v2642_v24  ;;  %1288 = vmatprep.mubr.f32.mxu0 %v2499_v3 }
 0x893   :  { %v910_v36 = vpop.f32.mrb[16].mxu0 }
 0x894   :  { %v911_v37 = vadd.f32 %v910_v36, %v2670_v29  ;;  %v912_v39 = vpop.f32.mrb[17].mxu0 }
 0x895   :  { %v913_v12 = vadd.f32 %v912_v39, %v2688_v60 }
 0x896   :  { %v933_v40 = vadd.f32 %v1998_v35, %v911_v37 }
 0x897   :  { %v916_v42 = vpop.f32.mrb[18].mxu0 }
 0x898   :  { %v2010_v44 = vmul.f32 -1.442695, %v933_v40  ;;  %v917_v46 = vadd.f32 %v916_v42, %v2670_v29  ;;  %v918_v47 = vpop.f32.mrb[19].mxu0 }
 0x899   :  { %v919_v23 = vadd.f32 %v918_v47, %v2688_v60 }
 0x89a   :  { %2371 = vpow2.f32 %v2010_v44  ;;  %v934_v49 = vadd.f32 %v2000_v41, %v917_v46 }
 0x89b   :  { %v922_v52 = vpop.f32.mrb[20].mxu0 }
 0x89c   :  { %v2011_v54 = vmul.f32 -1.442695, %v934_v49  ;;  %v923_v55 = vadd.f32 %v922_v52, %v2670_v29  ;;  %v924_v56 = vpop.f32.mrb[21].mxu0 }
 0x89d   :  { %v925_v30 = vadd.f32 %v924_v56, %v2688_v60 }
 0x89e   :  { %2373 = vpow2.f32 %v2011_v54  ;;  %v935_v57 = vadd.f32 %v2002_v50, %v923_v55 }
 0x89f   :  { %v928_v17 = vpop.f32.mrb[22].mxu0 }
 0x8a0   :  { %v2012_v59 = vmul.f32 -1.442695, %v935_v57  ;;  %v929_v38 = vadd.f32 %v928_v17, %v2670_v29  ;;  %v930_v62 = vpop.f32.mrb[23].mxu0 }
 0x8a1   :  { %v931_v33 = vadd.f32 %v930_v62, %v2688_v60 }
 0x8a2   :  { %2375 = vpow2.f32 %v2012_v59  ;;  %v936_v28 = vadd.f32 %v2004_v58, %v929_v38 }
 0x8a4   :  { %v2372_v63 = vpop.eup %2371  ;;  %v2013_v0 = vmul.f32 -1.442695, %v936_v28 }
 0x8a5   :  { %v949_v1 = vadd.f32 1.0, %v2372_v63 }
 0x8a6   :  { %2377 = vpow2.f32 %v2013_v0 }
 0x8a7   :  { %2379 = vrcp.f32 %v949_v1 }
 0x8a8   :  { %v2374_v2 = vpop.eup %2373 }
 0x8a9   :  { %v950_v5 = vadd.f32 1.0, %v2374_v2 }
 0x8ab   :  { %2381 = vrcp.f32 %v950_v5 }
 0x8ac   :  { %v2376_v6 = vpop.eup %2375 }
 0x8ad   :  { %v951_v7 = vadd.f32 1.0, %v2376_v6 }
 0x8af   :  { %2383 = vrcp.f32 %v951_v7 }
 0x8b0   :  { %v2378_v11 = vpop.eup %2377 }
 0x8b1   :  { %v2380_v13 = vpop.eup %2379  ;;  %v952_v18 = vadd.f32 1.0, %v2378_v11  ;;  %v2018_v11 = vld [vmem:[%s3290_s0 + $0x160] sm:$0xff] }
 0x8b2   :  { %v961_v19 = vmul.f32 %v2380_v13, %v913_v12  ;;  %v973_v42 = vsub.f32 1.0, %v2380_v13  ;;  %v997_v46 = vmul.f32 %v2380_v13, %v2923_v4 }
 0x8b3   :  { %2385 = vrcp.f32 %v952_v18 }
 0x8b4   :  { %v965_v22 = vadd.f32 %v1999_v16, %v961_v19 }
 0x8b5   :  { %v2382_v26 = vpop.eup %2381 }
 0x8b6   :  { %2387 = vtanh.f32 %v965_v22  ;;  %v962_v27 = vmul.f32 %v2382_v26, %v919_v23  ;;  %v974_v50 = vsub.f32 1.0, %v2382_v26  ;;  %v998_v54 = vmul.f32 %v2382_v26, %v2928_v25  ;;  %v2020_v22 = vld [vmem:[%s3290_s0 + $0x170] sm:$0xff] }
 0x8b8   :  { %v966_v48 = vadd.f32 %v2001_v43, %v962_v27 }
 0x8b9   :  { %v2384_v53 = vpop.eup %2383 }
 0x8ba   :  { %2389 = vtanh.f32 %v966_v48  ;;  %v963_v31 = vmul.f32 %v2384_v53, %v925_v30  ;;  %v975_v57 = vsub.f32 1.0, %v2384_v53  ;;  %v999_v17 = vmul.f32 %v2384_v53, %v2933_v45 }
 0x8bc   :  { %v967_v10 = vadd.f32 %v2003_v51, %v963_v31 }
 0x8bd   :  { %v2386_v61 = vpop.eup %2385 }
 0x8be   :  { %2391 = vtanh.f32 %v967_v10  ;;  %v964_v35 = vmul.f32 %v2386_v61, %v931_v33  ;;  %v976_v38 = vsub.f32 1.0, %v2386_v61  ;;  %v1000_v25 = vmul.f32 %v2386_v61, %v2938_v32 }
 0x8c0   :  { %v2388_v36 = vpop.eup %2387  ;;  %v968_v37 = vadd.f32 %v2005_v34, %v964_v35 }
 0x8c1   :  { %981 = vrot.lane.b32.xlu0 %v2388_v36, %s2500_s15 }
 0x8c2   :  { %2393 = vtanh.f32 %v968_v37  ;;  %v2015_v37 = vld [vmem:[%s3290_s0 + $0x148] sm:$0xff] }
 0x8c4   :  { %v2390_v39 = vpop.eup %2389 }
 0x8c5   :  { %983 = vrot.lane.b32.xlu1 %v2390_v39, %s2500_s15 }
 0x8c8   :  { %v2392_v40 = vpop.eup %2391 }
 0x8c9   :  { %985 = vrot.lane.b32.xlu0 %v2392_v40, %s2500_s15 }
 0x8cc   :  { %v2394_v41 = vpop.eup %2393 }
 0x8cd   :  { %987 = vrot.lane.b32.xlu1 %v2394_v41, %s2500_s15 }
 0x933   :  { %v982_v44 = vpop.permute.xlu0 %981 }
 0x934   :  { %v993_v47 = vmul.f32 %v982_v44, %v973_v42 }
 0x936   :  { %v2994_v49 = vadd.f32 %v997_v46, %v993_v47  ;;  %v2017_v46 = vld [vmem:[%s3290_s0 + $0x158] sm:$0xff] }
 0x937   :  { %v984_v52 = vpop.permute.xlu1 %983 }
 0x938   :  { %v994_v55 = vmul.f32 %v984_v52, %v974_v50  ;;  %1018 = vrot.lane.b32.xlu0 %v2994_v49, %s2500_s15 }
 0x93a   :  { %v2999_v56 = vadd.f32 %v998_v54, %v994_v55  ;;  %v2019_v55 = vld [vmem:[%s3290_s0 + $0x168] sm:$0xff] }
 0x93b   :  { %v986_v58 = vpop.permute.xlu0 %985 }
 0x93c   :  { %v995_v59 = vmul.f32 %v986_v58, %v975_v57  ;;  %1020 = vrot.lane.b32.xlu1 %v2999_v56, %s2500_s15 }
 0x93e   :  { %v3004_v4 = vadd.f32 %v999_v17, %v995_v59 }
 0x93f   :  { %v988_v62 = vpop.permute.xlu1 %987 }
 0x940   :  { %v996_v28 = vmul.f32 %v988_v62, %v976_v38  ;;  %1022 = vrot.lane.b32.xlu0 %v3004_v4, %s2500_s15  ;;  %v2021_v38 = vld [vmem:[%s3290_s0 + $0x178] sm:$0xff] }
 0x942   :  { %v3009_v63 = vadd.f32 %v1000_v25, %v996_v28 }
 0x944   :  { %1024 = vrot.lane.b32.xlu1 %v3009_v63, %s2500_s15 }
 0x9aa   :  { %v1019_v45 = vpop.permute.xlu0 %1018 }
 0x9ab   :  { %2022 = vmatmul.mubr.msk.f32.vlgmr.msra.gmra.mrb[16].mxu1 %vm80_vm0, %v1019_v45 }
 0x9ac   :  { %1104 = vmatprep.mubr.f32.mxu1 %v2499_v3  ;;  %2243 = vmatpush1.bf16.msra.mxu1 %v2589_v8 }
 0x9ad   :  { %2245 = vmatprep.subr.bf16.mxu1 %v2591_v9  ;;  %v2014_v9 = vld [vmem:[%s3290_s0 + $0x140] sm:$0xff] }
 0x9ae   :  { %v1021_v0 = vpop.permute.xlu1 %1020 }
 0x9af   :  { %2023 = vmatmul.mubr.msk.f32.gmra.mrb[18].mxu1 %vm80_vm0, %v1021_v0 }
 0x9b0   :  { %1110 = vmatprep.mubr.f32.mxu1 %v2499_v3  ;;  %2247 = vmatpush1.bf16.msra.mxu1 %v2608_v14 }
 0x9b1   :  { %2249 = vmatprep.subr.bf16.mxu1 %v2612_v15 }
 0x9b2   :  { %v1023_v32 = vpop.permute.xlu0 %1022 }
 0x9b3   :  { %2024 = vmatmul.mubr.msk.f32.gmra.mrb[20].mxu1 %vm80_vm0, %v1023_v32 }
 0x9b4   :  { %1116 = vmatprep.mubr.f32.mxu1 %v2499_v3  ;;  %2251 = vmatpush1.bf16.msra.mxu1 %v2628_v20  ;;  %v2016_v20 = vld [vmem:[%s3290_s0 + $0x150] sm:$0xff] }
 0x9b5   :  { %2253 = vmatprep.subr.bf16.mxu1 %v2632_v21 }
 0x9b6   :  { %v1025_v8 = vpop.permute.xlu1 %1024 }
 0x9b7   :  { %2025 = vmatmul.mubr.msk.f32.gmra.mrb[22].mxu1 %vm80_vm0, %v1025_v8 }
 0x9b8   :  { %2255 = vmatpush1.bf16.msra.mxu1 %v2642_v24  ;;  %1478 = vmatprep.mubr.f32.mxu1 %v2499_v3 }
 0xa7e   :  { %v1100_v14 = vpop.f32.mrb[16].mxu1 }
 0xa7f   :  { %v1101_v15 = vadd.f32 %v1100_v14, %v2670_v29  ;;  %v1102_v1 = vpop.f32.mrb[17].mxu1 }
 0xa80   :  { %v1103_v35 = vadd.f32 %v1102_v1, %v2688_v60 }
 0xa81   :  { %v1123_v2 = vadd.f32 %v2014_v9, %v1101_v15 }
 0xa82   :  { %v1106_v21 = vpop.f32.mrb[18].mxu1 }
 0xa83   :  { %v2026_v5 = vmul.f32 -1.442695, %v1123_v2  ;;  %v1107_v6 = vadd.f32 %v1106_v21, %v2670_v29  ;;  %v1108_v24 = vpop.f32.mrb[19].mxu1 }
 0xa84   :  { %v1109_v42 = vadd.f32 %v1108_v24, %v2688_v60 }
 0xa85   :  { %2395 = vpow2.f32 %v2026_v5  ;;  %v1124_v7 = vadd.f32 %v2016_v20, %v1107_v6 }
 0xa86   :  { %v1112_v12 = vpop.f32.mrb[20].mxu1 }
 0xa87   :  { %v2027_v13 = vmul.f32 -1.442695, %v1124_v7  ;;  %v1113_v16 = vadd.f32 %v1112_v12, %v2670_v29  ;;  %v1114_v18 = vpop.f32.mrb[21].mxu1 }
 0xa88   :  { %v1115_v52 = vadd.f32 %v1114_v18, %v2688_v60 }
 0xa89   :  { %2397 = vpow2.f32 %v2027_v13  ;;  %v1125_v19 = vadd.f32 %v2018_v11, %v1113_v16 }
 0xa8a   :  { %v1118_v23 = vpop.f32.mrb[22].mxu1 }
 0xa8b   :  { %v2028_v26 = vmul.f32 -1.442695, %v1125_v19  ;;  %v1119_v43 = vadd.f32 %v1118_v23, %v2670_v29  ;;  %v1120_v27 = vpop.f32.mrb[23].mxu1 }
 0xa8c   :  { %v1121_v17 = vadd.f32 %v1120_v27, %v2688_v60 }
 0xa8d   :  { %2399 = vpow2.f32 %v2028_v26  ;;  %v1126_v48 = vadd.f32 %v2020_v22, %v1119_v43  ;;  %v2030_v26 = vld [vmem:[%s3290_s0 + $0x180] sm:$0xff] }
 0xa8f   :  { %v2396_v30 = vpop.eup %2395  ;;  %v2029_v53 = vmul.f32 -1.442695, %v1126_v48 }
 0xa90   :  { %v1139_v51 = vadd.f32 1.0, %v2396_v30 }
 0xa91   :  { %2401 = vpow2.f32 %v2029_v53  ;;  %v2032_v53 = vld [vmem:[%s3290_s0 + $0x190] sm:$0xff] }
 0xa92   :  { %2403 = vrcp.f32 %v1139_v51 }
 0xa93   :  { %v2398_v31 = vpop.eup %2397 }
 0xa94   :  { %v1140_v10 = vadd.f32 1.0, %v2398_v31 }
 0xa96   :  { %2405 = vrcp.f32 %v1140_v10 }
 0xa97   :  { %v2400_v33 = vpop.eup %2399 }
 0xa98   :  { %v1141_v61 = vadd.f32 1.0, %v2400_v33 }
 0xa9a   :  { %2407 = vrcp.f32 %v1141_v61 }
 0xa9b   :  { %v2402_v34 = vpop.eup %2401 }
 0xa9c   :  { %v2404_v36 = vpop.eup %2403  ;;  %v1142_v39 = vadd.f32 1.0, %v2402_v34  ;;  %v2034_v34 = vld [vmem:[%s3290_s0 + $0x1a0] sm:$0xff] }
 0xa9d   :  { %v1151_v40 = vmul.f32 %v2404_v36, %v1103_v35  ;;  %v1163_v8 = vsub.f32 1.0, %v2404_v36  ;;  %v1187_v14 = vmul.f32 %v2404_v36, %v2994_v49 }
 0xa9e   :  { %2409 = vrcp.f32 %v1142_v39 }
 0xa9f   :  { %v1155_v41 = vadd.f32 %v2015_v37, %v1151_v40 }
 0xaa0   :  { %v2406_v44 = vpop.eup %2405 }
 0xaa1   :  { %2411 = vtanh.f32 %v1155_v41  ;;  %v1152_v47 = vmul.f32 %v2406_v44, %v1109_v42  ;;  %v1164_v2 = vsub.f32 1.0, %v2406_v44  ;;  %v1188_v21 = vmul.f32 %v2406_v44, %v2999_v56  ;;  %v2036_v41 = vld [vmem:[%s3290_s0 + $0x1b0] sm:$0xff] }
 0xaa3   :  { %v1156_v50 = vadd.f32 %v2017_v46, %v1152_v47 }
 0xaa4   :  { %v2408_v54 = vpop.eup %2407 }
 0xaa5   :  { %2413 = vtanh.f32 %v1156_v50  ;;  %v1153_v57 = vmul.f32 %v2408_v54, %v1115_v52  ;;  %v1165_v24 = vsub.f32 1.0, %v2408_v54  ;;  %v1189_v11 = vmul.f32 %v2408_v54, %v3004_v4 }
 0xaa7   :  { %v1157_v58 = vadd.f32 %v2019_v55, %v1153_v57 }
 0xaa8   :  { %v2410_v59 = vpop.eup %2409 }
 0xaa9   :  { %2415 = vtanh.f32 %v1157_v58  ;;  %v1154_v62 = vmul.f32 %v2410_v59, %v1121_v17  ;;  %v1166_v13 = vsub.f32 1.0, %v2410_v59  ;;  %v1190_v56 = vmul.f32 %v2410_v59, %v3009_v63 }
 0xaab   :  { %v2412_v25 = vpop.eup %2411  ;;  %v1158_v28 = vadd.f32 %v2021_v38, %v1154_v62 }
 0xaac   :  { %1171 = vrot.lane.b32.xlu0 %v2412_v25, %s2500_s15 }
 0xaad   :  { %2417 = vtanh.f32 %v1158_v28  ;;  %v2031_v28 = vld [vmem:[%s3290_s0 + $0x188] sm:$0xff] }
 0xaaf   :  { %v2414_v45 = vpop.eup %2413 }
 0xab0   :  { %1173 = vrot.lane.b32.xlu1 %v2414_v45, %s2500_s15 }
 0xab3   :  { %v2416_v0 = vpop.eup %2415 }
 0xab4   :  { %1175 = vrot.lane.b32.xlu0 %v2416_v0, %s2500_s15 }
 0xab7   :  { %v2418_v32 = vpop.eup %2417 }
 0xab8   :  { %1177 = vrot.lane.b32.xlu1 %v2418_v32, %s2500_s15 }
 0xb1e   :  { %v1172_v9 = vpop.permute.xlu0 %1171 }
 0xb1f   :  { %v1183_v15 = vmul.f32 %v1172_v9, %v1163_v8 }
 0xb21   :  { %v3065_v1 = vadd.f32 %v1187_v14, %v1183_v15  ;;  %v2033_v14 = vld [vmem:[%s3290_s0 + $0x198] sm:$0xff] }
 0xb22   :  { %v1174_v20 = vpop.permute.xlu1 %1173 }
 0xb23   :  { %v1184_v5 = vmul.f32 %v1174_v20, %v1164_v2  ;;  %1208 = vrot.lane.b32.xlu0 %v3065_v1, %s2500_s15 }
 0xb25   :  { %v3070_v6 = vadd.f32 %v1188_v21, %v1184_v5  ;;  %v2035_v5 = vld [vmem:[%s3290_s0 + $0x1a8] sm:$0xff] }
 0xb26   :  { %v1176_v7 = vpop.permute.xlu0 %1175 }
 0xb27   :  { %v1185_v12 = vmul.f32 %v1176_v7, %v1165_v24  ;;  %1210 = vrot.lane.b32.xlu1 %v3070_v6, %s2500_s15 }
 0xb29   :  { %v3075_v49 = vadd.f32 %v1189_v11, %v1185_v12 }
 0xb2a   :  { %v1178_v16 = vpop.permute.xlu1 %1177 }
 0xb2b   :  { %v1186_v18 = vmul.f32 %v1178_v16, %v1166_v13  ;;  %1212 = vrot.lane.b32.xlu0 %v3075_v49, %s2500_s15  ;;  %v2037_v13 = vld [vmem:[%s3290_s0 + $0x1b8] sm:$0xff] }
 0xb2d   :  { %v3080_v19 = vadd.f32 %v1190_v56, %v1186_v18 }
 0xb2f   :  { %1214 = vrot.lane.b32.xlu1 %v3080_v19, %s2500_s15 }
 0xb95   :  { %v1209_v4 = vpop.permute.xlu0 %1208 }
 0xb96   :  { %2038 = vmatmul.mubr.msk.f32.vlgmr.msra.gmra.mrb[24].mxu0 %vm80_vm0, %v1209_v4 }
 0xb97   :  { %1294 = vmatprep.mubr.f32.mxu0 %v2499_v3 }
 0xb99   :  { %v1211_v22 = vpop.permute.xlu1 %1210 }
 0xb9a   :  { %2039 = vmatmul.mubr.msk.f32.gmra.mrb[26].mxu0 %vm80_vm0, %v1211_v22 }
 0xb9b   :  { %1300 = vmatprep.mubr.f32.mxu0 %v2499_v3 }
 0xb9d   :  { %v1213_v63 = vpop.permute.xlu0 %1212 }
 0xb9e   :  { %2040 = vmatmul.mubr.msk.f32.gmra.mrb[28].mxu0 %vm80_vm0, %v1213_v63 }
 0xb9f   :  { %1306 = vmatprep.mubr.f32.mxu0 %v2499_v3 }
 0xba1   :  { %v1215_v23 = vpop.permute.xlu1 %1214 }
 0xba2   :  { %2041 = vmatmul.mubr.msk.f32.gmra.mrb[30].mxu0 %vm80_vm0, %v1215_v23 }
 0xc69   :  { %v1290_v43 = vpop.f32.mrb[24].mxu0 }
 0xc6a   :  { %v1291_v27 = vadd.f32 %v1290_v43, %v2670_v29  ;;  %v1292_v48 = vpop.f32.mrb[25].mxu0 }
 0xc6b   :  { %v1293_v62 = vadd.f32 %v1292_v48, %v2688_v60 }
 0xc6c   :  { %v1313_v30 = vadd.f32 %v2030_v26, %v1291_v27 }
 0xc6d   :  { %v1296_v51 = vpop.f32.mrb[26].mxu0 }
 0xc6e   :  { %v2042_v31 = vmul.f32 -1.442695, %v1313_v30  ;;  %v1297_v10 = vadd.f32 %v1296_v51, %v2670_v29  ;;  %v1298_v33 = vpop.f32.mrb[27].mxu0 }
 0xc6f   :  { %v1299_v8 = vadd.f32 %v1298_v33, %v2688_v60 }
 0xc70   :  { %2419 = vpow2.f32 %v2042_v31  ;;  %v1314_v61 = vadd.f32 %v2032_v53, %v1297_v10 }
 0xc71   :  { %v1302_v35 = vpop.f32.mrb[28].mxu0 }
 0xc72   :  { %v2043_v36 = vmul.f32 -1.442695, %v1314_v61  ;;  %v1303_v37 = vadd.f32 %v1302_v35, %v2670_v29  ;;  %v1304_v39 = vpop.f32.mrb[29].mxu0 }
 0xc73   :  { %v1305_v20 = vadd.f32 %v1304_v39, %v2688_v60 }
 0xc74   :  { %2421 = vpow2.f32 %v2043_v36  ;;  %v1315_v40 = vadd.f32 %v2034_v34, %v1303_v37 }
 0xc75   :  { %v1308_v42 = vpop.f32.mrb[30].mxu0 }
 0xc76   :  { %v2044_v44 = vmul.f32 -1.442695, %v1315_v40  ;;  %v1309_v46 = vadd.f32 %v1308_v42, %v2670_v29  ;;  %v1310_v47 = vpop.f32.mrb[31].mxu0 }
 0xc77   :  { %v1311_v11 = vadd.f32 %v1310_v47, %v2688_v60 }
 0xc78   :  { %2423 = vpow2.f32 %v2044_v44  ;;  %v1316_v50 = vadd.f32 %v2036_v41, %v1309_v46  ;;  %v2046_v44 = vld [vmem:[%s3290_s0 + $0x1c0] sm:$0xff] }
 0xc7a   :  { %v2420_v52 = vpop.eup %2419  ;;  %v2045_v54 = vmul.f32 -1.442695, %v1316_v50 }
 0xc7b   :  { %v1329_v55 = vadd.f32 1.0, %v2420_v52 }
 0xc7c   :  { %2425 = vpow2.f32 %v2045_v54  ;;  %v2048_v54 = vld [vmem:[%s3290_s0 + $0x1d0] sm:$0xff] }
 0xc7d   :  { %2427 = vrcp.f32 %v1329_v55 }
 0xc7e   :  { %v2422_v57 = vpop.eup %2421 }
 0xc7f   :  { %v1330_v58 = vadd.f32 1.0, %v2422_v57 }
 0xc81   :  { %2429 = vrcp.f32 %v1330_v58 }
 0xc82   :  { %v2424_v17 = vpop.eup %2423 }
 0xc83   :  { %v1331_v59 = vadd.f32 1.0, %v2424_v17 }
 0xc85   :  { %2431 = vrcp.f32 %v1331_v59  ;;  %v2050_v59 = vld [vmem:[%s3290_s0 + $0x1e0] sm:$0xff] }
 0xc86   :  { %v2426_v38 = vpop.eup %2425 }
 0xc87   :  { %v2428_v25 = vpop.eup %2427  ;;  %v1332_v45 = vadd.f32 1.0, %v2426_v38 }
 0xc88   :  { %v1341_v0 = vmul.f32 %v2428_v25, %v1293_v62  ;;  %v1353_v23 = vsub.f32 1.0, %v2428_v25  ;;  %v1377_v43 = vmul.f32 %v2428_v25, %v3065_v1 }
 0xc89   :  { %2433 = vrcp.f32 %v1332_v45 }
 0xc8a   :  { %v1345_v32 = vadd.f32 %v2031_v28, %v1341_v0  ;;  %v2052_v0 = vld [vmem:[%s3290_s0 + $0x1f0] sm:$0xff] }
 0xc8b   :  { %v2430_v9 = vpop.eup %2429 }
 0xc8c   :  { %2435 = vtanh.f32 %v1345_v32  ;;  %v1342_v15 = vmul.f32 %v2430_v9, %v1299_v8  ;;  %v1354_v30 = vsub.f32 1.0, %v2430_v9  ;;  %v1378_v51 = vmul.f32 %v2430_v9, %v3070_v6 }
 0xc8e   :  { %v1346_v2 = vadd.f32 %v2033_v14, %v1342_v15 }
 0xc8f   :  { %v2432_v21 = vpop.eup %2431 }
 0xc90   :  { %2437 = vtanh.f32 %v1346_v2  ;;  %v1343_v24 = vmul.f32 %v2432_v21, %v1305_v20  ;;  %v1355_v33 = vsub.f32 1.0, %v2432_v21  ;;  %v1379_v34 = vmul.f32 %v2432_v21, %v3075_v49 }
 0xc92   :  { %v1347_v7 = vadd.f32 %v2035_v5, %v1343_v24 }
 0xc93   :  { %v2434_v12 = vpop.eup %2433 }
 0xc94   :  { %2439 = vtanh.f32 %v1347_v7  ;;  %v1344_v16 = vmul.f32 %v2434_v12, %v1311_v11  ;;  %v1356_v36 = vsub.f32 1.0, %v2434_v12  ;;  %v1380_v6 = vmul.f32 %v2434_v12, %v3080_v19 }
 0xc96   :  { %v2436_v56 = vpop.eup %2435  ;;  %v1348_v18 = vadd.f32 %v2037_v13, %v1344_v16 }
 0xc97   :  { %1361 = vrot.lane.b32.xlu0 %v2436_v56, %s2500_s15 }
 0xc98   :  { %2441 = vtanh.f32 %v1348_v18 }
 0xc9a   :  { %v2438_v4 = vpop.eup %2437 }
 0xc9b   :  { %1363 = vrot.lane.b32.xlu1 %v2438_v4, %s2500_s15 }
 0xc9e   :  { %v2440_v22 = vpop.eup %2439 }
 0xc9f   :  { %1365 = vrot.lane.b32.xlu0 %v2440_v22, %s2500_s15 }
 0xca2   :  { %v2442_v63 = vpop.eup %2441 }
 0xca3   :  { %1367 = vrot.lane.b32.xlu1 %v2442_v63, %s2500_s15 }
 0xd09   :  { %v1362_v26 = vpop.permute.xlu0 %1361 }
 0xd0a   :  { %v1373_v27 = vmul.f32 %v1362_v26, %v1353_v23  ;;  %v2049_v23 = vld [vmem:[%s3290_s0 + $0x1d8] sm:$0xff] }
 0xd0c   :  { %v3128_v48 = vadd.f32 %v1377_v43, %v1373_v27 }
 0xd0d   :  { %v1364_v53 = vpop.permute.xlu1 %1363 }
 0xd0e   :  { %v1374_v31 = vmul.f32 %v1364_v53, %v1354_v30  ;;  %1398 = vrot.lane.b32.xlu0 %v3128_v48, %s2500_s15  ;;  %v2051_v53 = vld [vmem:[%s3290_s0 + $0x1e8] sm:$0xff] }
 0xd10   :  { %v3133_v10 = vadd.f32 %v1378_v51, %v1374_v31 }
 0xd11   :  { %v1366_v61 = vpop.permute.xlu0 %1365 }
 0xd12   :  { %v1375_v35 = vmul.f32 %v1366_v61, %v1355_v33  ;;  %1400 = vrot.lane.b32.xlu1 %v3133_v10, %s2500_s15 }
 0xd14   :  { %v3138_v1 = vadd.f32 %v1379_v34, %v1375_v35  ;;  %v2053_v34 = vld [vmem:[%s3290_s0 + $0x1f8] sm:$0xff] }
 0xd15   :  { %v1368_v37 = vpop.permute.xlu1 %1367 }
 0xd16   :  { %v1376_v39 = vmul.f32 %v1368_v37, %v1356_v36  ;;  %1402 = vrot.lane.b32.xlu0 %v3138_v1, %s2500_s15 }
 0xd18   :  { %v3143_v40 = vadd.f32 %v1380_v6, %v1376_v39  ;;  %v1755_v39 = vld [vmem:[%s3291_s7] sm:$0xff] }
 0xd1a   :  { %1404 = vrot.lane.b32.xlu1 %v3143_v40, %s2500_s15 }
 0xd80   :  { %v1399_v49 = vpop.permute.xlu0 %1398 }
 0xd81   :  { %2054 = vmatmul.mubr.msk.f32.vlgmr.msra.gmra.mrb[24].mxu1 %vm80_vm0, %v1399_v49  ;;  %v1575_v49 = vld [vmem:[%s3292_s3] sm:$0xff] }
 0xd82   :  { %1484 = vmatprep.mubr.f32.mxu1 %v2499_v3 }
 0xd84   :  { %v1401_v41 = vpop.permute.xlu1 %1400 }
 0xd85   :  { %2055 = vmatmul.mubr.msk.f32.gmra.mrb[26].mxu1 %vm80_vm0, %v1401_v41 }
 0xd86   :  { %1490 = vmatprep.mubr.f32.mxu1 %v2499_v3 }
 0xd88   :  { %v1403_v19 = vpop.permute.xlu0 %1402 }
 0xd89   :  { %2056 = vmatmul.mubr.msk.f32.gmra.mrb[28].mxu1 %vm80_vm0, %v1403_v19  ;;  %v1576_v19 = vld [vmem:[%s3292_s3 + $0x8] sm:$0xff] }
 0xd8a   :  { %1496 = vmatprep.mubr.f32.mxu1 %v2499_v3 }
 0xd8c   :  { %v1405_v42 = vpop.permute.xlu1 %1404 }
 0xd8d   :  { %2057 = vmatmul.mubr.msk.f32.gmra.mrb[30].mxu1 %vm80_vm0, %v1405_v42  ;;  %v1757_v42 = vld [vmem:[%s3291_s7 + $0x10] sm:$0xff] }
 0xe54   :  { %v1480_v46 = vpop.f32.mrb[24].mxu1 }
 0xe55   :  { %v1481_v47 = vadd.f32 %v1480_v46, %v2670_v29  ;;  %v1482_v50 = vpop.f32.mrb[25].mxu1  ;;  %v2256_v46 = vpack.c.bf16 %v1576_v19, %v1575_v49 }
 0xe56   :  { %v1483_v13 = vadd.f32 %v1482_v50, %v2688_v60  ;;  %v1577_v50 = vld [vmem:[%s3292_s3 + $0x10] sm:$0xff] }
 0xe57   :  { %v1503_v52 = vadd.f32 %v2046_v44, %v1481_v47  ;;  %v1758_v44 = vld [vmem:[%s3291_s7 + $0x18] sm:$0xff]  ;;  %2257 = vmatprep.subr.bf16.mxu0 %v2256_v46 }
 0xe58   :  { %v1486_v55 = vpop.f32.mrb[26].mxu1  ;;  %v2268_v47 = vpack.c.bf16 %v1758_v44, %v1757_v42  ;;  %2259 = vmatpush3.bf16.msra.mxu0 %v2256_v46 }
 0xe59   :  { %v2058_v57 = vmul.f32 -1.442695, %v1503_v52  ;;  %v1487_v3 = vadd.f32 %v1486_v55, %v2670_v29  ;;  %v1488_v58 = vpop.f32.mrb[27].mxu1  ;;  %v1578_v52 = vld [vmem:[%s3292_s3 + $0x18] sm:$0xff]  ;;  %s2501_s3 = smov 32  }
 0xe5a   :  { %v1489_v22 = vadd.f32 %v1488_v58, %v2688_v60  ;;  %v2260_v55 = vpack.c.bf16 %v1578_v52, %v1577_v50 }
 0xe5b   :  { %2443 = vpow2.f32 %v2058_v57  ;;  %v1504_v17 = vadd.f32 %v2048_v54, %v1487_v3 }
 0xe5c   :  { %v1492_v38 = vpop.f32.mrb[28].mxu1  ;;  %2261 = vmatprep.subr.bf16.mxu0 %v2260_v55 }
 0xe5d   :  { %v2059_v62 = vmul.f32 -1.442695, %v1504_v17  ;;  %v1493_v25 = vadd.f32 %v1492_v38, %v2670_v29  ;;  %v1494_v28 = vpop.f32.mrb[29].mxu1  ;;  %2263 = vmatpush3.bf16.msra.mxu0 %v2260_v55 }
 0xe5e   :  { %v1495_v27 = vadd.f32 %v1494_v28, %v2688_v60 }
 0xe5f   :  { %2445 = vpow2.f32 %v2059_v62  ;;  %v1505_v45 = vadd.f32 %v2050_v59, %v1493_v25 }
 0xe60   :  { %v1498_v32 = vpop.f32.mrb[30].mxu1 }
 0xe61   :  { %v2060_v8 = vmul.f32 -1.442695, %v1505_v45  ;;  %v1499_v9 = vadd.f32 %v1498_v32, %v2670_v29  ;;  %v1500_v14 = vpop.f32.mrb[31].mxu1  ;;  %v2047_v29 = vld [vmem:[%s3290_s0 + $0x1c8] sm:$0xff] }
 0xe62   :  { %v1501_v33 = vadd.f32 %v1500_v14, %v2688_v60  ;;  %v1756_v60 = vld [vmem:[%s3291_s7 + $0x8] sm:$0xff] }
 0xe63   :  { %2447 = vpow2.f32 %v2060_v8  ;;  %v1506_v15 = vadd.f32 %v2052_v0, %v1499_v9  ;;  %v2264_v41 = vpack.c.bf16 %v1756_v60, %v1755_v39 }
 0xe65   :  { %v2444_v2 = vpop.eup %2443  ;;  %v2061_v20 = vmul.f32 -1.442695, %v1506_v15  ;;  %2265 = vmatprep.subr.bf16.mxu1 %v2264_v41 }
 0xe66   :  { %v1519_v21 = vadd.f32 1.0, %v2444_v2  ;;  %2267 = vmatpush3.bf16.msra.mxu1 %v2264_v41 }
 0xe67   :  { %2449 = vpow2.f32 %v2061_v20  ;;  %2269 = vmatprep.subr.bf16.mxu1 %v2268_v47 }
 0xe68   :  { %2451 = vrcp.f32 %v1519_v21 }
 0xe69   :  { %v2446_v5 = vpop.eup %2445 }
 0xe6a   :  { %v1520_v24 = vadd.f32 1.0, %v2446_v5  ;;  %2271 = vmatpush3.bf16.msra.mxu1 %v2268_v47 }
 0xe6c   :  { %2453 = vrcp.f32 %v1520_v24 }
 0xe6d   :  { %v2448_v7 = vpop.eup %2447 }
 0xe6e   :  { %v1521_v11 = vadd.f32 1.0, %v2448_v7 }
 0xe70   :  { %2455 = vrcp.f32 %v1521_v11 }
 0xe71   :  { %v2450_v12 = vpop.eup %2449 }
 0xe72   :  { %v2452_v16 = vpop.eup %2451  ;;  %v1522_v56 = vadd.f32 1.0, %v2450_v12 }
 0xe73   :  { %v1531_v18 = vmul.f32 %v2452_v16, %v1483_v13  ;;  %v1543_v3 = vsub.f32 1.0, %v2452_v16  ;;  %v1567_v17 = vmul.f32 %v2452_v16, %v3128_v48  ;;  %v18_v16 = vstv %s3293_s6 }
 0xe74   :  { %2457 = vrcp.f32 %v1522_v56  ;;  %19 = vst [vmem:[#allocation2] sm:$0x1] %v18_v16  ;;  %v2073_v56 = vld [vmem:[%s3295_s8] ss:$0 sm:$0xff] }
 0xe75   :  { %v1535_v4 = vadd.f32 %v2047_v29, %v1531_v18  ;;  %v2062_v29 = vld [vmem:[%s3294_s4] ss:$0 sm:$0xff] }
 0xe76   :  { %v2454_v63 = vpop.eup %2453 }
 0xe77   :  { %2459 = vtanh.f32 %v1535_v4  ;;  %v1532_v26 = vmul.f32 %v2454_v63, %v1489_v22  ;;  %v1544_v62 = vsub.f32 1.0, %v2454_v63  ;;  %v1568_v28 = vmul.f32 %v2454_v63, %v3133_v10 }
 0xe79   :  { %v1536_v43 = vadd.f32 %v2049_v23, %v1532_v26 }
 0xe7a   :  { %v2456_v30 = vpop.eup %2455 }
 0xe7b   :  { %2461 = vtanh.f32 %v1536_v43  ;;  %v1533_v51 = vmul.f32 %v2456_v30, %v1495_v27  ;;  %v1545_v32 = vsub.f32 1.0, %v2456_v30  ;;  %v1569_v9 = vmul.f32 %v2456_v30, %v3138_v1  ;;  %v2078_v30 = vld [vmem:[%s3296_s9] ss:$0 sm:$0xff] }
 0xe7d   :  { %v1537_v31 = vadd.f32 %v2051_v53, %v1533_v51  ;;  %v2067_v53 = vld [vmem:[%s3297_s5] ss:$0 sm:$0xff] }
 0xe7e   :  { %v2458_v61 = vpop.eup %2457 }
 0xe7f   :  { %2463 = vtanh.f32 %v1537_v31  ;;  %v1534_v35 = vmul.f32 %v2458_v61, %v1501_v33  ;;  %v1546_v15 = vsub.f32 1.0, %v2458_v61  ;;  %v1570_v20 = vmul.f32 %v2458_v61, %v3143_v40 }
 0xe81   :  { %v2460_v36 = vpop.eup %2459  ;;  %v1538_v37 = vadd.f32 %v2053_v34, %v1534_v35 }
 0xe82   :  { %1551 = vrot.lane.b32.xlu0 %v2460_v36, %s2500_s15 }
 0xe83   :  { %2465 = vtanh.f32 %v1538_v37 }
 0xe85   :  { %v2462_v6 = vpop.eup %2461 }
 0xe86   :  { %1553 = vrot.lane.b32.xlu1 %v2462_v6, %s2500_s15 }
 0xe89   :  { %v2464_v54 = vpop.eup %2463 }
 0xe8a   :  { %1555 = vrot.lane.b32.xlu0 %v2464_v54, %s2500_s15 }
 0xe8d   :  { %v2466_v57 = vpop.eup %2465 }
 0xe8e   :  { %1557 = vrot.lane.b32.xlu1 %v2466_v57, %s2500_s15 }
 0xef4   :  { %v1552_v58 = vpop.permute.xlu0 %1551 }
 0xef5   :  { %v1563_v59 = vmul.f32 %v1552_v58, %v1543_v3  ;;  %v20_v58 = vstv %s3298_s10 }
 0xef6   :  { %21 = vst [vmem:[#allocation3] sm:$0x1] %v20_v58 }
 0xef7   :  { %v1571_v38 = vadd.f32 %v1567_v17, %v1563_v59 }
 0xef8   :  { %v1554_v25 = vpop.permute.xlu1 %1553 }
 0xef9   :  { %v1564_v45 = vmul.f32 %v1554_v25, %v1544_v62  ;;  %1766 = vrot.lane.b32.xlu1 %v1571_v38, %s2501_s3  ;;  %1590 = vrot.lane.b32.xlu0 %v1571_v38, %s2500_s15 }
 0xefb   :  { %v1572_v0 = vadd.f32 %v1568_v28, %v1564_v45 }
 0xefc   :  { %v1556_v8 = vpop.permute.xlu0 %1555 }
 0xefd   :  { %v1565_v14 = vmul.f32 %v1556_v8, %v1545_v32  ;;  %1768 = vrot.lane.b32.xlu1 %v1572_v0, %s2501_s3  ;;  %1592 = vrot.lane.b32.xlu0 %v1572_v0, %s2500_s15  ;;  %v2068_v32 = vld [vmem:[#allocation2] ss:$0 sm:$0xff]  ;;  %v2079_v8 = vld [vmem:[#allocation3] ss:$0 sm:$0xff] }
 0xeff   :  { %v1573_v48 = vadd.f32 %v1569_v9, %v1565_v14 }
 0xf00   :  { %v1558_v2 = vpop.permute.xlu1 %1557 }
 0xf01   :  { %v1566_v10 = vmul.f32 %v1558_v2, %v1546_v15  ;;  %1770 = vrot.lane.b32.xlu1 %v1573_v48, %s2501_s3  ;;  %1594 = vrot.lane.b32.xlu0 %v1573_v48, %s2500_s15 }
 0xf03   :  { %v1574_v21 = vadd.f32 %v1570_v20, %v1566_v10 }
 0xf05   :  { %1772 = vrot.lane.b32.xlu1 %v1574_v21, %s2501_s3  ;;  %1596 = vrot.lane.b32.xlu0 %v1574_v21, %s2500_s15 }
 0xf6b   :  { %v1767_v5 = vpop.permute.xlu1 %1766  ;;  %v1591_v1 = vpop.permute.xlu0 %1590 }
 0xf6c   :  { %2108 = vmatprep.mubr.msk.f32.mxu0 %vm1598_vm1, %v1591_v1  ;;  %2122 = vmatprep.mubr.msk.f32.mxu1 %vm1598_vm1, %v1767_v5 }
 0xf6f   :  { %v1769_v24 = vpop.permute.xlu1 %1768  ;;  %v1593_v7 = vpop.permute.xlu0 %1592 }
 0xf70   :  { %2109 = vmatmul.mubr.msk.f32.vlgmr.msra.gmra.mrb[32].mxu0 %vm1598_vm1, %v1593_v7  ;;  %2123 = vmatmul.mubr.msk.f32.vlgmr.msra.gmra.mrb[32].mxu1 %vm1598_vm1, %v1769_v24 }
 0xf73   :  { %v1771_v40 = vpop.permute.xlu1 %1770  ;;  %v1595_v11 = vpop.permute.xlu0 %1594 }
 0xf74   :  { %2111 = vmatprep.mubr.msk.f32.mxu0 %vm1598_vm1, %v1595_v11  ;;  %2125 = vmatprep.mubr.msk.f32.mxu1 %vm1598_vm1, %v1771_v40 }
 0xf77   :  { %v1773_v12 = vpop.permute.xlu1 %1772  ;;  %v1597_v13 = vpop.permute.xlu0 %1596 }
 0xf78   :  { %2112 = vmatmul.mubr.msk.f32.gmra.mrb[34].mxu0 %vm1598_vm1, %v1597_v13  ;;  %2126 = vmatmul.mubr.msk.f32.gmra.mrb[34].mxu1 %vm1598_vm1, %v1773_v12 }
0x1043   :  { %v2110_v18 = vpop.f32.mrb[32].mxu0  ;;  %v2124_v4 = vpop.f32.mrb[32].mxu1 }
0x1044   :  { %v1679_v22 = vadd.f32 %v2110_v18, %v2062_v29  ;;  %v1854_v63 = vadd.f32 %v2124_v4, %v2073_v56  ;;  %v1673_v23 = vpop.f32.mrb[33].mxu0  ;;  %v1848_v26 = vpop.f32.mrb[33].mxu1 }
0x1045   :  { %v1674_v43 = vadd.f32 %v2062_v29, %v1673_v23  ;;  %v1849_v27 = vadd.f32 %v2073_v56, %v1848_v26 }
0x1046   :  { %v1693_v51 = vmax.f32 %v1679_v22, 0.0  ;;  %v1868_v31 = vmax.f32 %v1854_v63, 0.0 }
0x1047   :  { %v1692_v33 = vmax.f32 %v1674_v43, 0.0  ;;  %v1867_v61 = vmax.f32 %v1849_v27, 0.0 }
0x1048   :  { %v1879_v34 = vmul.f32 %v2078_v30, %v1868_v31  ;;  %v1704_v35 = vmul.f32 %v2067_v53, %v1693_v51 }
0x1049   :  { %v1878_v6 = vmul.f32 %v2078_v30, %v1867_v61  ;;  %v1703_v39 = vmul.f32 %v2067_v53, %v1692_v33 }
0x104a   :  { %v1885_v36 = vsel %vm1707_vm2, %v1879_v34, 0.0  ;;  %v1711_v37 = vsel %vm1707_vm2, %v1704_v35, 0.0 }
0x104b   :  { %v2127_v60 = vpop.f32.mrb[34].mxu1  ;;  %1886 = vadd.xlane.f32.xlu0 %v1885_v36  ;;  %1712 = vadd.xlane.f32.xlu1 %v1711_v37  ;;  %v2113_v49 = vpop.f32.mrb[34].mxu0  ;;  %v1882_v52 = vsel %vm1707_vm2, %v1878_v6, 0.0  ;;  %v1708_v54 = vsel %vm1707_vm2, %v1703_v39, 0.0 }
0x104c   :  { %v1689_v41 = vadd.f32 %v2113_v49, %v2062_v29  ;;  %v1683_v19 = vpop.f32.mrb[35].mxu0  ;;  %v1858_v42 = vpop.f32.mrb[35].mxu1  ;;  %v1864_v47 = vadd.f32 %v2127_v60, %v2073_v56 }
0x104d   :  { %v1684_v44 = vadd.f32 %v2062_v29, %v1683_v19  ;;  %v1859_v46 = vadd.f32 %v2073_v56, %v1858_v42 }
0x104e   :  { %v1695_v50 = vmax.f32 %v1689_v41, 0.0  ;;  %v1870_v59 = vmax.f32 %v1864_v47, 0.0 }
0x104f   :  { %v1694_v55 = vmax.f32 %v1684_v44, 0.0  ;;  %v1869_v57 = vmax.f32 %v1859_v46, 0.0  ;;  %1883 = vadd.xlane.f32.xlu1 %v1882_v52  ;;  %1709 = vadd.xlane.f32.xlu0 %v1708_v54 }
0x1050   :  { %v1706_v3 = vmul.f32 %v2067_v53, %v1695_v50  ;;  %v1881_v45 = vmul.f32 %v2078_v30, %v1870_v59 }
0x1051   :  { %v1880_v17 = vmul.f32 %v2078_v30, %v1869_v57  ;;  %v1705_v62 = vmul.f32 %v2067_v53, %v1694_v55 }
0x1052   :  { %v1717_v38 = vsel %vm1707_vm2, %v1706_v3, 0.0  ;;  %v1891_v0 = vsel %vm1707_vm2, %v1881_v45, 0.0 }
0x1053   :  { %1718 = vadd.xlane.f32.xlu0 %v1717_v38  ;;  %v1888_v25 = vsel %vm1707_vm2, %v1880_v17, 0.0  ;;  %v1714_v28 = vsel %vm1707_vm2, %v1705_v62, 0.0 }
0x1054   :  { %1889 = vadd.xlane.f32.xlu1 %v1888_v25 }
0x1057   :  { %1715 = vadd.xlane.f32.xlu0 %v1714_v28 }
0x105b   :  { %1892 = vadd.xlane.f32.xlu0 %v1891_v0 }
0x10d8   :  { %v1713_v9 = vpop.xlane.xlu1 %1712  ;;  %v1887_v14 = vpop.xlane.xlu0 %1886 }
0x10d9   :  { %v1728_v48 = vadd.f32 %v2068_v32, %v1713_v9  ;;  %v1902_v15 = vadd.f32 %v2079_v8, %v1887_v14 }
0x10db   :  { %v2070_v2 = vmul.f32 -1.442695, %v1728_v48  ;;  %v2081_v20 = vmul.f32 -1.442695, %v1902_v15 }
0x10dc   :  { %v1884_v10 = vpop.xlane.xlu1 %1883  ;;  %v1710_v21 = vpop.xlane.xlu0 %1709 }
0x10dd   :  { %2467 = vpow2.f32 %v2070_v2  ;;  %v1901_v5 = vadd.f32 %v2079_v8, %v1884_v10  ;;  %v1727_v1 = vadd.f32 %v2068_v32, %v1710_v21 }
0x10de   :  { %2469 = vpow2.f32 %v2081_v20 }
0x10df   :  { %v2080_v24 = vmul.f32 -1.442695, %v1901_v5  ;;  %v2069_v7 = vmul.f32 -1.442695, %v1727_v1 }
0x10e0   :  { %v1719_v40 = vpop.xlane.xlu0 %1718 }
0x10e1   :  { %2471 = vpow2.f32 %v2080_v24  ;;  %v1730_v11 = vadd.f32 %v2068_v32, %v1719_v40  ;;  %v1890_v12 = vpop.xlane.xlu1 %1889 }
0x10e2   :  { %2473 = vpow2.f32 %v2069_v7  ;;  %v1903_v13 = vadd.f32 %v2079_v8, %v1890_v12 }
0x10e3   :  { %v2072_v16 = vmul.f32 -1.442695, %v1730_v11 }
0x10e4   :  { %v2082_v29 = vmul.f32 -1.442695, %v1903_v13  ;;  %v1716_v56 = vpop.xlane.xlu0 %1715 }
0x10e5   :  { %2475 = vpow2.f32 %v2072_v16  ;;  %v1729_v18 = vadd.f32 %v2068_v32, %v1716_v56 }
0x10e6   :  { %2477 = vpow2.f32 %v2082_v29 }
0x10e7   :  { %v2468_v4 = vpop.eup %2467  ;;  %v2071_v22 = vmul.f32 -1.442695, %v1729_v18 }
0x10e8   :  { %v2470_v63 = vpop.eup %2469  ;;  %v1744_v23 = vadd.f32 1.0, %v2468_v4  ;;  %v1893_v26 = vpop.xlane.xlu0 %1892 }
0x10e9   :  { %v1918_v43 = vadd.f32 1.0, %v2470_v63  ;;  %2479 = vpow2.f32 %v2071_v22  ;;  %v1904_v27 = vadd.f32 %v2079_v8, %v1893_v26 }
0x10ea   :  { %2481 = vrcp.f32 %v1744_v23 }
0x10eb   :  { %v2472_v30 = vpop.eup %2471  ;;  %2483 = vrcp.f32 %v1918_v43  ;;  %v2083_v53 = vmul.f32 -1.442695, %v1904_v27 }
0x10ec   :  { %v2474_v51 = vpop.eup %2473  ;;  %v1917_v31 = vadd.f32 1.0, %v2472_v30 }
0x10ed   :  { %v1743_v33 = vadd.f32 1.0, %v2474_v51  ;;  %2485 = vpow2.f32 %v2083_v53 }
0x10ee   :  { %2487 = vrcp.f32 %v1917_v31 }
0x10ef   :  { %v2476_v61 = vpop.eup %2475  ;;  %2489 = vrcp.f32 %v1743_v33 }
0x10f0   :  { %v2478_v34 = vpop.eup %2477  ;;  %v1746_v35 = vadd.f32 1.0, %v2476_v61 }
0x10f1   :  { %v1919_v36 = vadd.f32 1.0, %v2478_v34 }
0x10f2   :  { %2491 = vrcp.f32 %v1746_v35 }
0x10f3   :  { %v2480_v37 = vpop.eup %2479  ;;  %2493 = vrcp.f32 %v1919_v36 }
0x10f4   :  { %v2482_v6 = vpop.eup %2481  ;;  %v1745_v39 = vadd.f32 1.0, %v2480_v37 }
0x10f5   :  { %v2484_v60 = vpop.eup %2483  ;;  %1931 = vst.msk [vmem:[%s3299_s11 + $0x8] sm:$0xff] %vm1929_vm3, %v2482_v6 }
0x10f6   :  { %1935 = vst.msk [vmem:[%s3300_s12 + $0x8] sm:$0xff] %vm1929_vm3, %v2484_v60  ;;  %2495 = vrcp.f32 %v1745_v39 }
0x10f7   :  { %v2486_v49 = vpop.eup %2485 }
0x10f8   :  { %v2488_v41 = vpop.eup %2487  ;;  %v1920_v19 = vadd.f32 1.0, %v2486_v49 }
0x10f9   :  { %v2490_v42 = vpop.eup %2489  ;;  %1934 = vst.msk [vmem:[%s3300_s12] sm:$0xff] %vm1929_vm3, %v2488_v41 }
0x10fa   :  { %1930 = vst.msk [vmem:[%s3299_s11] sm:$0xff] %vm1929_vm3, %v2490_v42  ;;  %2497 = vrcp.f32 %v1920_v19 }
0x10fc   :  { %v2492_v44 = vpop.eup %2491 }
0x10fd   :  { %v2494_v46 = vpop.eup %2493  ;;  %1933 = vst.msk [vmem:[%s3299_s11 + $0x18] sm:$0xff] %vm1929_vm3, %v2492_v44 }
0x10fe   :  { %1936 = vst.msk [vmem:[%s3300_s12 + $0x10] sm:$0xff] %vm1929_vm3, %v2494_v46 }
0x1100   :  { %v2496_v47 = vpop.eup %2495 }
0x1101   :  { %1932 = vst.msk [vmem:[%s3299_s11 + $0x10] sm:$0xff] %vm1929_vm3, %v2496_v47 }
0x1104   :  { %v2498_v50 = vpop.eup %2497 }
0x1105   :  { %1937 = vst.msk [vmem:[%s3300_s12 + $0x18] sm:$0xff] %vm1929_vm3, %v2498_v50 }

// kernel: model_forward.4
= control target key start
LH: loop header
LB: loop body
LE: loop exit
PB: predicated region body
PF: predicated region fallthrough
CT: control target
= control target key end

     0   :  { %vm41_vm0 = vcmask 130048   ;;  %v1400_v3 = vmov 0.0|0.0   ;;  %vm1401_vm1 = vmmov 0   ;;  %v1402_v10 = vmov 0.0   ;;  %s1640_s0 = inlined_call_operand.vmem [shape: f32[16,16], index: 0, kind: input, shape index: {}]   ;;  %s1641_s1 = inlined_call_operand.vmem [shape: f32[16,96], index: 1, kind: input, shape index: {}]   ;;  %s1642_s2 = inlined_call_operand.vmem [shape: f32[1,96], index: 2, kind: input, shape index: {}]   ;;  %s1643_s3 = inlined_call_operand.vmem [shape: f32[32,96], index: 3, kind: input, shape index: {}]   ;;  %s1644_s4 = inlined_call_operand.vmem [shape: f32[1,96], index: 4, kind: input, shape index: {}]   ;;  %s1645_s5 = inlined_call_operand.vmem [shape: f32[32,16], index: 5, kind: input, shape index: {}]   ;;  %s1646_s6 = inlined_call_operand.vmem [shape: f32[1,16], index: 6, kind: input, shape index: {}]   ;;  %s1647_s7 = inlined_call_operand.vmem [shape: f32[2,16], index: 7, kind: input, shape index: {}]   ;;  %s1648_s8 = inlined_call_operand.hbm [shape: f32[2,16], index: 8, kind: output, shape index: {}]  }
   0x1   :  { %v123_v0 = vld [vmem:[%s1643_s3] sm:$0xff]  ;;  %v124_v1 = vld [vmem:[%s1643_s3 + $0x8] sm:$0xff]  ;;  %1264 = vmatprep.subr.bf16.mxu1 %v1400_v3  ;;  %v125_v6 = vld [vmem:[%s1643_s3 + $0x10] sm:$0xff]  ;;  %1169 = vmatprep.mubr.msk.f32.mxu1 %vm1401_vm1, %v1402_v10 }
   0x2   :  { %v32_v2 = vld [vmem:[%s1641_s1] sm:$0xff]  ;;  %v1461_v4 = vpack.c.bf16 %v124_v1, %v123_v0  ;;  %v33_v5 = vld [vmem:[%s1641_s1 + $0x8] sm:$0xff]  ;;  %v126_v7 = vld [vmem:[%s1643_s3 + $0x18] sm:$0xff] }
   0x3   :  { %v1260_v8 = vpack.c.bf16 %v33_v5, %v32_v2  ;;  %v30_v9 = vld [vmem:[%s1640_s0] sm:$0xff] }
   0x4   :  { %13 = vsyncpa [#allocation3], 0  ;;  %1266 = vmatpush3.bf16.msra.mxu1 %v1461_v4  ;;  %v1478_v11 = vpack.c.bf16 %v126_v7, %v125_v6  ;;  %1158 = vmatprep.mubr.msk.f32.mxu0 %vm41_vm0, %v30_v9  ;;  %v31_v12 = vld [vmem:[%s1640_s0 + $0x8] sm:$0xff]  ;;  %v1083_v14 = vld [vmem:[%s1642_s2] ss:$0 sm:$0xff]  ;;  %s1403_s22 = smov 64  }
   0x5   :  { %1261 = vmatprep.subr.bf16.mxu0 %v1260_v8  ;;  %1267 = vmatprep.subr.bf16.mxu1 %v1400_v3  ;;  %v1508_v15 = vld [vmem:[%s1644_s4] ss:$0 sm:$0xff]  ;;  %s1404_s2 = smov 96   ;;  %vm134_vm2 = vcmask 261120   ;;  %s1405_s11 = smov [#allocation2]   ;;  %vm1067_vm3 = vcmask 123904  }
   0x6   :  { %1263 = vmatpush3.bf16.msra.mxu0 %v1260_v8  ;;  %s1075_s12 = sshll.u32 %s1405_s11, 4  ;;  %s1076_s12 = int_to_ptr.vmem [resolvable:$true] %s1075_s12 }
   0x7   :  { %1270 = vmatprep.subr.bf16.mxu0 %v1400_v3  ;;  %p1381_p1 = scmp.lt.s32.totalorder %s1076_s12, %s1076_s12 }
   0x8   :  { %1269 = vmatpush3.bf16.msra.mxu1 %v1478_v11 }
   0x9   :  { %1159 = vmatmul.mubr.msk.f32.vlgmr.msra.gmra.mrb[0].mxu0 %vm41_vm0, %v31_v12  ;;  %1276 = vmatprep.subr.bf16.mxu1 %v1400_v3 }
   0xa   :  { %1272 = vmatpush3.bf16.msra.mxu0 %v1461_v4  ;;  %1180 = vmatprep.mubr.msk.f32.mxu0 %vm1401_vm1, %v1402_v10 }
   0xb   :  { %1170 = vmatmul.mubr.f32.vlgmr.msra.gmra.mrb[0].mxu1 %v1402_v10  ;;  %1273 = vmatprep.subr.bf16.mxu0 %v1400_v3 }
   0xc   :  { %1278 = vmatpush3.bf16.msra.mxu1 %v1461_v4  ;;  %1191 = vmatprep.mubr.msk.f32.mxu1 %vm1401_vm1, %v1402_v10 }
   0xd   :  { %1279 = vmatprep.subr.bf16.mxu1 %v1400_v3 }
   0xe   :  { %1275 = vmatpush3.bf16.msra.mxu0 %v1478_v11 }
   0xf   :  { %1282 = vmatprep.subr.bf16.mxu0 %v1400_v3 }
  0x10   :  { %1281 = vmatpush3.bf16.msra.mxu1 %v1478_v11 }
  0x11   :  { %1288 = vmatprep.subr.bf16.mxu1 %v1400_v3 }
  0xdc   :  { %v1160_v13 = vpop.f32.mrb[0].mxu0 }
  0xdd   :  { %v1510_v16 = vadd.f32 %v1160_v13, %v1083_v14  ;;  %v114_v17 = vpop.f32.mrb[1].mxu0 }
  0xde   :  { %v204_v18 = vpop.f32.mrb[0].mxu1  ;;  %v1514_v21 = vadd.f32 %v1083_v14, %v114_v17 }
  0xdf   :  { %v205_v19 = vadd.f32 %v1508_v15, %v204_v18  ;;  %v1171_v20 = vpop.f32.mrb[1].mxu1 }
  0xe1   :  { %216 = vrot.lane.b32.xlu0 %v205_v19, %s1403_s22  ;;  %v208_v22 = vadd.f32 %v205_v19, %v1514_v21 }
  0xe3   :  { %v1087_v23 = vmul.f32 -1.442695, %v208_v22 }
  0xe5   :  { %1324 = vpow2.f32 %v1087_v23 }
  0xef   :  { %v1325_v24 = vpop.eup %1324 }
  0xf0   :  { %v212_v25 = vadd.f32 1.0, %v1325_v24 }
  0xf2   :  { %1326 = vrcp.f32 %v212_v25 }
  0xfc   :  { %v1327_v26 = vpop.eup %1326 }
  0xfd   :  { %v226_v32 = vsub.f32 1.0, %v1327_v26  ;;  %v232_v34 = vmul.f32 0.0, %v1327_v26 }
 0x153   :  { %v217_v27 = vpop.permute.xlu0 %216 }
 0x154   :  { %v219_v28 = vmul.f32 %v1327_v26, %v217_v27 }
 0x156   :  { %221 = vrot.lane.b32.xlu0 %v219_v28, %s1403_s22 }
 0x1c8   :  { %v222_v29 = vpop.permute.xlu0 %221 }
 0x1c9   :  { %v224_v30 = vadd.f32 %v222_v29, %v1514_v21 }
 0x1cb   :  { %1328 = vtanh.f32 %v224_v30 }
 0x1d5   :  { %v1329_v31 = vpop.eup %1328 }
 0x1d6   :  { %228 = vrot.lane.b32.xlu1 %v1329_v31, %s1404_s2 }
 0x248   :  { %v229_v33 = vpop.permute.xlu1 %228 }
 0x249   :  { %v231_v35 = vmul.f32 %v229_v33, %v226_v32 }
 0x24b   :  { %v233_v36 = vadd.f32 %v232_v34, %v231_v35 }
 0x24d   :  { %235 = vrot.lane.b32.xlu1 %v233_v36, %s1404_s2  ;;  %v335_v52 = vrot.slane %v233_v36, 6 }
 0x2bf   :  { %v236_v37 = vpop.permute.xlu1 %235 }
 0x2c0   :  { %1181 = vmatmul.mubr.msk.f32.vlgmr.msra.gmra.mrb[2].mxu0 %vm134_vm2, %v236_v37 }
 0x2c1   :  { %1284 = vmatpush3.bf16.msra.mxu0 %v1461_v4  ;;  %1202 = vmatprep.mubr.msk.f32.mxu0 %vm1401_vm1, %v1402_v10 }
 0x2c2   :  { %1285 = vmatprep.subr.bf16.mxu0 %v1400_v3 }
 0x2c5   :  { %1287 = vmatpush3.bf16.msra.mxu0 %v1478_v11 }
 0x2c6   :  { %1294 = vmatprep.subr.bf16.mxu0 %v1400_v3 }
 0x393   :  { %v305_v38 = vpop.f32.mrb[2].mxu0 }
 0x394   :  { %v306_v39 = vadd.f32 %v1508_v15, %v305_v38  ;;  %v1182_v40 = vpop.f32.mrb[3].mxu0 }
 0x396   :  { %v310_v41 = vrot.slane %v306_v39, 6 }
 0x398   :  { %319 = vrot.lane.b32.xlu0 %v310_v41, %s1403_s22  ;;  %v312_v42 = vadd.f32 %v310_v41, %v1514_v21 }
 0x39a   :  { %v1089_v43 = vmul.f32 -1.442695, %v312_v42 }
 0x39c   :  { %1330 = vpow2.f32 %v1089_v43 }
 0x3a6   :  { %v1331_v44 = vpop.eup %1330 }
 0x3a7   :  { %v316_v45 = vadd.f32 1.0, %v1331_v44 }
 0x3a9   :  { %1332 = vrcp.f32 %v316_v45 }
 0x3b3   :  { %v1333_v46 = vpop.eup %1332 }
 0x3b4   :  { %v329_v53 = vsub.f32 1.0, %v1333_v46  ;;  %v337_v56 = vmul.f32 %v1333_v46, %v335_v52 }
 0x40a   :  { %v320_v47 = vpop.permute.xlu0 %319 }
 0x40b   :  { %v322_v48 = vmul.f32 %v1333_v46, %v320_v47 }
 0x40d   :  { %324 = vrot.lane.b32.xlu1 %v322_v48, %s1403_s22 }
 0x47f   :  { %v325_v49 = vpop.permute.xlu1 %324 }
 0x480   :  { %v327_v50 = vadd.f32 %v325_v49, %v1514_v21 }
 0x482   :  { %1334 = vtanh.f32 %v327_v50 }
 0x48c   :  { %v1335_v51 = vpop.eup %1334 }
 0x48d   :  { %331 = vrot.lane.b32.xlu0 %v1335_v51, %s1404_s2 }
 0x4ff   :  { %v332_v54 = vpop.permute.xlu0 %331 }
 0x500   :  { %v334_v55 = vmul.f32 %v332_v54, %v329_v53 }
 0x502   :  { %v338_v57 = vadd.f32 %v337_v56, %v334_v55 }
 0x504   :  { %v340_v58 = vrot.slane %v338_v57, 2  ;;  %v441_v14 = vrot.slane %v338_v57, 6 }
 0x506   :  { %341 = vrot.lane.b32.xlu1 %v340_v58, %s1404_s2 }
 0x578   :  { %v342_v59 = vpop.permute.xlu1 %341 }
 0x579   :  { %1192 = vmatmul.mubr.msk.f32.vlgmr.msra.gmra.mrb[2].mxu1 %vm134_vm2, %v342_v59 }
 0x57a   :  { %1290 = vmatpush3.bf16.msra.mxu1 %v1461_v4  ;;  %1213 = vmatprep.mubr.msk.f32.mxu1 %vm1401_vm1, %v1402_v10 }
 0x57b   :  { %1291 = vmatprep.subr.bf16.mxu1 %v1400_v3 }
 0x57e   :  { %1293 = vmatpush3.bf16.msra.mxu1 %v1478_v11 }
 0x57f   :  { %1300 = vmatprep.subr.bf16.mxu1 %v1400_v3 }
 0x64c   :  { %v411_v60 = vpop.f32.mrb[2].mxu1 }
 0x64d   :  { %v412_v61 = vadd.f32 %v1508_v15, %v411_v60  ;;  %v1193_v62 = vpop.f32.mrb[3].mxu1 }
 0x64f   :  { %v416_v63 = vrot.slane %v412_v61, 4 }
 0x651   :  { %425 = vrot.lane.b32.xlu0 %v416_v63, %s1403_s22  ;;  %v418_v0 = vadd.f32 %v416_v63, %v1514_v21 }
 0x653   :  { %v1091_v1 = vmul.f32 -1.442695, %v418_v0 }
 0x655   :  { %1336 = vpow2.f32 %v1091_v1 }
 0x65f   :  { %v1337_v2 = vpop.eup %1336 }
 0x660   :  { %v422_v5 = vadd.f32 1.0, %v1337_v2 }
 0x662   :  { %1338 = vrcp.f32 %v422_v5 }
 0x66c   :  { %v1339_v6 = vpop.eup %1338 }
 0x66d   :  { %v435_v17 = vsub.f32 1.0, %v1339_v6  ;;  %v443_v19 = vmul.f32 %v1339_v6, %v441_v14 }
 0x6c3   :  { %v426_v7 = vpop.permute.xlu0 %425 }
 0x6c4   :  { %v428_v8 = vmul.f32 %v1339_v6, %v426_v7 }
 0x6c6   :  { %430 = vrot.lane.b32.xlu1 %v428_v8, %s1403_s22 }
 0x738   :  { %v431_v9 = vpop.permute.xlu1 %430 }
 0x739   :  { %v433_v12 = vadd.f32 %v431_v9, %v1514_v21 }
 0x73b   :  { %1340 = vtanh.f32 %v433_v12 }
 0x745   :  { %v1341_v13 = vpop.eup %1340 }
 0x746   :  { %437 = vrot.lane.b32.xlu0 %v1341_v13, %s1404_s2 }
 0x7b8   :  { %v438_v18 = vpop.permute.xlu0 %437 }
 0x7b9   :  { %v440_v20 = vmul.f32 %v438_v18, %v435_v17 }
 0x7bb   :  { %v444_v22 = vadd.f32 %v443_v19, %v440_v20 }
 0x7bd   :  { %v446_v23 = vrot.slane %v444_v22, 4  ;;  %v547_v39 = vrot.slane %v444_v22, 6 }
 0x7bf   :  { %447 = vrot.lane.b32.xlu1 %v446_v23, %s1404_s2 }
 0x831   :  { %v448_v24 = vpop.permute.xlu1 %447 }
 0x832   :  { %1203 = vmatmul.mubr.msk.f32.vlgmr.msra.gmra.mrb[4].mxu0 %vm134_vm2, %v448_v24 }
 0x833   :  { %1296 = vmatpush3.bf16.msra.mxu0 %v1461_v4  ;;  %1224 = vmatprep.mubr.msk.f32.mxu0 %vm1401_vm1, %v1402_v10 }
 0x834   :  { %1297 = vmatprep.subr.bf16.mxu0 %v1400_v3 }
 0x837   :  { %1299 = vmatpush3.bf16.msra.mxu0 %v1478_v11 }
 0x838   :  { %1306 = vmatprep.subr.bf16.mxu0 %v1400_v3 }
 0x905   :  { %v517_v25 = vpop.f32.mrb[4].mxu0 }
 0x906   :  { %v518_v26 = vadd.f32 %v1508_v15, %v517_v25  ;;  %v1204_v27 = vpop.f32.mrb[5].mxu0 }
 0x908   :  { %v522_v28 = vrot.slane %v518_v26, 2 }
 0x90a   :  { %531 = vrot.lane.b32.xlu0 %v522_v28, %s1403_s22  ;;  %v524_v29 = vadd.f32 %v522_v28, %v1514_v21 }
 0x90c   :  { %v1093_v30 = vmul.f32 -1.442695, %v524_v29 }
 0x90e   :  { %1342 = vpow2.f32 %v1093_v30 }
 0x918   :  { %v1343_v31 = vpop.eup %1342 }
 0x919   :  { %v528_v32 = vadd.f32 1.0, %v1343_v31 }
 0x91b   :  { %1344 = vrcp.f32 %v528_v32 }
 0x925   :  { %v1345_v33 = vpop.eup %1344 }
 0x926   :  { %v541_v40 = vsub.f32 1.0, %v1345_v33  ;;  %v549_v42 = vmul.f32 %v1345_v33, %v547_v39 }
 0x97c   :  { %v532_v34 = vpop.permute.xlu0 %531 }
 0x97d   :  { %v534_v35 = vmul.f32 %v1345_v33, %v532_v34 }
 0x97f   :  { %536 = vrot.lane.b32.xlu1 %v534_v35, %s1403_s22 }
 0x9f1   :  { %v537_v36 = vpop.permute.xlu1 %536 }
 0x9f2   :  { %v539_v37 = vadd.f32 %v537_v36, %v1514_v21 }
 0x9f4   :  { %1346 = vtanh.f32 %v539_v37 }
 0x9fe   :  { %v1347_v38 = vpop.eup %1346 }
 0x9ff   :  { %543 = vrot.lane.b32.xlu0 %v1347_v38, %s1404_s2 }
 0xa71   :  { %v544_v41 = vpop.permute.xlu0 %543 }
 0xa72   :  { %v546_v43 = vmul.f32 %v544_v41, %v541_v40 }
 0xa74   :  { %v550_v44 = vadd.f32 %v549_v42, %v546_v43 }
 0xa76   :  { %v552_v45 = vrot.slane %v550_v44, 6 }
 0xa78   :  { %553 = vrot.lane.b32.xlu1 %v552_v45, %s1404_s2 }
 0xaea   :  { %v554_v46 = vpop.permute.xlu1 %553 }
 0xaeb   :  { %1214 = vmatmul.mubr.msk.f32.vlgmr.msra.gmra.mrb[4].mxu1 %vm134_vm2, %v554_v46 }
 0xaec   :  { %1302 = vmatpush3.bf16.msra.mxu1 %v1461_v4  ;;  %1235 = vmatprep.mubr.msk.f32.mxu1 %vm1401_vm1, %v1402_v10 }
 0xaed   :  { %1303 = vmatprep.subr.bf16.mxu1 %v1400_v3 }
 0xaf0   :  { %1305 = vmatpush3.bf16.msra.mxu1 %v1478_v11 }
 0xaf1   :  { %1312 = vmatprep.subr.bf16.mxu1 %v1400_v3 }
 0xbbe   :  { %v623_v21 = vpop.f32.mrb[4].mxu1 }
 0xbbf   :  { %v624_v47 = vadd.f32 %v1508_v15, %v623_v21  ;;  %v1215_v48 = vpop.f32.mrb[5].mxu1 }
 0xbc1   :  { %635 = vrot.lane.b32.xlu0 %v624_v47, %s1403_s22  ;;  %v627_v49 = vadd.f32 %v624_v47, %v1510_v16 }
 0xbc3   :  { %v1095_v50 = vmul.f32 -1.442695, %v627_v49 }
 0xbc5   :  { %1348 = vpow2.f32 %v1095_v50 }
 0xbcf   :  { %v1349_v51 = vpop.eup %1348 }
 0xbd0   :  { %v631_v52 = vadd.f32 1.0, %v1349_v51 }
 0xbd2   :  { %1350 = vrcp.f32 %v631_v52 }
 0xbdc   :  { %v1351_v53 = vpop.eup %1350 }
 0xbdd   :  { %v645_v59 = vsub.f32 1.0, %v1351_v53  ;;  %v652_v61 = vmul.f32 %v1351_v53, %v552_v45 }
 0xc33   :  { %v636_v54 = vpop.permute.xlu0 %635 }
 0xc34   :  { %v638_v55 = vmul.f32 %v1351_v53, %v636_v54 }
 0xc36   :  { %640 = vrot.lane.b32.xlu1 %v638_v55, %s1403_s22 }
 0xca8   :  { %v641_v56 = vpop.permute.xlu1 %640 }
 0xca9   :  { %v643_v57 = vadd.f32 %v641_v56, %v1510_v16 }
 0xcab   :  { %1352 = vtanh.f32 %v643_v57 }
 0xcb5   :  { %v1353_v58 = vpop.eup %1352 }
 0xcb6   :  { %647 = vrot.lane.b32.xlu0 %v1353_v58, %s1404_s2 }
 0xd28   :  { %v648_v60 = vpop.permute.xlu0 %647 }
 0xd29   :  { %v650_v62 = vmul.f32 %v648_v60, %v645_v59 }
 0xd2b   :  { %v653_v63 = vadd.f32 %v652_v61, %v650_v62  ;;  %v972_v61 = vld [vmem:[%s1645_s5 + $0x8] sm:$0xff]  ;;  %v973_v62 = vld [vmem:[%s1645_s5 + $0x10] sm:$0xff] }
 0xd2d   :  { %655 = vrot.lane.b32.xlu1 %v653_v63, %s1404_s2  ;;  %v755_v19 = vrot.slane %v653_v63, 6 }
 0xd9f   :  { %v656_v0 = vpop.permute.xlu1 %655 }
 0xda0   :  { %1225 = vmatmul.mubr.msk.f32.vlgmr.msra.gmra.mrb[6].mxu0 %vm134_vm2, %v656_v0  ;;  %v974_v0 = vld [vmem:[%s1645_s5 + $0x18] sm:$0xff] }
 0xda1   :  { %1308 = vmatpush3.bf16.msra.mxu0 %v1461_v4  ;;  %1246 = vmatprep.mubr.msk.f32.mxu0 %vm1401_vm1, %v1402_v10 }
 0xda2   :  { %1309 = vmatprep.subr.bf16.mxu0 %v1400_v3 }
 0xda5   :  { %1311 = vmatpush3.bf16.msra.mxu0 %v1478_v11 }
 0xe73   :  { %v725_v1 = vpop.f32.mrb[6].mxu0 }
 0xe74   :  { %v726_v2 = vadd.f32 %v1508_v15, %v725_v1  ;;  %v1226_v5 = vpop.f32.mrb[7].mxu0 }
 0xe76   :  { %v730_v6 = vrot.slane %v726_v2, 6 }
 0xe78   :  { %739 = vrot.lane.b32.xlu0 %v730_v6, %s1403_s22  ;;  %v732_v7 = vadd.f32 %v730_v6, %v1510_v16 }
 0xe7a   :  { %v1097_v8 = vmul.f32 -1.442695, %v732_v7 }
 0xe7c   :  { %1354 = vpow2.f32 %v1097_v8 }
 0xe86   :  { %v1355_v9 = vpop.eup %1354 }
 0xe87   :  { %v736_v4 = vadd.f32 1.0, %v1355_v9 }
 0xe89   :  { %1356 = vrcp.f32 %v736_v4 }
 0xe93   :  { %v1357_v12 = vpop.eup %1356 }
 0xe94   :  { %v749_v20 = vsub.f32 1.0, %v1357_v12  ;;  %v757_v24 = vmul.f32 %v1357_v12, %v755_v19 }
 0xeea   :  { %v740_v13 = vpop.permute.xlu0 %739 }
 0xeeb   :  { %v742_v14 = vmul.f32 %v1357_v12, %v740_v13 }
 0xeed   :  { %744 = vrot.lane.b32.xlu1 %v742_v14, %s1403_s22 }
 0xf5f   :  { %v745_v11 = vpop.permute.xlu1 %744 }
 0xf60   :  { %v747_v17 = vadd.f32 %v745_v11, %v1510_v16 }
 0xf62   :  { %1358 = vtanh.f32 %v747_v17  ;;  %v1059_v17 = vld [vmem:[%s1647_s7] sm:$0x3] }
 0xf6c   :  { %v1359_v18 = vpop.eup %1358 }
 0xf6d   :  { %751 = vrot.lane.b32.xlu0 %v1359_v18, %s1404_s2 }
 0xfdf   :  { %v752_v22 = vpop.permute.xlu0 %751 }
 0xfe0   :  { %v754_v23 = vmul.f32 %v752_v22, %v749_v20 }
 0xfe2   :  { %v758_v25 = vadd.f32 %v757_v24, %v754_v23 }
 0xfe4   :  { %v760_v26 = vrot.slane %v758_v25, 2  ;;  %v861_v41 = vrot.slane %v758_v25, 6 }
 0xfe6   :  { %761 = vrot.lane.b32.xlu1 %v760_v26, %s1404_s2 }
0x1058   :  { %v762_v27 = vpop.permute.xlu1 %761 }
0x1059   :  { %1236 = vmatmul.mubr.msk.f32.vlgmr.msra.gmra.mrb[6].mxu1 %vm134_vm2, %v762_v27 }
0x105a   :  { %1257 = vmatprep.mubr.msk.f32.mxu1 %vm1401_vm1, %v1402_v10 }
0x112c   :  { %v831_v28 = vpop.f32.mrb[6].mxu1 }
0x112d   :  { %v832_v29 = vadd.f32 %v1508_v15, %v831_v28  ;;  %v1237_v30 = vpop.f32.mrb[7].mxu1 }
0x112f   :  { %v836_v31 = vrot.slane %v832_v29, 4 }
0x1131   :  { %845 = vrot.lane.b32.xlu0 %v836_v31, %s1403_s22  ;;  %v838_v32 = vadd.f32 %v836_v31, %v1510_v16 }
0x1133   :  { %v1099_v33 = vmul.f32 -1.442695, %v838_v32 }
0x1135   :  { %1360 = vpow2.f32 %v1099_v33 }
0x113f   :  { %v1361_v34 = vpop.eup %1360 }
0x1140   :  { %v842_v35 = vadd.f32 1.0, %v1361_v34 }
0x1142   :  { %1362 = vrcp.f32 %v842_v35 }
0x114c   :  { %v1363_v36 = vpop.eup %1362 }
0x114d   :  { %v855_v42 = vsub.f32 1.0, %v1363_v36  ;;  %v863_v44 = vmul.f32 %v1363_v36, %v861_v41 }
0x11a3   :  { %v846_v37 = vpop.permute.xlu0 %845 }
0x11a4   :  { %v848_v38 = vmul.f32 %v1363_v36, %v846_v37 }
0x11a6   :  { %850 = vrot.lane.b32.xlu1 %v848_v38, %s1403_s22 }
0x1218   :  { %v851_v10 = vpop.permute.xlu1 %850 }
0x1219   :  { %v853_v39 = vadd.f32 %v851_v10, %v1510_v16 }
0x121b   :  { %1364 = vtanh.f32 %v853_v39 }
0x1225   :  { %v1365_v40 = vpop.eup %1364 }
0x1226   :  { %857 = vrot.lane.b32.xlu0 %v1365_v40, %s1404_s2 }
0x1298   :  { %v858_v43 = vpop.permute.xlu0 %857 }
0x1299   :  { %v860_v45 = vmul.f32 %v858_v43, %v855_v42 }
0x129b   :  { %v864_v46 = vadd.f32 %v863_v44, %v860_v45 }
0x129d   :  { %v866_v21 = vrot.slane %v864_v46, 4  ;;  %v967_v2 = vrot.slane %v864_v46, 6 }
0x129f   :  { %867 = vrot.lane.b32.xlu1 %v866_v21, %s1404_s2 }
0x1311   :  { %v868_v47 = vpop.permute.xlu1 %867 }
0x1312   :  { %1247 = vmatmul.mubr.msk.f32.vlgmr.msra.gmra.mrb[8].mxu0 %vm134_vm2, %v868_v47 }
0x13e5   :  { %v937_v48 = vpop.f32.mrb[8].mxu0 }
0x13e6   :  { %v938_v49 = vadd.f32 %v1508_v15, %v937_v48  ;;  %v1248_v50 = vpop.f32.mrb[9].mxu0  ;;  %v971_v15 = vld [vmem:[%s1645_s5] sm:$0xff] }
0x13e7   :  { %v1313_v63 = vpack.c.bf16 %v972_v61, %v971_v15 }
0x13e8   :  { %v942_v51 = vrot.slane %v938_v49, 2 }
0x13e9   :  { %1314 = vmatpush3.bf16.msra.mxu1 %v1313_v63 }
0x13ea   :  { %951 = vrot.lane.b32.xlu0 %v942_v51, %s1403_s22  ;;  %v944_v52 = vadd.f32 %v942_v51, %v1510_v16  ;;  %1315 = vmatprep.subr.bf16.mxu1 %v1400_v3  ;;  %v1102_v3 = vld [vmem:[%s1646_s6] ss:$0 sm:$0xff]  ;;  %s1376_s6 = scalar_lea.vmem %s1076_s12, 32 }
0x13eb   :  { %p1377_p0 = scmp.ne.s32.totalorder %s1076_s12, %s1376_s6  ;;  %p1382_p2 = scmp.lt.s32.totalorder %s1376_s6, %s1376_s6 }
0x13ec   :  { %v1101_v53 = vmul.f32 -1.442695, %v944_v52 }
0x13ed   :  { %p1383_p3 = por %p1382_p2, %p1381_p1 }
0x13ee   :  { %1366 = vpow2.f32 %v1101_v53 }
0x13ef   :  { %p1384_p4 = pnand %p1383_p3, %p1377_p0 }
0x13f8   :  { %v1367_v54 = vpop.eup %1366 }
0x13f9   :  { %v948_v55 = vadd.f32 1.0, %v1367_v54 }
0x13fb   :  { %1368 = vrcp.f32 %v948_v55 }
0x1405   :  { %v1369_v56 = vpop.eup %1368 }
0x1406   :  { %v961_v5 = vsub.f32 1.0, %v1369_v56  ;;  %v969_v7 = vmul.f32 %v1369_v56, %v967_v2 }
0x145c   :  { %v952_v57 = vpop.permute.xlu0 %951 }
0x145d   :  { %v954_v58 = vmul.f32 %v1369_v56, %v952_v57 }
0x145f   :  { %956 = vrot.lane.b32.xlu1 %v954_v58, %s1403_s22 }
0x14d1   :  { %v957_v59 = vpop.permute.xlu1 %956 }
0x14d2   :  { %v959_v60 = vadd.f32 %v957_v59, %v1510_v16  ;;  %v1316_v16 = vpack.c.bf16 %v974_v0, %v973_v62 }
0x14d4   :  { %1370 = vtanh.f32 %v959_v60  ;;  %1317 = vmatpush3.bf16.msra.mxu1 %v1316_v16 }
0x14de   :  { %v1371_v1 = vpop.eup %1370 }
0x14df   :  { %963 = vrot.lane.b32.xlu0 %v1371_v1, %s1404_s2 }
0x1551   :  { %v964_v6 = vpop.permute.xlu0 %963 }
0x1552   :  { %v966_v8 = vmul.f32 %v964_v6, %v961_v5 }
0x1554   :  { %v970_v9 = vadd.f32 %v969_v7, %v966_v8 }
0x1556   :  { %v983_v4 = vrot.slane %v970_v9, 6 }
0x1558   :  { %984 = vrot.lane.b32.xlu1 %v983_v4, %s1404_s2 }
0x15ca   :  { %v985_v12 = vpop.permute.xlu1 %984 }
0x15cb   :  { %1258 = vmatmul.mubr.msk.f32.vlgmr.msra.gmra.mrb[8].mxu1 %vm134_vm2, %v985_v12 }
0x169e   :  { %v1054_v13 = vpop.f32.mrb[8].mxu1 }
0x169f   :  { %v1055_v14 = vadd.f32 %v1102_v3, %v1054_v13  ;;  %v1259_v11 = vpop.f32.mrb[9].mxu1 }
0x16a1   :  { %v1058_v18 = vmul.f32 0.5, %v1055_v14 }
0x16a3   :  { %v1060_v19 = vadd.f32 %v1059_v17, %v1058_v18 }
0x16a5   :  { %v1104_v20 = vmul.f32 -1.442695, %v1060_v19 }
0x16a7   :  { %1372 = vpow2.f32 %v1104_v20 }
0x16b1   :  { %v1373_v22 = vpop.eup %1372 }
0x16b2   :  { %v1064_v23 = vadd.f32 1.0, %v1373_v22 }
0x16b4   :  { %1374 = vrcp.f32 %v1064_v23 }
0x16be   :  { %v1375_v24 = vpop.eup %1374 }
0x16bf   :  { %1068 = vst.msk [vmem:[#allocation2] sm:$0x3] %vm1067_vm3, %v1375_v24 }
0x16c0   :  { %1387 = shalt.err (!%p1384_p4)
}
0x16c1   :  { %s1388_s14 = scalar_lea.hbm %s1648_s8, 32 }
0x16c2   :  { %p1389_p5 = scmp.ne.s32.totalorder %s1648_s8, %s1388_s14  ;;  %p1392_p6 = scmp.lt.u32.totalorder %s1388_s14, %s1648_s8 }
0x16c4   :  { %p1394_p7 = pnand %p1392_p6, %p1389_p5 }
0x16c6   :  { %1397 = shalt.err (!%p1394_p7)
}
0x16c7   :  { %1078 = dma.vmem_to_hbm [thread:$0]  %s1076_s12, 32, %s1648_s8, [#allocation3]  }
0x16c8   :  { %1398 = dma.done.wait [#allocation3], 32  }
0x16c9   :  { %1399 = vsyncadd [#allocation3], 4294967264 }
0x16ca   :  { %1082 = vsyncpa [#allocation3], 1 }

</bundles_post_ra>
